<compile_context>
chip_gen: v7x
topology: tpu7x:2x2x1
jax: 0.10.0
libtpu: 0.0.40
codegen_flags: <defaults>
</compile_context>

<pallas_src>
import jax
import jax.numpy as jnp
from jax import lax
from jax.experimental import pallas as pl
from jax.experimental.pallas import tpu as pltpu

HIDDEN = 32       # hidden_size
T_STEPS = 3       # input_timesteps
F_IN = 4          # input_features
F_OUT = 1         # output_features
N_NODES = 16      # number of graph nodes
L_LSTM = 4        # LSTM num_layers
EPS = 1e-5        # LayerNorm eps (PyTorch default)


def _layernorm(h, gamma, beta):
    mu = jnp.mean(h, axis=-1, keepdims=True)
    var = jnp.mean((h - mu) ** 2, axis=-1, keepdims=True)
    return (h - mu) * lax.rsqrt(var + EPS) * gamma + beta


# ----------------------------------------------------------------------------
# Single fused kernel: GCN stack -> 4-layer LSTM -> head.
# x_ref is the timestep-major flattened node features [T*N, F_IN];
# abig_ref is block-diag(A_norm) = I_T (x) A_norm, shape [T*N, T*N].
# ----------------------------------------------------------------------------
def mpnn_lstm_kernel(x_ref, abig_ref,
                     w1_ref, b1_ref, g1_ref, be1_ref,
                     w2_ref, b2_ref, g2_ref, be2_ref,
                     w3_ref, b3_ref, g3_ref, be3_ref,
                     lstm_w_ref, lstm_b_ref,
                     w1a_ref, w1b_ref, bh1_ref,
                     w2h_ref, bh2_ref,
                     o_ref):
    x = x_ref[...]           # [T*N, F_IN]
    a_big = abig_ref[...]    # [T*N, T*N]

    # ---- GCN stack: 3 x [GCNConv -> ReLU -> LayerNorm], all T steps fused ---
    def gcn_layer(h, w, b, g, be):
        hw = jnp.dot(h, w, preferred_element_type=jnp.float32)          # [T*N, H]
        ah = jnp.dot(a_big, hw, preferred_element_type=jnp.float32) + b
        ah = jnp.maximum(ah, 0.0)                                        # ReLU
        # TODO(synk): F.dropout is identity here (inference mode)
        return _layernorm(ah, g, be)

    h = gcn_layer(x, w1_ref[...], b1_ref[...], g1_ref[...], be1_ref[...])
    h = gcn_layer(h, w2_ref[...], b2_ref[...], g2_ref[...], be2_ref[...])
    h = gcn_layer(h, w3_ref[...], b3_ref[...], g3_ref[...], be3_ref[...])

    # ---- 4-layer LSTM over T steps (batch = N nodes) ------------------------
    # Per layer: fused weight [2H, 4H] = [wih.T ; whh.T] with gate column
    # order (i, f, o, g); bias [1, 4H] = b_ih + b_hh (same permutation).
    seq = [h[t * N_NODES:(t + 1) * N_NODES, :] for t in range(T_STEPS)]
    h_t = jnp.zeros((N_NODES, HIDDEN), jnp.float32)
    for l in range(L_LSTM):                       # static unrolled layer loop
        w_l = lstm_w_ref[l]                       # [2H, 4H]
        b_l = lstm_b_ref[l]                       # [1, 4H]
        h_t = jnp.zeros((N_NODES, HIDDEN), jnp.float32)
        c_t = jnp.zeros((N_NODES, HIDDEN), jnp.float32)
        nxt = []
        for t in range(T_STEPS):                  # static unrolled time loop
            xh = jnp.concatenate([seq[t], h_t], axis=1)                  # [N, 2H]
            gates = jnp.dot(xh, w_l, preferred_element_type=jnp.float32) + b_l
            sig = jax.nn.sigmoid(gates[:, :3 * HIDDEN])   # i | f | o (one call)
            i_g = sig[:, 0:HIDDEN]
            f_g = sig[:, HIDDEN:2 * HIDDEN]
            o_g = sig[:, 2 * HIDDEN:3 * HIDDEN]
            g_g = jnp.tanh(gates[:, 3 * HIDDEN:])
            c_t = f_g * c_t + i_g * g_g
            h_t = o_g * jnp.tanh(c_t)
            nxt.append(h_t)
        seq = nxt                                  # becomes next layer's input
    h_last = jnp.maximum(h_t, 0.0)                 # F.relu(H[-1])

    # ---- head: cat([H, S]) @ W1 + b1 as split matmul ------------------------
    # S = X[:, :, 0].T in [N, T]; S @ W1b computed as sum_t S[:,t:t+1]*W1b[t,:]
    w1b = w1b_ref[...]                             # [T, H]
    s_part = jnp.zeros((N_NODES, HIDDEN), jnp.float32)
    for t in range(T_STEPS):
        s_part = s_part + x[t * N_NODES:(t + 1) * N_NODES, 0:1] * w1b[t:t + 1, :]

    h1 = (jnp.dot(h_last, w1a_ref[...], preferred_element_type=jnp.float32)
          + s_part + bh1_ref[...])
    h1 = jnp.maximum(h1, 0.0)
    out = jnp.dot(h1, w2h_ref[...], preferred_element_type=jnp.float32) + bh2_ref[...]
    # TODO(synk): F.dropout is identity here (inference mode)
    o_ref[...] = jax.nn.sigmoid(out)


# ----------------------------------------------------------------------------
# Wrapper
# ----------------------------------------------------------------------------
def mpnn_lstm_forward(X, A_norm, params):
    T, N, _ = X.shape
    X_flat = X.reshape(T * N, F_IN)                               # contiguous, free
    A_big = jnp.kron(jnp.eye(T, dtype=A_norm.dtype), A_norm)      # I_T (x) A_norm

    full = lambda shape: pl.BlockSpec(shape, lambda i: (0,) * len(shape))

    args = [X_flat, A_big]
    specs = [full(X_flat.shape), full(A_big.shape)]
    for k in (1, 2, 3):
        for name in (f"gcn{k}_w", f"gcn{k}_b", f"ln{k}_g", f"ln{k}_b"):
            args.append(params[name])
            specs.append(full(params[name].shape))
    for name in ("lstm_w", "lstm_b", "lin1_wa", "lin1_wb", "lin1_b",
                 "lin2_w", "lin2_b"):
        args.append(params[name])
        specs.append(full(params[name].shape))

    return pl.pallas_call(
        mpnn_lstm_kernel,
        out_shape=jax.ShapeDtypeStruct((N, F_OUT), jnp.float32),
        grid=(1,),
        in_specs=specs,
        out_specs=full((N, F_OUT)),
        compiler_params=pltpu.CompilerParams(dimension_semantics=("arbitrary",)),
    )(*args)


# ----------------------------------------------------------------------------
# Deterministic parameter init (shapes follow the PyTorch module's __init__)
# ----------------------------------------------------------------------------
def init_params(key):
    p = {}
    ks = iter(jax.random.split(key, 64))
    unif = lambda k, shape, fan: jax.random.uniform(
        k, shape, jnp.float32, -1.0 / jnp.sqrt(fan), 1.0 / jnp.sqrt(fan))

    # GCNConv weights ([in, out]) + biases, LayerNorm gamma/beta
    dims = [(F_IN, HIDDEN), (HIDDEN, HIDDEN), (HIDDEN, HIDDEN)]
    for idx, (fi, fo) in enumerate(dims, start=1):
        p[f"gcn{idx}_w"] = unif(next(ks), (fi, fo), fi)
        p[f"gcn{idx}_b"] = unif(next(ks), (1, fo), fi)
        p[f"ln{idx}_g"] = jnp.ones((1, HIDDEN), jnp.float32)
        p[f"ln{idx}_b"] = jnp.zeros((1, HIDDEN), jnp.float32)

    # LSTM: PyTorch weight_ih/weight_hh are [4H, H] with gate blocks (i,f,g,o).
    # Store one fused [2H, 4H] weight per layer ([x|h] @ W) with gate columns
    # permuted to (i, f, o, g) so the kernel does a single wide sigmoid.
    H = HIDDEN
    perm = jnp.concatenate([jnp.arange(0, H), jnp.arange(H, 2 * H),
                            jnp.arange(3 * H, 4 * H), jnp.arange(2 * H, 3 * H)])
    ws, bs = [], []
    for _ in range(L_LSTM):
        wih = unif(next(ks), (4 * H, H), H)        # input_size == hidden_size
        whh = unif(next(ks), (4 * H, H), H)
        b_ih = unif(next(ks), (4 * H,), H)
        b_hh = unif(next(ks), (4 * H,), H)
        ws.append(jnp.concatenate([wih.T[:, perm], whh.T[:, perm]], axis=0))
        bs.append((b_ih + b_hh)[perm].reshape(1, 4 * H))
    p["lstm_w"] = jnp.stack(ws)                    # [L, 2H, 4H]
    p["lstm_b"] = jnp.stack(bs)                    # [L, 1, 4H]

    # lin1: Linear(hidden + T -> hidden), stored transposed and split
    fan1 = HIDDEN + T_STEPS
    w1_t = unif(next(ks), (fan1, HIDDEN), fan1)    # [H+T, H]
    p["lin1_wa"] = w1_t[:HIDDEN]                   # [H, H]
    p["lin1_wb"] = w1_t[HIDDEN:]                   # [T, H]
    p["lin1_b"] = unif(next(ks), (1, HIDDEN), fan1)
    # lin2: Linear(hidden -> 1)
    p["lin2_w"] = unif(next(ks), (HIDDEN, F_OUT), HIDDEN)
    p["lin2_b"] = unif(next(ks), (1, F_OUT), HIDDEN)
    return p


def build_graph(n):
    # deterministic symmetric ring graph, unit edge weights
    src = jnp.arange(n)
    dst = (src + 1) % n
    edge_index = jnp.stack([jnp.concatenate([src, dst]),
                            jnp.concatenate([dst, src])])          # [2, 2N]
    edge_weight = jnp.ones((edge_index.shape[1],), jnp.float32)
    # GCN normalization:  D^{-1/2} (A + I) D^{-1/2}
    A = jnp.zeros((n, n), jnp.float32).at[edge_index[1], edge_index[0]].add(
        edge_weight)
    A_hat = A + jnp.eye(n, dtype=jnp.float32)
    deg = A_hat.sum(axis=1)
    d_inv_sqrt = lax.rsqrt(deg)
    A_norm = d_inv_sqrt[:, None] * A_hat * d_inv_sqrt[None, :]
    return edge_index, A_norm


if __name__ == "__main__":
    key = jax.random.PRNGKey(0)
    k_x, k_p = jax.random.split(key)

    X = jax.random.normal(k_x, (T_STEPS, N_NODES, F_IN), jnp.float32)
    edge_index, A_norm = build_graph(N_NODES)
    params = init_params(k_p)

    fwd = jax.jit(mpnn_lstm_forward)
    out = fwd(X, A_norm, params)
    jax.block_until_ready(out)

    assert out.shape == (N_NODES, F_OUT), out.shape
    assert bool(jnp.all(jnp.isfinite(out)))
    assert bool(jnp.all((out > 0.0) & (out < 1.0)))   # sigmoid range
    print("KERNEL_OK")
</pallas_src>

<mosaic_0001>
module attributes {stable_mosaic.version = 11 : i64} {
  func.func @mpnn_lstm_kernel(%arg0: i32, %arg1: memref<48x4xf32, #tpu.memory_space<vmem>>, %arg2: memref<48x48xf32, #tpu.memory_space<vmem>>, %arg3: memref<4x32xf32, #tpu.memory_space<vmem>>, %arg4: memref<1x32xf32, #tpu.memory_space<vmem>>, %arg5: memref<1x32xf32, #tpu.memory_space<vmem>>, %arg6: memref<1x32xf32, #tpu.memory_space<vmem>>, %arg7: memref<32x32xf32, #tpu.memory_space<vmem>>, %arg8: memref<1x32xf32, #tpu.memory_space<vmem>>, %arg9: memref<1x32xf32, #tpu.memory_space<vmem>>, %arg10: memref<1x32xf32, #tpu.memory_space<vmem>>, %arg11: memref<32x32xf32, #tpu.memory_space<vmem>>, %arg12: memref<1x32xf32, #tpu.memory_space<vmem>>, %arg13: memref<1x32xf32, #tpu.memory_space<vmem>>, %arg14: memref<1x32xf32, #tpu.memory_space<vmem>>, %arg15: memref<4x64x128xf32, #tpu.memory_space<vmem>>, %arg16: memref<4x1x128xf32, #tpu.memory_space<vmem>>, %arg17: memref<32x32xf32, #tpu.memory_space<vmem>>, %arg18: memref<3x32xf32, #tpu.memory_space<vmem>>, %arg19: memref<1x32xf32, #tpu.memory_space<vmem>>, %arg20: memref<32x1xf32, #tpu.memory_space<vmem>>, %arg21: memref<1x1xf32, #tpu.memory_space<vmem>>, %arg22: memref<16x1xf32, #tpu.memory_space<vmem>>) attributes {dimension_semantics = [#tpu.dimension_semantics<arbitrary>], iteration_bounds = array<i64: 1>, scalar_prefetch = 0 : i64, scratch_operands = 0 : i64, tpu.core_type = #tpu.core_type<tc>, window_params = [{pipeline_mode = #tpu.pipeline_mode<synchronous>, transform_indices = @transform_0, window_bounds = array<i64: 48, 4>}, {pipeline_mode = #tpu.pipeline_mode<synchronous>, transform_indices = @transform_1, window_bounds = array<i64: 48, 48>}, {pipeline_mode = #tpu.pipeline_mode<synchronous>, transform_indices = @transform_2, window_bounds = array<i64: 4, 32>}, {pipeline_mode = #tpu.pipeline_mode<synchronous>, transform_indices = @transform_3, window_bounds = array<i64: 1, 32>}, {pipeline_mode = #tpu.pipeline_mode<synchronous>, transform_indices = @transform_4, window_bounds = array<i64: 1, 32>}, {pipeline_mode = #tpu.pipeline_mode<synchronous>, transform_indices = @transform_5, window_bounds = array<i64: 1, 32>}, {pipeline_mode = #tpu.pipeline_mode<synchronous>, transform_indices = @transform_6, window_bounds = array<i64: 32, 32>}, {pipeline_mode = #tpu.pipeline_mode<synchronous>, transform_indices = @transform_7, window_bounds = array<i64: 1, 32>}, {pipeline_mode = #tpu.pipeline_mode<synchronous>, transform_indices = @transform_8, window_bounds = array<i64: 1, 32>}, {pipeline_mode = #tpu.pipeline_mode<synchronous>, transform_indices = @transform_9, window_bounds = array<i64: 1, 32>}, {pipeline_mode = #tpu.pipeline_mode<synchronous>, transform_indices = @transform_10, window_bounds = array<i64: 32, 32>}, {pipeline_mode = #tpu.pipeline_mode<synchronous>, transform_indices = @transform_11, window_bounds = array<i64: 1, 32>}, {pipeline_mode = #tpu.pipeline_mode<synchronous>, transform_indices = @transform_12, window_bounds = array<i64: 1, 32>}, {pipeline_mode = #tpu.pipeline_mode<synchronous>, transform_indices = @transform_13, window_bounds = array<i64: 1, 32>}, {pipeline_mode = #tpu.pipeline_mode<synchronous>, transform_indices = @transform_14, window_bounds = array<i64: 4, 64, 128>}, {pipeline_mode = #tpu.pipeline_mode<synchronous>, transform_indices = @transform_15, window_bounds = array<i64: 4, 1, 128>}, {pipeline_mode = #tpu.pipeline_mode<synchronous>, transform_indices = @transform_16, window_bounds = array<i64: 32, 32>}, {pipeline_mode = #tpu.pipeline_mode<synchronous>, transform_indices = @transform_17, window_bounds = array<i64: 3, 32>}, {pipeline_mode = #tpu.pipeline_mode<synchronous>, transform_indices = @transform_18, window_bounds = array<i64: 1, 32>}, {pipeline_mode = #tpu.pipeline_mode<synchronous>, transform_indices = @transform_19, window_bounds = array<i64: 32, 1>}, {pipeline_mode = #tpu.pipeline_mode<synchronous>, transform_indices = @transform_20, window_bounds = array<i64: 1, 1>}, {pipeline_mode = #tpu.pipeline_mode<synchronous>, transform_indices = @transform_21, window_bounds = array<i64: 16, 1>}]} {
    %c0 = arith.constant 0 : index
    %c0_0 = arith.constant 0 : index
    %0 = vector.load %arg1[%c0, %c0_0] : memref<48x4xf32, #tpu.memory_space<vmem>>, vector<48x4xf32>
    %c0_1 = arith.constant 0 : index
    %c0_2 = arith.constant 0 : index
    %1 = vector.load %arg2[%c0_1, %c0_2] : memref<48x48xf32, #tpu.memory_space<vmem>>, vector<48x48xf32>
    %c0_3 = arith.constant 0 : index
    %c0_4 = arith.constant 0 : index
    %2 = vector.load %arg3[%c0_3, %c0_4] : memref<4x32xf32, #tpu.memory_space<vmem>>, vector<4x32xf32>
    %c0_5 = arith.constant 0 : index
    %c0_6 = arith.constant 0 : index
    %3 = vector.load %arg4[%c0_5, %c0_6] : memref<1x32xf32, #tpu.memory_space<vmem>>, vector<1x32xf32>
    %c0_7 = arith.constant 0 : index
    %c0_8 = arith.constant 0 : index
    %4 = vector.load %arg5[%c0_7, %c0_8] : memref<1x32xf32, #tpu.memory_space<vmem>>, vector<1x32xf32>
    %c0_9 = arith.constant 0 : index
    %c0_10 = arith.constant 0 : index
    %5 = vector.load %arg6[%c0_9, %c0_10] : memref<1x32xf32, #tpu.memory_space<vmem>>, vector<1x32xf32>
    %cst = arith.constant dense<0.000000e+00> : vector<48x32xf32>
    %6 = tpu.matmul %0, %2, %cst {dimension_numbers = #tpu.dot_dimension_numbers<[1], [0], [0], [1], [0, 0, 1, 1], [], []>} : vector<48x4xf32>, vector<4x32xf32>, vector<48x32xf32> -> vector<48x32xf32>
    %cst_11 = arith.constant dense<0.000000e+00> : vector<48x32xf32>
    %7 = tpu.matmul %1, %6, %cst_11 {dimension_numbers = #tpu.dot_dimension_numbers<[1], [0], [0], [1], [0, 0, 1, 1], [], []>} : vector<48x48xf32>, vector<48x32xf32>, vector<48x32xf32> -> vector<48x32xf32>
    %8 = vector.broadcast %3 : vector<1x32xf32> to vector<48x32xf32>
    %9 = arith.addf %7, %8 : vector<48x32xf32>
    %cst_12 = arith.constant 0.000000e+00 : f32
    %10 = vector.broadcast %cst_12 : f32 to vector<48x32xf32>
    %11 = arith.maximumf %9, %10 : vector<48x32xf32>
    %cst_13 = arith.constant dense<0.000000e+00> : vector<48xf32>
    %12 = vector.multi_reduction <add>, %11, %cst_13 [1] : vector<48x32xf32> to vector<48xf32>
    %13 = vector.shape_cast %12 : vector<48xf32> to vector<48x1xf32>
    %cst_14 = arith.constant 3.200000e+01 : f32
    %14 = vector.broadcast %cst_14 : f32 to vector<48x1xf32>
    %15 = arith.divf %13, %14 : vector<48x1xf32>
    %16 = vector.broadcast %15 : vector<48x1xf32> to vector<48x32xf32>
    %17 = arith.subf %11, %16 : vector<48x32xf32>
    %18 = arith.mulf %17, %17 : vector<48x32xf32>
    %cst_15 = arith.constant dense<0.000000e+00> : vector<48xf32>
    %19 = vector.multi_reduction <add>, %18, %cst_15 [1] : vector<48x32xf32> to vector<48xf32>
    %20 = vector.shape_cast %19 : vector<48xf32> to vector<48x1xf32>
    %cst_16 = arith.constant 3.200000e+01 : f32
    %21 = vector.broadcast %cst_16 : f32 to vector<48x1xf32>
    %22 = arith.divf %20, %21 : vector<48x1xf32>
    %23 = vector.broadcast %15 : vector<48x1xf32> to vector<48x32xf32>
    %24 = arith.subf %11, %23 : vector<48x32xf32>
    %cst_17 = arith.constant 9.99999974E-6 : f32
    %25 = vector.broadcast %cst_17 : f32 to vector<48x1xf32>
    %26 = arith.addf %22, %25 : vector<48x1xf32>
    %27 = math.rsqrt %26 : vector<48x1xf32>
    %28 = vector.broadcast %27 : vector<48x1xf32> to vector<48x32xf32>
    %29 = arith.mulf %24, %28 : vector<48x32xf32>
    %30 = vector.broadcast %4 : vector<1x32xf32> to vector<48x32xf32>
    %31 = arith.mulf %29, %30 : vector<48x32xf32>
    %32 = vector.broadcast %5 : vector<1x32xf32> to vector<48x32xf32>
    %33 = arith.addf %31, %32 : vector<48x32xf32>
    %c0_18 = arith.constant 0 : index
    %c0_19 = arith.constant 0 : index
    %34 = vector.load %arg7[%c0_18, %c0_19] : memref<32x32xf32, #tpu.memory_space<vmem>>, vector<32x32xf32>
    %c0_20 = arith.constant 0 : index
    %c0_21 = arith.constant 0 : index
    %35 = vector.load %arg8[%c0_20, %c0_21] : memref<1x32xf32, #tpu.memory_space<vmem>>, vector<1x32xf32>
    %c0_22 = arith.constant 0 : index
    %c0_23 = arith.constant 0 : index
    %36 = vector.load %arg9[%c0_22, %c0_23] : memref<1x32xf32, #tpu.memory_space<vmem>>, vector<1x32xf32>
    %c0_24 = arith.constant 0 : index
    %c0_25 = arith.constant 0 : index
    %37 = vector.load %arg10[%c0_24, %c0_25] : memref<1x32xf32, #tpu.memory_space<vmem>>, vector<1x32xf32>
    %cst_26 = arith.constant dense<0.000000e+00> : vector<48x32xf32>
    %38 = tpu.matmul %33, %34, %cst_26 {dimension_numbers = #tpu.dot_dimension_numbers<[1], [0], [0], [1], [0, 0, 1, 1], [], []>} : vector<48x32xf32>, vector<32x32xf32>, vector<48x32xf32> -> vector<48x32xf32>
    %cst_27 = arith.constant dense<0.000000e+00> : vector<48x32xf32>
    %39 = tpu.matmul %1, %38, %cst_27 {dimension_numbers = #tpu.dot_dimension_numbers<[1], [0], [0], [1], [0, 0, 1, 1], [], []>} : vector<48x48xf32>, vector<48x32xf32>, vector<48x32xf32> -> vector<48x32xf32>
    %40 = vector.broadcast %35 : vector<1x32xf32> to vector<48x32xf32>
    %41 = arith.addf %39, %40 : vector<48x32xf32>
    %cst_28 = arith.constant 0.000000e+00 : f32
    %42 = vector.broadcast %cst_28 : f32 to vector<48x32xf32>
    %43 = arith.maximumf %41, %42 : vector<48x32xf32>
    %cst_29 = arith.constant dense<0.000000e+00> : vector<48xf32>
    %44 = vector.multi_reduction <add>, %43, %cst_29 [1] : vector<48x32xf32> to vector<48xf32>
    %45 = vector.shape_cast %44 : vector<48xf32> to vector<48x1xf32>
    %cst_30 = arith.constant 3.200000e+01 : f32
    %46 = vector.broadcast %cst_30 : f32 to vector<48x1xf32>
    %47 = arith.divf %45, %46 : vector<48x1xf32>
    %48 = vector.broadcast %47 : vector<48x1xf32> to vector<48x32xf32>
    %49 = arith.subf %43, %48 : vector<48x32xf32>
    %50 = arith.mulf %49, %49 : vector<48x32xf32>
    %cst_31 = arith.constant dense<0.000000e+00> : vector<48xf32>
    %51 = vector.multi_reduction <add>, %50, %cst_31 [1] : vector<48x32xf32> to vector<48xf32>
    %52 = vector.shape_cast %51 : vector<48xf32> to vector<48x1xf32>
    %cst_32 = arith.constant 3.200000e+01 : f32
    %53 = vector.broadcast %cst_32 : f32 to vector<48x1xf32>
    %54 = arith.divf %52, %53 : vector<48x1xf32>
    %55 = vector.broadcast %47 : vector<48x1xf32> to vector<48x32xf32>
    %56 = arith.subf %43, %55 : vector<48x32xf32>
    %cst_33 = arith.constant 9.99999974E-6 : f32
    %57 = vector.broadcast %cst_33 : f32 to vector<48x1xf32>
    %58 = arith.addf %54, %57 : vector<48x1xf32>
    %59 = math.rsqrt %58 : vector<48x1xf32>
    %60 = vector.broadcast %59 : vector<48x1xf32> to vector<48x32xf32>
    %61 = arith.mulf %56, %60 : vector<48x32xf32>
    %62 = vector.broadcast %36 : vector<1x32xf32> to vector<48x32xf32>
    %63 = arith.mulf %61, %62 : vector<48x32xf32>
    %64 = vector.broadcast %37 : vector<1x32xf32> to vector<48x32xf32>
    %65 = arith.addf %63, %64 : vector<48x32xf32>
    %c0_34 = arith.constant 0 : index
    %c0_35 = arith.constant 0 : index
    %66 = vector.load %arg11[%c0_34, %c0_35] : memref<32x32xf32, #tpu.memory_space<vmem>>, vector<32x32xf32>
    %c0_36 = arith.constant 0 : index
    %c0_37 = arith.constant 0 : index
    %67 = vector.load %arg12[%c0_36, %c0_37] : memref<1x32xf32, #tpu.memory_space<vmem>>, vector<1x32xf32>
    %c0_38 = arith.constant 0 : index
    %c0_39 = arith.constant 0 : index
    %68 = vector.load %arg13[%c0_38, %c0_39] : memref<1x32xf32, #tpu.memory_space<vmem>>, vector<1x32xf32>
    %c0_40 = arith.constant 0 : index
    %c0_41 = arith.constant 0 : index
    %69 = vector.load %arg14[%c0_40, %c0_41] : memref<1x32xf32, #tpu.memory_space<vmem>>, vector<1x32xf32>
    %cst_42 = arith.constant dense<0.000000e+00> : vector<48x32xf32>
    %70 = tpu.matmul %65, %66, %cst_42 {dimension_numbers = #tpu.dot_dimension_numbers<[1], [0], [0], [1], [0, 0, 1, 1], [], []>} : vector<48x32xf32>, vector<32x32xf32>, vector<48x32xf32> -> vector<48x32xf32>
    %cst_43 = arith.constant dense<0.000000e+00> : vector<48x32xf32>
    %71 = tpu.matmul %1, %70, %cst_43 {dimension_numbers = #tpu.dot_dimension_numbers<[1], [0], [0], [1], [0, 0, 1, 1], [], []>} : vector<48x48xf32>, vector<48x32xf32>, vector<48x32xf32> -> vector<48x32xf32>
    %72 = vector.broadcast %67 : vector<1x32xf32> to vector<48x32xf32>
    %73 = arith.addf %71, %72 : vector<48x32xf32>
    %cst_44 = arith.constant 0.000000e+00 : f32
    %74 = vector.broadcast %cst_44 : f32 to vector<48x32xf32>
    %75 = arith.maximumf %73, %74 : vector<48x32xf32>
    %cst_45 = arith.constant dense<0.000000e+00> : vector<48xf32>
    %76 = vector.multi_reduction <add>, %75, %cst_45 [1] : vector<48x32xf32> to vector<48xf32>
    %77 = vector.shape_cast %76 : vector<48xf32> to vector<48x1xf32>
    %cst_46 = arith.constant 3.200000e+01 : f32
    %78 = vector.broadcast %cst_46 : f32 to vector<48x1xf32>
    %79 = arith.divf %77, %78 : vector<48x1xf32>
    %80 = vector.broadcast %79 : vector<48x1xf32> to vector<48x32xf32>
    %81 = arith.subf %75, %80 : vector<48x32xf32>
    %82 = arith.mulf %81, %81 : vector<48x32xf32>
    %cst_47 = arith.constant dense<0.000000e+00> : vector<48xf32>
    %83 = vector.multi_reduction <add>, %82, %cst_47 [1] : vector<48x32xf32> to vector<48xf32>
    %84 = vector.shape_cast %83 : vector<48xf32> to vector<48x1xf32>
    %cst_48 = arith.constant 3.200000e+01 : f32
    %85 = vector.broadcast %cst_48 : f32 to vector<48x1xf32>
    %86 = arith.divf %84, %85 : vector<48x1xf32>
    %87 = vector.broadcast %79 : vector<48x1xf32> to vector<48x32xf32>
    %88 = arith.subf %75, %87 : vector<48x32xf32>
    %cst_49 = arith.constant 9.99999974E-6 : f32
    %89 = vector.broadcast %cst_49 : f32 to vector<48x1xf32>
    %90 = arith.addf %86, %89 : vector<48x1xf32>
    %91 = math.rsqrt %90 : vector<48x1xf32>
    %92 = vector.broadcast %91 : vector<48x1xf32> to vector<48x32xf32>
    %93 = arith.mulf %88, %92 : vector<48x32xf32>
    %94 = vector.broadcast %68 : vector<1x32xf32> to vector<48x32xf32>
    %95 = arith.mulf %93, %94 : vector<48x32xf32>
    %96 = vector.broadcast %69 : vector<1x32xf32> to vector<48x32xf32>
    %97 = arith.addf %95, %96 : vector<48x32xf32>
    %98 = vector.extract_strided_slice %97 {offsets = [0, 0], sizes = [16, 32], strides = [1, 1]} : vector<48x32xf32> to vector<16x32xf32>
    %99 = vector.extract_strided_slice %97 {offsets = [16, 0], sizes = [16, 32], strides = [1, 1]} : vector<48x32xf32> to vector<16x32xf32>
    %100 = vector.extract_strided_slice %97 {offsets = [32, 0], sizes = [16, 32], strides = [1, 1]} : vector<48x32xf32> to vector<16x32xf32>
    %c0_50 = arith.constant 0 : index
    %c0_51 = arith.constant 0 : index
    %c0_52 = arith.constant 0 : index
    %101 = vector.load %arg15[%c0_50, %c0_51, %c0_52] : memref<4x64x128xf32, #tpu.memory_space<vmem>>, vector<1x64x128xf32>
    %102 = vector.shape_cast %101 : vector<1x64x128xf32> to vector<64x128xf32>
    %c0_53 = arith.constant 0 : index
    %c0_54 = arith.constant 0 : index
    %c0_55 = arith.constant 0 : index
    %103 = vector.load %arg16[%c0_53, %c0_54, %c0_55] : memref<4x1x128xf32, #tpu.memory_space<vmem>>, vector<1x1x128xf32>
    %104 = vector.shape_cast %103 : vector<1x1x128xf32> to vector<1x128xf32>
    %cst_56 = arith.constant 0.000000e+00 : f32
    %105 = vector.broadcast %cst_56 : f32 to vector<16x32xf32>
    %cst_57 = arith.constant 0.000000e+00 : f32
    %106 = vector.broadcast %cst_57 : f32 to vector<16x32xf32>
    %107 = tpu.concatenate %98, %105 in 1 : vector<16x32xf32>, vector<16x32xf32> -> vector<16x64xf32>
    %cst_58 = arith.constant dense<0.000000e+00> : vector<16x128xf32>
    %108 = tpu.matmul %107, %102, %cst_58 {dimension_numbers = #tpu.dot_dimension_numbers<[1], [0], [0], [1], [0, 0, 1, 1], [], []>} : vector<16x64xf32>, vector<64x128xf32>, vector<16x128xf32> -> vector<16x128xf32>
    %109 = vector.broadcast %104 : vector<1x128xf32> to vector<16x128xf32>
    %110 = arith.addf %108, %109 : vector<16x128xf32>
    %111 = vector.extract_strided_slice %110 {offsets = [0, 0], sizes = [16, 96], strides = [1, 1]} : vector<16x128xf32> to vector<16x96xf32>
    %112 = arith.negf %111 : vector<16x96xf32>
    %113 = math.exp %112 : vector<16x96xf32>
    %cst_59 = arith.constant 1.000000e+00 : f32
    %114 = vector.broadcast %cst_59 : f32 to vector<16x96xf32>
    %115 = arith.addf %114, %113 : vector<16x96xf32>
    %116 = arith.divf %114, %115 : vector<16x96xf32>
    %117 = vector.extract_strided_slice %116 {offsets = [0, 0], sizes = [16, 32], strides = [1, 1]} : vector<16x96xf32> to vector<16x32xf32>
    %118 = vector.extract_strided_slice %116 {offsets = [0, 32], sizes = [16, 32], strides = [1, 1]} : vector<16x96xf32> to vector<16x32xf32>
    %119 = vector.extract_strided_slice %116 {offsets = [0, 64], sizes = [16, 32], strides = [1, 1]} : vector<16x96xf32> to vector<16x32xf32>
    %120 = vector.extract_strided_slice %110 {offsets = [0, 96], sizes = [16, 32], strides = [1, 1]} : vector<16x128xf32> to vector<16x32xf32>
    %121 = math.tanh %120 : vector<16x32xf32>
    %122 = arith.mulf %118, %106 : vector<16x32xf32>
    %123 = arith.mulf %117, %121 : vector<16x32xf32>
    %124 = arith.addf %122, %123 : vector<16x32xf32>
    %125 = math.tanh %124 : vector<16x32xf32>
    %126 = arith.mulf %119, %125 : vector<16x32xf32>
    %127 = tpu.concatenate %99, %126 in 1 : vector<16x32xf32>, vector<16x32xf32> -> vector<16x64xf32>
    %cst_60 = arith.constant dense<0.000000e+00> : vector<16x128xf32>
    %128 = tpu.matmul %127, %102, %cst_60 {dimension_numbers = #tpu.dot_dimension_numbers<[1], [0], [0], [1], [0, 0, 1, 1], [], []>} : vector<16x64xf32>, vector<64x128xf32>, vector<16x128xf32> -> vector<16x128xf32>
    %129 = vector.broadcast %104 : vector<1x128xf32> to vector<16x128xf32>
    %130 = arith.addf %128, %129 : vector<16x128xf32>
    %131 = vector.extract_strided_slice %130 {offsets = [0, 0], sizes = [16, 96], strides = [1, 1]} : vector<16x128xf32> to vector<16x96xf32>
    %132 = arith.negf %131 : vector<16x96xf32>
    %133 = math.exp %132 : vector<16x96xf32>
    %cst_61 = arith.constant 1.000000e+00 : f32
    %134 = vector.broadcast %cst_61 : f32 to vector<16x96xf32>
    %135 = arith.addf %134, %133 : vector<16x96xf32>
    %136 = arith.divf %134, %135 : vector<16x96xf32>
    %137 = vector.extract_strided_slice %136 {offsets = [0, 0], sizes = [16, 32], strides = [1, 1]} : vector<16x96xf32> to vector<16x32xf32>
    %138 = vector.extract_strided_slice %136 {offsets = [0, 32], sizes = [16, 32], strides = [1, 1]} : vector<16x96xf32> to vector<16x32xf32>
    %139 = vector.extract_strided_slice %136 {offsets = [0, 64], sizes = [16, 32], strides = [1, 1]} : vector<16x96xf32> to vector<16x32xf32>
    %140 = vector.extract_strided_slice %130 {offsets = [0, 96], sizes = [16, 32], strides = [1, 1]} : vector<16x128xf32> to vector<16x32xf32>
    %141 = math.tanh %140 : vector<16x32xf32>
    %142 = arith.mulf %138, %124 : vector<16x32xf32>
    %143 = arith.mulf %137, %141 : vector<16x32xf32>
    %144 = arith.addf %142, %143 : vector<16x32xf32>
    %145 = math.tanh %144 : vector<16x32xf32>
    %146 = arith.mulf %139, %145 : vector<16x32xf32>
    %147 = tpu.concatenate %100, %146 in 1 : vector<16x32xf32>, vector<16x32xf32> -> vector<16x64xf32>
    %cst_62 = arith.constant dense<0.000000e+00> : vector<16x128xf32>
    %148 = tpu.matmul %147, %102, %cst_62 {dimension_numbers = #tpu.dot_dimension_numbers<[1], [0], [0], [1], [0, 0, 1, 1], [], []>} : vector<16x64xf32>, vector<64x128xf32>, vector<16x128xf32> -> vector<16x128xf32>
    %149 = vector.broadcast %104 : vector<1x128xf32> to vector<16x128xf32>
    %150 = arith.addf %148, %149 : vector<16x128xf32>
    %151 = vector.extract_strided_slice %150 {offsets = [0, 0], sizes = [16, 96], strides = [1, 1]} : vector<16x128xf32> to vector<16x96xf32>
    %152 = arith.negf %151 : vector<16x96xf32>
    %153 = math.exp %152 : vector<16x96xf32>
    %cst_63 = arith.constant 1.000000e+00 : f32
    %154 = vector.broadcast %cst_63 : f32 to vector<16x96xf32>
    %155 = arith.addf %154, %153 : vector<16x96xf32>
    %156 = arith.divf %154, %155 : vector<16x96xf32>
    %157 = vector.extract_strided_slice %156 {offsets = [0, 0], sizes = [16, 32], strides = [1, 1]} : vector<16x96xf32> to vector<16x32xf32>
    %158 = vector.extract_strided_slice %156 {offsets = [0, 32], sizes = [16, 32], strides = [1, 1]} : vector<16x96xf32> to vector<16x32xf32>
    %159 = vector.extract_strided_slice %156 {offsets = [0, 64], sizes = [16, 32], strides = [1, 1]} : vector<16x96xf32> to vector<16x32xf32>
    %160 = vector.extract_strided_slice %150 {offsets = [0, 96], sizes = [16, 32], strides = [1, 1]} : vector<16x128xf32> to vector<16x32xf32>
    %161 = math.tanh %160 : vector<16x32xf32>
    %162 = arith.mulf %158, %144 : vector<16x32xf32>
    %163 = arith.mulf %157, %161 : vector<16x32xf32>
    %164 = arith.addf %162, %163 : vector<16x32xf32>
    %165 = math.tanh %164 : vector<16x32xf32>
    %166 = arith.mulf %159, %165 : vector<16x32xf32>
    %c1 = arith.constant 1 : index
    %c0_64 = arith.constant 0 : index
    %c0_65 = arith.constant 0 : index
    %167 = vector.load %arg15[%c1, %c0_64, %c0_65] : memref<4x64x128xf32, #tpu.memory_space<vmem>>, vector<1x64x128xf32>
    %168 = vector.shape_cast %167 : vector<1x64x128xf32> to vector<64x128xf32>
    %c1_66 = arith.constant 1 : index
    %c0_67 = arith.constant 0 : index
    %c0_68 = arith.constant 0 : index
    %169 = vector.load %arg16[%c1_66, %c0_67, %c0_68] : memref<4x1x128xf32, #tpu.memory_space<vmem>>, vector<1x1x128xf32>
    %170 = vector.shape_cast %169 : vector<1x1x128xf32> to vector<1x128xf32>
    %cst_69 = arith.constant 0.000000e+00 : f32
    %171 = vector.broadcast %cst_69 : f32 to vector<16x32xf32>
    %cst_70 = arith.constant 0.000000e+00 : f32
    %172 = vector.broadcast %cst_70 : f32 to vector<16x32xf32>
    %173 = tpu.concatenate %126, %171 in 1 : vector<16x32xf32>, vector<16x32xf32> -> vector<16x64xf32>
    %cst_71 = arith.constant dense<0.000000e+00> : vector<16x128xf32>
    %174 = tpu.matmul %173, %168, %cst_71 {dimension_numbers = #tpu.dot_dimension_numbers<[1], [0], [0], [1], [0, 0, 1, 1], [], []>} : vector<16x64xf32>, vector<64x128xf32>, vector<16x128xf32> -> vector<16x128xf32>
    %175 = vector.broadcast %170 : vector<1x128xf32> to vector<16x128xf32>
    %176 = arith.addf %174, %175 : vector<16x128xf32>
    %177 = vector.extract_strided_slice %176 {offsets = [0, 0], sizes = [16, 96], strides = [1, 1]} : vector<16x128xf32> to vector<16x96xf32>
    %178 = arith.negf %177 : vector<16x96xf32>
    %179 = math.exp %178 : vector<16x96xf32>
    %cst_72 = arith.constant 1.000000e+00 : f32
    %180 = vector.broadcast %cst_72 : f32 to vector<16x96xf32>
    %181 = arith.addf %180, %179 : vector<16x96xf32>
    %182 = arith.divf %180, %181 : vector<16x96xf32>
    %183 = vector.extract_strided_slice %182 {offsets = [0, 0], sizes = [16, 32], strides = [1, 1]} : vector<16x96xf32> to vector<16x32xf32>
    %184 = vector.extract_strided_slice %182 {offsets = [0, 32], sizes = [16, 32], strides = [1, 1]} : vector<16x96xf32> to vector<16x32xf32>
    %185 = vector.extract_strided_slice %182 {offsets = [0, 64], sizes = [16, 32], strides = [1, 1]} : vector<16x96xf32> to vector<16x32xf32>
    %186 = vector.extract_strided_slice %176 {offsets = [0, 96], sizes = [16, 32], strides = [1, 1]} : vector<16x128xf32> to vector<16x32xf32>
    %187 = math.tanh %186 : vector<16x32xf32>
    %188 = arith.mulf %184, %172 : vector<16x32xf32>
    %189 = arith.mulf %183, %187 : vector<16x32xf32>
    %190 = arith.addf %188, %189 : vector<16x32xf32>
    %191 = math.tanh %190 : vector<16x32xf32>
    %192 = arith.mulf %185, %191 : vector<16x32xf32>
    %193 = tpu.concatenate %146, %192 in 1 : vector<16x32xf32>, vector<16x32xf32> -> vector<16x64xf32>
    %cst_73 = arith.constant dense<0.000000e+00> : vector<16x128xf32>
    %194 = tpu.matmul %193, %168, %cst_73 {dimension_numbers = #tpu.dot_dimension_numbers<[1], [0], [0], [1], [0, 0, 1, 1], [], []>} : vector<16x64xf32>, vector<64x128xf32>, vector<16x128xf32> -> vector<16x128xf32>
    %195 = vector.broadcast %170 : vector<1x128xf32> to vector<16x128xf32>
    %196 = arith.addf %194, %195 : vector<16x128xf32>
    %197 = vector.extract_strided_slice %196 {offsets = [0, 0], sizes = [16, 96], strides = [1, 1]} : vector<16x128xf32> to vector<16x96xf32>
    %198 = arith.negf %197 : vector<16x96xf32>
    %199 = math.exp %198 : vector<16x96xf32>
    %cst_74 = arith.constant 1.000000e+00 : f32
    %200 = vector.broadcast %cst_74 : f32 to vector<16x96xf32>
    %201 = arith.addf %200, %199 : vector<16x96xf32>
    %202 = arith.divf %200, %201 : vector<16x96xf32>
    %203 = vector.extract_strided_slice %202 {offsets = [0, 0], sizes = [16, 32], strides = [1, 1]} : vector<16x96xf32> to vector<16x32xf32>
    %204 = vector.extract_strided_slice %202 {offsets = [0, 32], sizes = [16, 32], strides = [1, 1]} : vector<16x96xf32> to vector<16x32xf32>
    %205 = vector.extract_strided_slice %202 {offsets = [0, 64], sizes = [16, 32], strides = [1, 1]} : vector<16x96xf32> to vector<16x32xf32>
    %206 = vector.extract_strided_slice %196 {offsets = [0, 96], sizes = [16, 32], strides = [1, 1]} : vector<16x128xf32> to vector<16x32xf32>
    %207 = math.tanh %206 : vector<16x32xf32>
    %208 = arith.mulf %204, %190 : vector<16x32xf32>
    %209 = arith.mulf %203, %207 : vector<16x32xf32>
    %210 = arith.addf %208, %209 : vector<16x32xf32>
    %211 = math.tanh %210 : vector<16x32xf32>
    %212 = arith.mulf %205, %211 : vector<16x32xf32>
    %213 = tpu.concatenate %166, %212 in 1 : vector<16x32xf32>, vector<16x32xf32> -> vector<16x64xf32>
    %cst_75 = arith.constant dense<0.000000e+00> : vector<16x128xf32>
    %214 = tpu.matmul %213, %168, %cst_75 {dimension_numbers = #tpu.dot_dimension_numbers<[1], [0], [0], [1], [0, 0, 1, 1], [], []>} : vector<16x64xf32>, vector<64x128xf32>, vector<16x128xf32> -> vector<16x128xf32>
    %215 = vector.broadcast %170 : vector<1x128xf32> to vector<16x128xf32>
    %216 = arith.addf %214, %215 : vector<16x128xf32>
    %217 = vector.extract_strided_slice %216 {offsets = [0, 0], sizes = [16, 96], strides = [1, 1]} : vector<16x128xf32> to vector<16x96xf32>
    %218 = arith.negf %217 : vector<16x96xf32>
    %219 = math.exp %218 : vector<16x96xf32>
    %cst_76 = arith.constant 1.000000e+00 : f32
    %220 = vector.broadcast %cst_76 : f32 to vector<16x96xf32>
    %221 = arith.addf %220, %219 : vector<16x96xf32>
    %222 = arith.divf %220, %221 : vector<16x96xf32>
    %223 = vector.extract_strided_slice %222 {offsets = [0, 0], sizes = [16, 32], strides = [1, 1]} : vector<16x96xf32> to vector<16x32xf32>
    %224 = vector.extract_strided_slice %222 {offsets = [0, 32], sizes = [16, 32], strides = [1, 1]} : vector<16x96xf32> to vector<16x32xf32>
    %225 = vector.extract_strided_slice %222 {offsets = [0, 64], sizes = [16, 32], strides = [1, 1]} : vector<16x96xf32> to vector<16x32xf32>
    %226 = vector.extract_strided_slice %216 {offsets = [0, 96], sizes = [16, 32], strides = [1, 1]} : vector<16x128xf32> to vector<16x32xf32>
    %227 = math.tanh %226 : vector<16x32xf32>
    %228 = arith.mulf %224, %210 : vector<16x32xf32>
    %229 = arith.mulf %223, %227 : vector<16x32xf32>
    %230 = arith.addf %228, %229 : vector<16x32xf32>
    %231 = math.tanh %230 : vector<16x32xf32>
    %232 = arith.mulf %225, %231 : vector<16x32xf32>
    %c2 = arith.constant 2 : index
    %c0_77 = arith.constant 0 : index
    %c0_78 = arith.constant 0 : index
    %233 = vector.load %arg15[%c2, %c0_77, %c0_78] : memref<4x64x128xf32, #tpu.memory_space<vmem>>, vector<1x64x128xf32>
    %234 = vector.shape_cast %233 : vector<1x64x128xf32> to vector<64x128xf32>
    %c2_79 = arith.constant 2 : index
    %c0_80 = arith.constant 0 : index
    %c0_81 = arith.constant 0 : index
    %235 = vector.load %arg16[%c2_79, %c0_80, %c0_81] : memref<4x1x128xf32, #tpu.memory_space<vmem>>, vector<1x1x128xf32>
    %236 = vector.shape_cast %235 : vector<1x1x128xf32> to vector<1x128xf32>
    %cst_82 = arith.constant 0.000000e+00 : f32
    %237 = vector.broadcast %cst_82 : f32 to vector<16x32xf32>
    %cst_83 = arith.constant 0.000000e+00 : f32
    %238 = vector.broadcast %cst_83 : f32 to vector<16x32xf32>
    %239 = tpu.concatenate %192, %237 in 1 : vector<16x32xf32>, vector<16x32xf32> -> vector<16x64xf32>
    %cst_84 = arith.constant dense<0.000000e+00> : vector<16x128xf32>
    %240 = tpu.matmul %239, %234, %cst_84 {dimension_numbers = #tpu.dot_dimension_numbers<[1], [0], [0], [1], [0, 0, 1, 1], [], []>} : vector<16x64xf32>, vector<64x128xf32>, vector<16x128xf32> -> vector<16x128xf32>
    %241 = vector.broadcast %236 : vector<1x128xf32> to vector<16x128xf32>
    %242 = arith.addf %240, %241 : vector<16x128xf32>
    %243 = vector.extract_strided_slice %242 {offsets = [0, 0], sizes = [16, 96], strides = [1, 1]} : vector<16x128xf32> to vector<16x96xf32>
    %244 = arith.negf %243 : vector<16x96xf32>
    %245 = math.exp %244 : vector<16x96xf32>
    %cst_85 = arith.constant 1.000000e+00 : f32
    %246 = vector.broadcast %cst_85 : f32 to vector<16x96xf32>
    %247 = arith.addf %246, %245 : vector<16x96xf32>
    %248 = arith.divf %246, %247 : vector<16x96xf32>
    %249 = vector.extract_strided_slice %248 {offsets = [0, 0], sizes = [16, 32], strides = [1, 1]} : vector<16x96xf32> to vector<16x32xf32>
    %250 = vector.extract_strided_slice %248 {offsets = [0, 32], sizes = [16, 32], strides = [1, 1]} : vector<16x96xf32> to vector<16x32xf32>
    %251 = vector.extract_strided_slice %248 {offsets = [0, 64], sizes = [16, 32], strides = [1, 1]} : vector<16x96xf32> to vector<16x32xf32>
    %252 = vector.extract_strided_slice %242 {offsets = [0, 96], sizes = [16, 32], strides = [1, 1]} : vector<16x128xf32> to vector<16x32xf32>
    %253 = math.tanh %252 : vector<16x32xf32>
    %254 = arith.mulf %250, %238 : vector<16x32xf32>
    %255 = arith.mulf %249, %253 : vector<16x32xf32>
    %256 = arith.addf %254, %255 : vector<16x32xf32>
    %257 = math.tanh %256 : vector<16x32xf32>
    %258 = arith.mulf %251, %257 : vector<16x32xf32>
    %259 = tpu.concatenate %212, %258 in 1 : vector<16x32xf32>, vector<16x32xf32> -> vector<16x64xf32>
    %cst_86 = arith.constant dense<0.000000e+00> : vector<16x128xf32>
    %260 = tpu.matmul %259, %234, %cst_86 {dimension_numbers = #tpu.dot_dimension_numbers<[1], [0], [0], [1], [0, 0, 1, 1], [], []>} : vector<16x64xf32>, vector<64x128xf32>, vector<16x128xf32> -> vector<16x128xf32>
    %261 = vector.broadcast %236 : vector<1x128xf32> to vector<16x128xf32>
    %262 = arith.addf %260, %261 : vector<16x128xf32>
    %263 = vector.extract_strided_slice %262 {offsets = [0, 0], sizes = [16, 96], strides = [1, 1]} : vector<16x128xf32> to vector<16x96xf32>
    %264 = arith.negf %263 : vector<16x96xf32>
    %265 = math.exp %264 : vector<16x96xf32>
    %cst_87 = arith.constant 1.000000e+00 : f32
    %266 = vector.broadcast %cst_87 : f32 to vector<16x96xf32>
    %267 = arith.addf %266, %265 : vector<16x96xf32>
    %268 = arith.divf %266, %267 : vector<16x96xf32>
    %269 = vector.extract_strided_slice %268 {offsets = [0, 0], sizes = [16, 32], strides = [1, 1]} : vector<16x96xf32> to vector<16x32xf32>
    %270 = vector.extract_strided_slice %268 {offsets = [0, 32], sizes = [16, 32], strides = [1, 1]} : vector<16x96xf32> to vector<16x32xf32>
    %271 = vector.extract_strided_slice %268 {offsets = [0, 64], sizes = [16, 32], strides = [1, 1]} : vector<16x96xf32> to vector<16x32xf32>
    %272 = vector.extract_strided_slice %262 {offsets = [0, 96], sizes = [16, 32], strides = [1, 1]} : vector<16x128xf32> to vector<16x32xf32>
    %273 = math.tanh %272 : vector<16x32xf32>
    %274 = arith.mulf %270, %256 : vector<16x32xf32>
    %275 = arith.mulf %269, %273 : vector<16x32xf32>
    %276 = arith.addf %274, %275 : vector<16x32xf32>
    %277 = math.tanh %276 : vector<16x32xf32>
    %278 = arith.mulf %271, %277 : vector<16x32xf32>
    %279 = tpu.concatenate %232, %278 in 1 : vector<16x32xf32>, vector<16x32xf32> -> vector<16x64xf32>
    %cst_88 = arith.constant dense<0.000000e+00> : vector<16x128xf32>
    %280 = tpu.matmul %279, %234, %cst_88 {dimension_numbers = #tpu.dot_dimension_numbers<[1], [0], [0], [1], [0, 0, 1, 1], [], []>} : vector<16x64xf32>, vector<64x128xf32>, vector<16x128xf32> -> vector<16x128xf32>
    %281 = vector.broadcast %236 : vector<1x128xf32> to vector<16x128xf32>
    %282 = arith.addf %280, %281 : vector<16x128xf32>
    %283 = vector.extract_strided_slice %282 {offsets = [0, 0], sizes = [16, 96], strides = [1, 1]} : vector<16x128xf32> to vector<16x96xf32>
    %284 = arith.negf %283 : vector<16x96xf32>
    %285 = math.exp %284 : vector<16x96xf32>
    %cst_89 = arith.constant 1.000000e+00 : f32
    %286 = vector.broadcast %cst_89 : f32 to vector<16x96xf32>
    %287 = arith.addf %286, %285 : vector<16x96xf32>
    %288 = arith.divf %286, %287 : vector<16x96xf32>
    %289 = vector.extract_strided_slice %288 {offsets = [0, 0], sizes = [16, 32], strides = [1, 1]} : vector<16x96xf32> to vector<16x32xf32>
    %290 = vector.extract_strided_slice %288 {offsets = [0, 32], sizes = [16, 32], strides = [1, 1]} : vector<16x96xf32> to vector<16x32xf32>
    %291 = vector.extract_strided_slice %288 {offsets = [0, 64], sizes = [16, 32], strides = [1, 1]} : vector<16x96xf32> to vector<16x32xf32>
    %292 = vector.extract_strided_slice %282 {offsets = [0, 96], sizes = [16, 32], strides = [1, 1]} : vector<16x128xf32> to vector<16x32xf32>
    %293 = math.tanh %292 : vector<16x32xf32>
    %294 = arith.mulf %290, %276 : vector<16x32xf32>
    %295 = arith.mulf %289, %293 : vector<16x32xf32>
    %296 = arith.addf %294, %295 : vector<16x32xf32>
    %297 = math.tanh %296 : vector<16x32xf32>
    %298 = arith.mulf %291, %297 : vector<16x32xf32>
    %c3 = arith.constant 3 : index
    %c0_90 = arith.constant 0 : index
    %c0_91 = arith.constant 0 : index
    %299 = vector.load %arg15[%c3, %c0_90, %c0_91] : memref<4x64x128xf32, #tpu.memory_space<vmem>>, vector<1x64x128xf32>
    %300 = vector.shape_cast %299 : vector<1x64x128xf32> to vector<64x128xf32>
    %c3_92 = arith.constant 3 : index
    %c0_93 = arith.constant 0 : index
    %c0_94 = arith.constant 0 : index
    %301 = vector.load %arg16[%c3_92, %c0_93, %c0_94] : memref<4x1x128xf32, #tpu.memory_space<vmem>>, vector<1x1x128xf32>
    %302 = vector.shape_cast %301 : vector<1x1x128xf32> to vector<1x128xf32>
    %cst_95 = arith.constant 0.000000e+00 : f32
    %303 = vector.broadcast %cst_95 : f32 to vector<16x32xf32>
    %cst_96 = arith.constant 0.000000e+00 : f32
    %304 = vector.broadcast %cst_96 : f32 to vector<16x32xf32>
    %305 = tpu.concatenate %258, %303 in 1 : vector<16x32xf32>, vector<16x32xf32> -> vector<16x64xf32>
    %cst_97 = arith.constant dense<0.000000e+00> : vector<16x128xf32>
    %306 = tpu.matmul %305, %300, %cst_97 {dimension_numbers = #tpu.dot_dimension_numbers<[1], [0], [0], [1], [0, 0, 1, 1], [], []>} : vector<16x64xf32>, vector<64x128xf32>, vector<16x128xf32> -> vector<16x128xf32>
    %307 = vector.broadcast %302 : vector<1x128xf32> to vector<16x128xf32>
    %308 = arith.addf %306, %307 : vector<16x128xf32>
    %309 = vector.extract_strided_slice %308 {offsets = [0, 0], sizes = [16, 96], strides = [1, 1]} : vector<16x128xf32> to vector<16x96xf32>
    %310 = arith.negf %309 : vector<16x96xf32>
    %311 = math.exp %310 : vector<16x96xf32>
    %cst_98 = arith.constant 1.000000e+00 : f32
    %312 = vector.broadcast %cst_98 : f32 to vector<16x96xf32>
    %313 = arith.addf %312, %311 : vector<16x96xf32>
    %314 = arith.divf %312, %313 : vector<16x96xf32>
    %315 = vector.extract_strided_slice %314 {offsets = [0, 0], sizes = [16, 32], strides = [1, 1]} : vector<16x96xf32> to vector<16x32xf32>
    %316 = vector.extract_strided_slice %314 {offsets = [0, 32], sizes = [16, 32], strides = [1, 1]} : vector<16x96xf32> to vector<16x32xf32>
    %317 = vector.extract_strided_slice %314 {offsets = [0, 64], sizes = [16, 32], strides = [1, 1]} : vector<16x96xf32> to vector<16x32xf32>
    %318 = vector.extract_strided_slice %308 {offsets = [0, 96], sizes = [16, 32], strides = [1, 1]} : vector<16x128xf32> to vector<16x32xf32>
    %319 = math.tanh %318 : vector<16x32xf32>
    %320 = arith.mulf %316, %304 : vector<16x32xf32>
    %321 = arith.mulf %315, %319 : vector<16x32xf32>
    %322 = arith.addf %320, %321 : vector<16x32xf32>
    %323 = math.tanh %322 : vector<16x32xf32>
    %324 = arith.mulf %317, %323 : vector<16x32xf32>
    %325 = tpu.concatenate %278, %324 in 1 : vector<16x32xf32>, vector<16x32xf32> -> vector<16x64xf32>
    %cst_99 = arith.constant dense<0.000000e+00> : vector<16x128xf32>
    %326 = tpu.matmul %325, %300, %cst_99 {dimension_numbers = #tpu.dot_dimension_numbers<[1], [0], [0], [1], [0, 0, 1, 1], [], []>} : vector<16x64xf32>, vector<64x128xf32>, vector<16x128xf32> -> vector<16x128xf32>
    %327 = vector.broadcast %302 : vector<1x128xf32> to vector<16x128xf32>
    %328 = arith.addf %326, %327 : vector<16x128xf32>
    %329 = vector.extract_strided_slice %328 {offsets = [0, 0], sizes = [16, 96], strides = [1, 1]} : vector<16x128xf32> to vector<16x96xf32>
    %330 = arith.negf %329 : vector<16x96xf32>
    %331 = math.exp %330 : vector<16x96xf32>
    %cst_100 = arith.constant 1.000000e+00 : f32
    %332 = vector.broadcast %cst_100 : f32 to vector<16x96xf32>
    %333 = arith.addf %332, %331 : vector<16x96xf32>
    %334 = arith.divf %332, %333 : vector<16x96xf32>
    %335 = vector.extract_strided_slice %334 {offsets = [0, 0], sizes = [16, 32], strides = [1, 1]} : vector<16x96xf32> to vector<16x32xf32>
    %336 = vector.extract_strided_slice %334 {offsets = [0, 32], sizes = [16, 32], strides = [1, 1]} : vector<16x96xf32> to vector<16x32xf32>
    %337 = vector.extract_strided_slice %334 {offsets = [0, 64], sizes = [16, 32], strides = [1, 1]} : vector<16x96xf32> to vector<16x32xf32>
    %338 = vector.extract_strided_slice %328 {offsets = [0, 96], sizes = [16, 32], strides = [1, 1]} : vector<16x128xf32> to vector<16x32xf32>
    %339 = math.tanh %338 : vector<16x32xf32>
    %340 = arith.mulf %336, %322 : vector<16x32xf32>
    %341 = arith.mulf %335, %339 : vector<16x32xf32>
    %342 = arith.addf %340, %341 : vector<16x32xf32>
    %343 = math.tanh %342 : vector<16x32xf32>
    %344 = arith.mulf %337, %343 : vector<16x32xf32>
    %345 = tpu.concatenate %298, %344 in 1 : vector<16x32xf32>, vector<16x32xf32> -> vector<16x64xf32>
    %cst_101 = arith.constant dense<0.000000e+00> : vector<16x128xf32>
    %346 = tpu.matmul %345, %300, %cst_101 {dimension_numbers = #tpu.dot_dimension_numbers<[1], [0], [0], [1], [0, 0, 1, 1], [], []>} : vector<16x64xf32>, vector<64x128xf32>, vector<16x128xf32> -> vector<16x128xf32>
    %347 = vector.broadcast %302 : vector<1x128xf32> to vector<16x128xf32>
    %348 = arith.addf %346, %347 : vector<16x128xf32>
    %349 = vector.extract_strided_slice %348 {offsets = [0, 0], sizes = [16, 96], strides = [1, 1]} : vector<16x128xf32> to vector<16x96xf32>
    %350 = arith.negf %349 : vector<16x96xf32>
    %351 = math.exp %350 : vector<16x96xf32>
    %cst_102 = arith.constant 1.000000e+00 : f32
    %352 = vector.broadcast %cst_102 : f32 to vector<16x96xf32>
    %353 = arith.addf %352, %351 : vector<16x96xf32>
    %354 = arith.divf %352, %353 : vector<16x96xf32>
    %355 = vector.extract_strided_slice %354 {offsets = [0, 0], sizes = [16, 32], strides = [1, 1]} : vector<16x96xf32> to vector<16x32xf32>
    %356 = vector.extract_strided_slice %354 {offsets = [0, 32], sizes = [16, 32], strides = [1, 1]} : vector<16x96xf32> to vector<16x32xf32>
    %357 = vector.extract_strided_slice %354 {offsets = [0, 64], sizes = [16, 32], strides = [1, 1]} : vector<16x96xf32> to vector<16x32xf32>
    %358 = vector.extract_strided_slice %348 {offsets = [0, 96], sizes = [16, 32], strides = [1, 1]} : vector<16x128xf32> to vector<16x32xf32>
    %359 = math.tanh %358 : vector<16x32xf32>
    %360 = arith.mulf %356, %342 : vector<16x32xf32>
    %361 = arith.mulf %355, %359 : vector<16x32xf32>
    %362 = arith.addf %360, %361 : vector<16x32xf32>
    %363 = math.tanh %362 : vector<16x32xf32>
    %364 = arith.mulf %357, %363 : vector<16x32xf32>
    %cst_103 = arith.constant 0.000000e+00 : f32
    %365 = vector.broadcast %cst_103 : f32 to vector<16x32xf32>
    %366 = arith.maximumf %364, %365 : vector<16x32xf32>
    %c0_104 = arith.constant 0 : index
    %c0_105 = arith.constant 0 : index
    %367 = vector.load %arg18[%c0_104, %c0_105] : memref<3x32xf32, #tpu.memory_space<vmem>>, vector<3x32xf32>
    %cst_106 = arith.constant 0.000000e+00 : f32
    %368 = vector.broadcast %cst_106 : f32 to vector<16x32xf32>
    %369 = vector.extract_strided_slice %0 {offsets = [0, 0], sizes = [16, 1], strides = [1, 1]} : vector<48x4xf32> to vector<16x1xf32>
    %370 = vector.extract_strided_slice %367 {offsets = [0, 0], sizes = [1, 32], strides = [1, 1]} : vector<3x32xf32> to vector<1x32xf32>
    %371 = vector.broadcast %369 : vector<16x1xf32> to vector<16x32xf32>
    %372 = vector.broadcast %370 : vector<1x32xf32> to vector<16x32xf32>
    %373 = arith.mulf %371, %372 : vector<16x32xf32>
    %374 = arith.addf %368, %373 : vector<16x32xf32>
    %375 = vector.extract_strided_slice %0 {offsets = [16, 0], sizes = [16, 1], strides = [1, 1]} : vector<48x4xf32> to vector<16x1xf32>
    %376 = vector.extract_strided_slice %367 {offsets = [1, 0], sizes = [1, 32], strides = [1, 1]} : vector<3x32xf32> to vector<1x32xf32>
    %377 = vector.broadcast %375 : vector<16x1xf32> to vector<16x32xf32>
    %378 = vector.broadcast %376 : vector<1x32xf32> to vector<16x32xf32>
    %379 = arith.mulf %377, %378 : vector<16x32xf32>
    %380 = arith.addf %374, %379 : vector<16x32xf32>
    %381 = vector.extract_strided_slice %0 {offsets = [32, 0], sizes = [16, 1], strides = [1, 1]} : vector<48x4xf32> to vector<16x1xf32>
    %382 = vector.extract_strided_slice %367 {offsets = [2, 0], sizes = [1, 32], strides = [1, 1]} : vector<3x32xf32> to vector<1x32xf32>
    %383 = vector.broadcast %381 : vector<16x1xf32> to vector<16x32xf32>
    %384 = vector.broadcast %382 : vector<1x32xf32> to vector<16x32xf32>
    %385 = arith.mulf %383, %384 : vector<16x32xf32>
    %386 = arith.addf %380, %385 : vector<16x32xf32>
    %c0_107 = arith.constant 0 : index
    %c0_108 = arith.constant 0 : index
    %387 = vector.load %arg17[%c0_107, %c0_108] : memref<32x32xf32, #tpu.memory_space<vmem>>, vector<32x32xf32>
    %cst_109 = arith.constant dense<0.000000e+00> : vector<16x32xf32>
    %388 = tpu.matmul %366, %387, %cst_109 {dimension_numbers = #tpu.dot_dimension_numbers<[1], [0], [0], [1], [0, 0, 1, 1], [], []>} : vector<16x32xf32>, vector<32x32xf32>, vector<16x32xf32> -> vector<16x32xf32>
    %389 = arith.addf %388, %386 : vector<16x32xf32>
    %c0_110 = arith.constant 0 : index
    %c0_111 = arith.constant 0 : index
    %390 = vector.load %arg19[%c0_110, %c0_111] : memref<1x32xf32, #tpu.memory_space<vmem>>, vector<1x32xf32>
    %391 = vector.broadcast %390 : vector<1x32xf32> to vector<16x32xf32>
    %392 = arith.addf %389, %391 : vector<16x32xf32>
    %cst_112 = arith.constant 0.000000e+00 : f32
    %393 = vector.broadcast %cst_112 : f32 to vector<16x32xf32>
    %394 = arith.maximumf %392, %393 : vector<16x32xf32>
    %c0_113 = arith.constant 0 : index
    %c0_114 = arith.constant 0 : index
    %395 = vector.load %arg20[%c0_113, %c0_114] : memref<32x1xf32, #tpu.memory_space<vmem>>, vector<32x1xf32>
    %cst_115 = arith.constant dense<0.000000e+00> : vector<16x1xf32>
    %396 = tpu.matmul %394, %395, %cst_115 {dimension_numbers = #tpu.dot_dimension_numbers<[1], [0], [0], [1], [0, 0, 1, 1], [], []>} : vector<16x32xf32>, vector<32x1xf32>, vector<16x1xf32> -> vector<16x1xf32>
    %c0_116 = arith.constant 0 : index
    %c0_117 = arith.constant 0 : index
    %397 = vector.load %arg21[%c0_116, %c0_117] : memref<1x1xf32, #tpu.memory_space<vmem>>, vector<1x1xf32>
    %398 = vector.broadcast %397 : vector<1x1xf32> to vector<16x1xf32>
    %399 = arith.addf %396, %398 : vector<16x1xf32>
    %400 = arith.negf %399 : vector<16x1xf32>
    %401 = math.exp %400 : vector<16x1xf32>
    %cst_118 = arith.constant 1.000000e+00 : f32
    %402 = vector.broadcast %cst_118 : f32 to vector<16x1xf32>
    %403 = arith.addf %402, %401 : vector<16x1xf32>
    %404 = arith.divf %402, %403 : vector<16x1xf32>
    %c0_119 = arith.constant 0 : index
    %c0_120 = arith.constant 0 : index
    %405 = vector.load %arg22[%c0_119, %c0_120] : memref<16x1xf32, #tpu.memory_space<vmem>>, vector<16x1xf32>
    tpu.vector_store %arg22[%c0_119, %c0_120], %404 {strides = array<i32>} : memref<16x1xf32, #tpu.memory_space<vmem>>, vector<16x1xf32>,
    return
  }
  func.func @transform_0(%arg0: i32) -> (i32, i32) {
    %c0_i32 = arith.constant 0 : i32
    %c0_i32_0 = arith.constant 0 : i32
    %c0_i32_1 = arith.constant 0 : i32
    return %c0_i32, %c0_i32_0 : i32, i32
  }
  func.func @transform_1(%arg0: i32) -> (i32, i32) {
    %c0_i32 = arith.constant 0 : i32
    %c0_i32_0 = arith.constant 0 : i32
    %c0_i32_1 = arith.constant 0 : i32
    return %c0_i32, %c0_i32_0 : i32, i32
  }
  func.func @transform_2(%arg0: i32) -> (i32, i32) {
    %c0_i32 = arith.constant 0 : i32
    %c0_i32_0 = arith.constant 0 : i32
    %c0_i32_1 = arith.constant 0 : i32
    return %c0_i32, %c0_i32_0 : i32, i32
  }
  func.func @transform_3(%arg0: i32) -> (i32, i32) {
    %c0_i32 = arith.constant 0 : i32
    %c0_i32_0 = arith.constant 0 : i32
    %c0_i32_1 = arith.constant 0 : i32
    return %c0_i32, %c0_i32_0 : i32, i32
  }
  func.func @transform_4(%arg0: i32) -> (i32, i32) {
    %c0_i32 = arith.constant 0 : i32
    %c0_i32_0 = arith.constant 0 : i32
    %c0_i32_1 = arith.constant 0 : i32
    return %c0_i32, %c0_i32_0 : i32, i32
  }
  func.func @transform_5(%arg0: i32) -> (i32, i32) {
    %c0_i32 = arith.constant 0 : i32
    %c0_i32_0 = arith.constant 0 : i32
    %c0_i32_1 = arith.constant 0 : i32
    return %c0_i32, %c0_i32_0 : i32, i32
  }
  func.func @transform_6(%arg0: i32) -> (i32, i32) {
    %c0_i32 = arith.constant 0 : i32
    %c0_i32_0 = arith.constant 0 : i32
    %c0_i32_1 = arith.constant 0 : i32
    return %c0_i32, %c0_i32_0 : i32, i32
  }
  func.func @transform_7(%arg0: i32) -> (i32, i32) {
    %c0_i32 = arith.constant 0 : i32
    %c0_i32_0 = arith.constant 0 : i32
    %c0_i32_1 = arith.constant 0 : i32
    return %c0_i32, %c0_i32_0 : i32, i32
  }
  func.func @transform_8(%arg0: i32) -> (i32, i32) {
    %c0_i32 = arith.constant 0 : i32
    %c0_i32_0 = arith.constant 0 : i32
    %c0_i32_1 = arith.constant 0 : i32
    return %c0_i32, %c0_i32_0 : i32, i32
  }
  func.func @transform_9(%arg0: i32) -> (i32, i32) {
    %c0_i32 = arith.constant 0 : i32
    %c0_i32_0 = arith.constant 0 : i32
    %c0_i32_1 = arith.constant 0 : i32
    return %c0_i32, %c0_i32_0 : i32, i32
  }
  func.func @transform_10(%arg0: i32) -> (i32, i32) {
    %c0_i32 = arith.constant 0 : i32
    %c0_i32_0 = arith.constant 0 : i32
    %c0_i32_1 = arith.constant 0 : i32
    return %c0_i32, %c0_i32_0 : i32, i32
  }
  func.func @transform_11(%arg0: i32) -> (i32, i32) {
    %c0_i32 = arith.constant 0 : i32
    %c0_i32_0 = arith.constant 0 : i32
    %c0_i32_1 = arith.constant 0 : i32
    return %c0_i32, %c0_i32_0 : i32, i32
  }
  func.func @transform_12(%arg0: i32) -> (i32, i32) {
    %c0_i32 = arith.constant 0 : i32
    %c0_i32_0 = arith.constant 0 : i32
    %c0_i32_1 = arith.constant 0 : i32
    return %c0_i32, %c0_i32_0 : i32, i32
  }
  func.func @transform_13(%arg0: i32) -> (i32, i32) {
    %c0_i32 = arith.constant 0 : i32
    %c0_i32_0 = arith.constant 0 : i32
    %c0_i32_1 = arith.constant 0 : i32
    return %c0_i32, %c0_i32_0 : i32, i32
  }
  func.func @transform_14(%arg0: i32) -> (i32, i32, i32) {
    %c0_i32 = arith.constant 0 : i32
    %c0_i32_0 = arith.constant 0 : i32
    %c0_i32_1 = arith.constant 0 : i32
    %c0_i32_2 = arith.constant 0 : i32
    return %c0_i32, %c0_i32_0, %c0_i32_1 : i32, i32, i32
  }
  func.func @transform_15(%arg0: i32) -> (i32, i32, i32) {
    %c0_i32 = arith.constant 0 : i32
    %c0_i32_0 = arith.constant 0 : i32
    %c0_i32_1 = arith.constant 0 : i32
    %c0_i32_2 = arith.constant 0 : i32
    return %c0_i32, %c0_i32_0, %c0_i32_1 : i32, i32, i32
  }
  func.func @transform_16(%arg0: i32) -> (i32, i32) {
    %c0_i32 = arith.constant 0 : i32
    %c0_i32_0 = arith.constant 0 : i32
    %c0_i32_1 = arith.constant 0 : i32
    return %c0_i32, %c0_i32_0 : i32, i32
  }
  func.func @transform_17(%arg0: i32) -> (i32, i32) {
    %c0_i32 = arith.constant 0 : i32
    %c0_i32_0 = arith.constant 0 : i32
    %c0_i32_1 = arith.constant 0 : i32
    return %c0_i32, %c0_i32_0 : i32, i32
  }
  func.func @transform_18(%arg0: i32) -> (i32, i32) {
    %c0_i32 = arith.constant 0 : i32
    %c0_i32_0 = arith.constant 0 : i32
    %c0_i32_1 = arith.constant 0 : i32
    return %c0_i32, %c0_i32_0 : i32, i32
  }
  func.func @transform_19(%arg0: i32) -> (i32, i32) {
    %c0_i32 = arith.constant 0 : i32
    %c0_i32_0 = arith.constant 0 : i32
    %c0_i32_1 = arith.constant 0 : i32
    return %c0_i32, %c0_i32_0 : i32, i32
  }
  func.func @transform_20(%arg0: i32) -> (i32, i32) {
    %c0_i32 = arith.constant 0 : i32
    %c0_i32_0 = arith.constant 0 : i32
    %c0_i32_1 = arith.constant 0 : i32
    return %c0_i32, %c0_i32_0 : i32, i32
  }
  func.func @transform_21(%arg0: i32) -> (i32, i32) {
    %c0_i32 = arith.constant 0 : i32
    %c0_i32_0 = arith.constant 0 : i32
    %c0_i32_1 = arith.constant 0 : i32
    return %c0_i32, %c0_i32_0 : i32, i32
  }
}

</mosaic_0001>

<bundles_post_ra>
// kernel: mpnn_lstm_forward.1
= control target key start
LH: loop header
LB: loop body
LE: loop exit
PB: predicated region body
PF: predicated region fallthrough
CT: control target
= control target key end

     0   :  { %vm105_vm0 = vcmask 1043456   ;;  %vm86_vm1 = vcmask 31744   ;;  %vm210_vm2 = vcmask 392192   ;;  %vm330_vm3 = vcmask 261120   ;;  %s5260_s2 = inlined_call_operand.vmem [shape: f32[4,32], index: 2, kind: input, shape index: {}]   ;;  %s5261_s0 = inlined_call_operand.vmem [shape: f32[48,4], index: 0, kind: input, shape index: {}]   ;;  %s5262_s1 = inlined_call_operand.vmem [shape: f32[48,48], index: 1, kind: input, shape index: {}]   ;;  %s5263_s3 = inlined_call_operand.vmem [shape: f32[1,32], index: 3, kind: input, shape index: {}]   ;;  %s5264_s6 = inlined_call_operand.vmem [shape: f32[32,32], index: 6, kind: input, shape index: {}]   ;;  %s5265_s4 = inlined_call_operand.vmem [shape: f32[1,32], index: 4, kind: input, shape index: {}]   ;;  %s5266_s5 = inlined_call_operand.vmem [shape: f32[1,32], index: 5, kind: input, shape index: {}]   ;;  %s5267_s7 = inlined_call_operand.vmem [shape: f32[1,32], index: 7, kind: input, shape index: {}]   ;;  %s5268_s10 = inlined_call_operand.vmem [shape: f32[32,32], index: 10, kind: input, shape index: {}]   ;;  %s5269_s8 = inlined_call_operand.vmem [shape: f32[1,32], index: 8, kind: input, shape index: {}]   ;;  %s5270_s9 = inlined_call_operand.vmem [shape: f32[1,32], index: 9, kind: input, shape index: {}]   ;;  %s5271_s11 = inlined_call_operand.vmem [shape: f32[1,32], index: 11, kind: input, shape index: {}]   ;;  %s5272_s14 = inlined_call_operand.vmem [shape: f32[4,64,128], index: 14, kind: input, shape index: {}]   ;;  %s5273_s12 = inlined_call_operand.vmem [shape: f32[1,32], index: 12, kind: input, shape index: {}]   ;;  %s5274_s13 = inlined_call_operand.vmem [shape: f32[1,32], index: 13, kind: input, shape index: {}]   ;;  %s5275_s15 = inlined_call_operand.vmem [shape: f32[4,1,128], index: 15, kind: input, shape index: {}]   ;;  %s5276_s16 = inlined_call_operand.vmem [shape: f32[32,32], index: 16, kind: input, shape index: {}]   ;;  %s5277_s19 = inlined_call_operand.vmem [shape: f32[32,1], index: 19, kind: input, shape index: {}]   ;;  %s5278_s20 = inlined_call_operand.<no memory space> [shape: f32[1,1], index: 20, kind: input, shape index: {}]   ;;  %s5279_s17 = inlined_call_operand.vmem [shape: f32[3,32], index: 17, kind: input, shape index: {}]   ;;  %s5280_s18 = inlined_call_operand.vmem [shape: f32[1,32], index: 18, kind: input, shape index: {}]   ;;  %s5281_s21 = inlined_call_operand.vmem [shape: f32[16,1], index: 21, kind: output, shape index: {}]  }
   0x1   :  { %5285 = sst [smem:[#allocation3_spill]] %s5260_s2  ;;  %vm1109_vm4 = vcmask 523264   ;;  %vm3110_vm5 = vcmask 7168  }
   0x2   :  { %5286 = sst [smem:[#allocation4_spill]] %s5261_s0  ;;  %s5291_s26 = sld [smem:[#allocation3_spill]] }
   0x3   :  { %5287 = sst [smem:[#allocation5_spill]] %s5262_s1  ;;  %s5292_s28 = sld [smem:[#allocation4_spill]] }
   0x4   :  { %5288 = sst [smem:[#allocation6_spill]] %s5263_s3  ;;  %s5293_s27 = sld [smem:[#allocation5_spill]] }
   0x5   :  { %5289 = sst [smem:[#allocation7_spill]] %s5264_s6 }
   0x6   :  { %5290 = sst [smem:[#allocation8_spill]] %s5265_s4  ;;  %s5295_s29 = sld [smem:[#allocation7_spill]] }
   0x7   :  { %s5296_s1 = sld [smem:[#allocation8_spill]] }
   0x8   :  { %v82_v0 = vld [vmem:[%s5291_s26] sm:$0xf]  ;;  %s5294_s26 = sld [smem:[#allocation6_spill]] }
   0x9   :  { %v70_v1 = vld [vmem:[%s5292_s28] sm:$0xff]  ;;  %v71_v2 = vld [vmem:[%s5292_s28 + $0x8] sm:$0xff]  ;;  %3445 = vmatprep.subr.msk.mxu1 %vm105_vm0, %v82_v0  ;;  %v72_v3 = vld [vmem:[%s5292_s28 + $0x10] sm:$0xff] }
   0xa   :  { %3447 = vmatprep.mubr.msk.f32.mxu1 %vm86_vm1, %v70_v1  ;;  %3446 = vmatpush3.msk.msra.mxu1 %vm105_vm0, %v82_v0  ;;  %v73_v4 = vld [vmem:[%s5292_s28 + $0x18] sm:$0xff]  ;;  %v74_v5 = vld [vmem:[%s5292_s28 + $0x20] sm:$0xff]  ;;  %v75_v6 = vld [vmem:[%s5292_s28 + $0x28] sm:$0xff] }
   0xb   :  { %3448 = vmatmul.mubr.msk.f32.vlgmr.msra.gmra.mrb[0].mxu1 %vm86_vm1, %v71_v2  ;;  %v4449_v7 = vld [vmem:[%s5293_s27] sm:$0xff]  ;;  %v4456_v17 = vld [vmem:[%s5293_s27 + $0x8] sm:$0xff]  ;;  %v4461_v18 = vld [vmem:[%s5293_s27 + $0x10] sm:$0xff] }
   0xc   :  { %3450 = vmatprep.mubr.msk.f32.mxu1 %vm86_vm1, %v72_v3  ;;  %v4470_v19 = vld [vmem:[%s5293_s27 + $0x18] sm:$0xff]  ;;  %v4475_v20 = vld [vmem:[%s5293_s27 + $0x20] sm:$0xff]  ;;  %v4484_v21 = vld [vmem:[%s5293_s27 + $0x28] sm:$0xff]  ;;  %s4312_s27 = smov 96  }
   0xe   :  { %v3124_v22 = vld [vmem:[%s5294_s26] ss:$0 sm:$0xff] }
   0xf   :  { %3451 = vmatmul.mubr.msk.f32.gmra.mrb[2].mxu1 %vm86_vm1, %v73_v4 }
  0x10   :  { %3453 = vmatprep.mubr.msk.f32.mxu1 %vm86_vm1, %v74_v5 }
  0x13   :  { %3454 = vmatmul.mubr.msk.f32.gmra.mrb[4].mxu1 %vm86_vm1, %v75_v6 }
  0x14   :  { %3468 = vmatprep.mubr.msk.f32.mxu1 %vm210_vm2, %v4449_v7 }
  0xde   :  { %v3449_v8 = vpop.f32.mrb[0].mxu1 }
  0xdf   :  { %v175_v9 = vpop.f32.mrb[1].mxu1 }
  0xe0   :  { %v3803_v10 = vpack.c.bf16 %v3449_v8, %v175_v9 }
  0xe2   :  { %v3452_v11 = vpop.f32.mrb[2].mxu1  ;;  %3804 = vmatprep.subr.bf16.mxu1 %v3803_v10 }
  0xe3   :  { %v185_v12 = vpop.f32.mrb[3].mxu1  ;;  %3806 = vmatpush3.bf16.msra.mxu1 %v3803_v10 }
  0xe4   :  { %v3807_v13 = vpack.c.bf16 %v3452_v11, %v185_v12 }
  0xe6   :  { %v3455_v14 = vpop.f32.mrb[4].mxu1  ;;  %3808 = vmatprep.subr.bf16.mxu1 %v3807_v13 }
  0xe7   :  { %v195_v15 = vpop.f32.mrb[5].mxu1  ;;  %3810 = vmatpush3.bf16.msra.mxu1 %v3807_v13 }
  0xe8   :  { %v3811_v16 = vpack.c.bf16 %v3455_v14, %v195_v15  ;;  %v434_v14 = vld [vmem:[%s5295_s29] sm:$0xff]  ;;  %v435_v15 = vld [vmem:[%s5295_s29 + $0x8] sm:$0xff] }
  0xea   :  { %3812 = vmatprep.subr.bf16.mxu1 %v3811_v16 }
  0xeb   :  { %3814 = vmatpush3.bf16.msra.mxu1 %v3811_v16  ;;  %v3815_v16 = vpack.c.bf16 %v435_v15, %v434_v14  ;;  %v3139_v15 = vld [vmem:[%s5267_s7] ss:$0 sm:$0xff]  ;;  %s4313_s7 = smov 64  }
  0xed   :  { %3816 = vmatprep.subr.bf16.mxu0 %v3815_v16 }
  0xee   :  { %3469 = vmatmul.mubr.msk.f32.vlgmr.msra.gmra.mrb[6].mxu1 %vm210_vm2, %v4456_v17  ;;  %3818 = vmatpush3.bf16.msra.mxu0 %v3815_v16 }
  0xef   :  { %3471 = vmatprep.mubr.msk.f32.mxu1 %vm210_vm2, %v4461_v18 }
  0xf2   :  { %3472 = vmatmul.mubr.msk.f32.gmra.mrb[8].mxu1 %vm210_vm2, %v4470_v19 }
  0xf3   :  { %3474 = vmatprep.mubr.msk.f32.mxu1 %vm210_vm2, %v4475_v20 }
  0xf6   :  { %3475 = vmatmul.mubr.msk.f32.gmra.mrb[10].mxu1 %vm210_vm2, %v4484_v21 }
  0xf7   :  { %3506 = vmatprep.mubr.msk.f32.mxu1 %vm210_vm2, %v4449_v7 }
 0x1c1   :  { %v3470_v23 = vpop.f32.mrb[6].mxu1 }
 0x1c2   :  { %v301_v24 = vadd.f32 %v3470_v23, %v3124_v22  ;;  %v295_v25 = vpop.f32.mrb[7].mxu1  ;;  %v437_v23 = vld [vmem:[%s5295_s29 + $0x18] sm:$0xff] }
 0x1c3   :  { %v296_v26 = vadd.f32 %v3124_v22, %v295_v25 }
 0x1c4   :  { %v325_v29 = vmax.f32 %v301_v24, 0.0 }
 0x1c5   :  { %v324_v27 = vmax.f32 %v296_v26, 0.0  ;;  %v3473_v28 = vpop.f32.mrb[8].mxu1 }
 0x1c6   :  { %v305_v30 = vpop.f32.mrb[9].mxu1  ;;  %v311_v31 = vadd.f32 %v3473_v28, %v3124_v22  ;;  %v334_v37 = vsel %vm330_vm3, %v325_v29, 0.0 }
 0x1c7   :  { %v306_v32 = vadd.f32 %v3124_v22, %v305_v30  ;;  %v331_v33 = vsel %vm330_vm3, %v324_v27, 0.0 }
 0x1c8   :  { %332 = vadd.xlane.f32.xlu0 %v331_v33  ;;  %v327_v38 = vmax.f32 %v311_v31, 0.0 }
 0x1c9   :  { %v326_v34 = vmax.f32 %v306_v32, 0.0  ;;  %v3476_v35 = vpop.f32.mrb[10].mxu1 }
 0x1ca   :  { %v315_v36 = vpop.f32.mrb[11].mxu1  ;;  %v321_v39 = vadd.f32 %v3476_v35, %v3124_v22  ;;  %v340_v44 = vsel %vm330_vm3, %v327_v38, 0.0 }
 0x1cb   :  { %v316_v40 = vadd.f32 %v3124_v22, %v315_v36  ;;  %v337_v41 = vsel %vm330_vm3, %v326_v34, 0.0  ;;  %v436_v22 = vld [vmem:[%s5295_s29 + $0x10] sm:$0xff] }
 0x1cc   :  { %338 = vadd.xlane.f32.xlu1 %v337_v41  ;;  %335 = vadd.xlane.f32.xlu0 %v334_v37  ;;  %v329_v43 = vmax.f32 %v321_v39, 0.0  ;;  %v3819_v24 = vpack.c.bf16 %v437_v23, %v436_v22 }
 0x1cd   :  { %v328_v42 = vmax.f32 %v316_v40, 0.0 }
 0x1ce   :  { %v346_v46 = vsel %vm330_vm3, %v329_v43, 0.0  ;;  %3820 = vmatprep.subr.bf16.mxu0 %v3819_v24 }
 0x1cf   :  { %v343_v45 = vsel %vm330_vm3, %v328_v42, 0.0  ;;  %3822 = vmatpush3.bf16.msra.mxu0 %v3819_v24 }
 0x1d0   :  { %341 = vadd.xlane.f32.xlu1 %v340_v44  ;;  %344 = vadd.xlane.f32.xlu0 %v343_v45  ;;  %v3131_v44 = vld [vmem:[%s5296_s1] ss:$0 sm:$0xff] }
 0x1d4   :  { %347 = vadd.xlane.f32.xlu1 %v346_v46  ;;  %v3132_v46 = vld [vmem:[%s5266_s5] ss:$0 sm:$0xff] }
 0x255   :  { %v333_v47 = vpop.xlane.xlu0 %332 }
 0x256   :  { %v350_v48 = vmul.f32 0.03125, %v333_v47 }
 0x258   :  { %v4499_v49 = vsub.f32 %v324_v27, %v350_v48 }
 0x259   :  { %v339_v50 = vpop.xlane.xlu1 %338  ;;  %v336_v51 = vpop.xlane.xlu0 %335 }
 0x25a   :  { %v352_v52 = vmul.f32 0.03125, %v339_v50  ;;  %v351_v53 = vmul.f32 0.03125, %v336_v51  ;;  %v362_v54 = vmul.f32 %v4499_v49, %v4499_v49 }
 0x25c   :  { %v4503_v55 = vsub.f32 %v326_v34, %v352_v52  ;;  %v4505_v56 = vsub.f32 %v325_v29, %v351_v53  ;;  %v368_v57 = vsel %vm330_vm3, %v362_v54, 0.0 }
 0x25d   :  { %v342_v58 = vpop.xlane.xlu1 %341  ;;  %369 = vadd.xlane.f32.xlu0 %v368_v57  ;;  %v345_v59 = vpop.xlane.xlu0 %344 }
 0x25e   :  { %v353_v60 = vmul.f32 0.03125, %v342_v58  ;;  %v354_v61 = vmul.f32 0.03125, %v345_v59  ;;  %v364_v62 = vmul.f32 %v4503_v55, %v4503_v55  ;;  %v363_v63 = vmul.f32 %v4505_v56, %v4505_v56 }
 0x260   :  { %v4512_v0 = vsub.f32 %v327_v38, %v353_v60  ;;  %v4514_v1 = vsub.f32 %v328_v42, %v354_v61  ;;  %v374_v2 = vsel %vm330_vm3, %v364_v62, 0.0  ;;  %v371_v3 = vsel %vm330_vm3, %v363_v63, 0.0 }
 0x261   :  { %v348_v4 = vpop.xlane.xlu1 %347  ;;  %375 = vadd.xlane.f32.xlu0 %v374_v2  ;;  %372 = vadd.xlane.f32.xlu1 %v371_v3 }
 0x262   :  { %v355_v5 = vmul.f32 0.03125, %v348_v4  ;;  %v365_v6 = vmul.f32 %v4512_v0, %v4512_v0  ;;  %v366_v8 = vmul.f32 %v4514_v1, %v4514_v1 }
 0x264   :  { %v4522_v9 = vsub.f32 %v329_v43, %v355_v5  ;;  %v377_v10 = vsel %vm330_vm3, %v365_v6, 0.0  ;;  %v380_v11 = vsel %vm330_vm3, %v366_v8, 0.0 }
 0x265   :  { %378 = vadd.xlane.f32.xlu1 %v377_v10  ;;  %381 = vadd.xlane.f32.xlu0 %v380_v11 }
 0x266   :  { %v367_v12 = vmul.f32 %v4522_v9, %v4522_v9 }
 0x268   :  { %v383_v13 = vsel %vm330_vm3, %v367_v12, 0.0 }
 0x269   :  { %384 = vadd.xlane.f32.xlu1 %v383_v13 }
 0x2ea   :  { %v370_v25 = vpop.xlane.xlu0 %369 }
 0x2eb   :  { %v386_v26 = vmul.f32 0.03125, %v370_v25 }
 0x2ed   :  { %v392_v27 = vadd.f32 1e-05, %v386_v26 }
 0x2ee   :  { %v373_v28 = vpop.xlane.xlu1 %372  ;;  %v376_v29 = vpop.xlane.xlu0 %375 }
 0x2ef   :  { %4069 = vrsqrt.f32 %v392_v27  ;;  %v387_v30 = vmul.f32 0.03125, %v373_v28  ;;  %v388_v31 = vmul.f32 0.03125, %v376_v29 }
 0x2f1   :  { %v393_v32 = vadd.f32 1e-05, %v387_v30  ;;  %v394_v33 = vadd.f32 1e-05, %v388_v31 }
 0x2f2   :  { %v379_v34 = vpop.xlane.xlu1 %378  ;;  %v382_v35 = vpop.xlane.xlu0 %381 }
 0x2f3   :  { %4071 = vrsqrt.f32 %v393_v32  ;;  %v389_v36 = vmul.f32 0.03125, %v379_v34  ;;  %v390_v37 = vmul.f32 0.03125, %v382_v35 }
 0x2f4   :  { %4073 = vrsqrt.f32 %v394_v33 }
 0x2f5   :  { %v395_v38 = vadd.f32 1e-05, %v389_v36  ;;  %v396_v39 = vadd.f32 1e-05, %v390_v37 }
 0x2f6   :  { %v385_v40 = vpop.xlane.xlu1 %384 }
 0x2f7   :  { %4075 = vrsqrt.f32 %v395_v38  ;;  %v391_v41 = vmul.f32 0.03125, %v385_v40 }
 0x2f8   :  { %4077 = vrsqrt.f32 %v396_v39 }
 0x2f9   :  { %v4070_v42 = vpop.eup %4069  ;;  %v397_v43 = vadd.f32 1e-05, %v391_v41 }
 0x2fa   :  { %v404_v45 = vmul.f32 %v4070_v42, %v4499_v49 }
 0x2fb   :  { %4079 = vrsqrt.f32 %v397_v43 }
 0x2fc   :  { %v416_v47 = vmul.f32 %v3131_v44, %v404_v45 }
 0x2fd   :  { %v4072_v48 = vpop.eup %4071 }
 0x2fe   :  { %v4074_v50 = vpop.eup %4073  ;;  %v428_v51 = vadd.f32 %v3132_v46, %v416_v47  ;;  %v405_v52 = vmul.f32 %v4072_v48, %v4505_v56 }
 0x2ff   :  { %v406_v53 = vmul.f32 %v4074_v50, %v4503_v55 }
 0x300   :  { %3485 = vmatprep.mubr.msk.f32.mxu0 %vm330_vm3, %v428_v51  ;;  %v417_v54 = vmul.f32 %v3131_v44, %v405_v52 }
 0x301   :  { %v4076_v57 = vpop.eup %4075  ;;  %v418_v58 = vmul.f32 %v3131_v44, %v406_v53 }
 0x302   :  { %v4078_v59 = vpop.eup %4077  ;;  %v429_v49 = vadd.f32 %v3132_v46, %v417_v54  ;;  %v407_v60 = vmul.f32 %v4076_v57, %v4512_v0 }
 0x303   :  { %v430_v61 = vadd.f32 %v3132_v46, %v418_v58  ;;  %v408_v62 = vmul.f32 %v4078_v59, %v4514_v1 }
 0x304   :  { %3486 = vmatmul.mubr.msk.f32.vlgmr.msra.gmra.mrb[0].mxu0 %vm330_vm3, %v429_v49  ;;  %v419_v63 = vmul.f32 %v3131_v44, %v407_v60 }
 0x305   :  { %v4080_v2 = vpop.eup %4079  ;;  %3488 = vmatprep.mubr.msk.f32.mxu0 %vm330_vm3, %v430_v61  ;;  %v420_v56 = vmul.f32 %v3131_v44, %v408_v62 }
 0x306   :  { %v431_v55 = vadd.f32 %v3132_v46, %v419_v63  ;;  %v409_v3 = vmul.f32 %v4080_v2, %v4522_v9 }
 0x307   :  { %v432_v4 = vadd.f32 %v3132_v46, %v420_v56 }
 0x308   :  { %3489 = vmatmul.mubr.msk.f32.gmra.mrb[2].mxu0 %vm330_vm3, %v431_v55  ;;  %v421_v5 = vmul.f32 %v3131_v44, %v409_v3 }
 0x309   :  { %3491 = vmatprep.mubr.msk.f32.mxu0 %vm330_vm3, %v432_v4 }
 0x30a   :  { %v433_v0 = vadd.f32 %v3132_v46, %v421_v5 }
 0x30c   :  { %3492 = vmatmul.mubr.msk.f32.gmra.mrb[4].mxu0 %vm330_vm3, %v433_v0 }
 0x3d7   :  { %v3487_v1 = vpop.f32.mrb[0].mxu0 }
 0x3d8   :  { %v525_v6 = vpop.f32.mrb[1].mxu0 }
 0x3d9   :  { %v3823_v8 = vpack.c.bf16 %v3487_v1, %v525_v6 }
 0x3db   :  { %v3490_v10 = vpop.f32.mrb[2].mxu0  ;;  %3824 = vmatprep.subr.bf16.mxu1 %v3823_v8 }
 0x3dc   :  { %v535_v11 = vpop.f32.mrb[3].mxu0  ;;  %3826 = vmatpush3.bf16.msra.mxu1 %v3823_v8 }
 0x3dd   :  { %v3827_v12 = vpack.c.bf16 %v3490_v10, %v535_v11 }
 0x3df   :  { %v3493_v13 = vpop.f32.mrb[4].mxu0  ;;  %3828 = vmatprep.subr.bf16.mxu1 %v3827_v12 }
 0x3e0   :  { %v545_v9 = vpop.f32.mrb[5].mxu0  ;;  %3830 = vmatpush3.bf16.msra.mxu1 %v3827_v12  ;;  %v763_v12 = vld [vmem:[%s5268_s10] sm:$0xff] }
 0x3e1   :  { %v3831_v14 = vpack.c.bf16 %v3493_v13, %v545_v9  ;;  %v764_v13 = vld [vmem:[%s5268_s10 + $0x8] sm:$0xff] }
 0x3e2   :  { %v3835_v9 = vpack.c.bf16 %v764_v13, %v763_v12  ;;  %v4653_v12 = vld [vmem:[%s5271_s11] ss:$0 sm:$0xff]  ;;  %s4311_s11 = smov 32  }
 0x3e3   :  { %3832 = vmatprep.subr.bf16.mxu1 %v3831_v14 }
 0x3e4   :  { %3834 = vmatpush3.bf16.msra.mxu1 %v3831_v14  ;;  %3836 = vmatprep.subr.bf16.mxu0 %v3835_v9  ;;  %v765_v14 = vld [vmem:[%s5268_s10 + $0x10] sm:$0xff] }
 0x3e5   :  { %3838 = vmatpush3.bf16.msra.mxu0 %v3835_v9 }
 0x3e7   :  { %3507 = vmatmul.mubr.msk.f32.vlgmr.msra.gmra.mrb[12].mxu1 %vm210_vm2, %v4456_v17 }
 0x3e8   :  { %3509 = vmatprep.mubr.msk.f32.mxu1 %vm210_vm2, %v4461_v18 }
 0x3eb   :  { %3510 = vmatmul.mubr.msk.f32.gmra.mrb[14].mxu1 %vm210_vm2, %v4470_v19 }
 0x3ec   :  { %3512 = vmatprep.mubr.msk.f32.mxu1 %vm210_vm2, %v4475_v20 }
 0x3ef   :  { %3513 = vmatmul.mubr.msk.f32.gmra.mrb[16].mxu1 %vm210_vm2, %v4484_v21 }
 0x3f0   :  { %3544 = vmatprep.mubr.msk.f32.mxu1 %vm210_vm2, %v4449_v7 }
 0x4ba   :  { %v3508_v16 = vpop.f32.mrb[12].mxu1 }
 0x4bb   :  { %v632_v22 = vadd.f32 %v3508_v16, %v3139_v15  ;;  %v626_v23 = vpop.f32.mrb[13].mxu1 }
 0x4bc   :  { %v627_v24 = vadd.f32 %v3139_v15, %v626_v23 }
 0x4bd   :  { %v656_v25 = vmax.f32 %v632_v22, 0.0 }
 0x4be   :  { %v655_v26 = vmax.f32 %v627_v24, 0.0  ;;  %v3511_v27 = vpop.f32.mrb[14].mxu1 }
 0x4bf   :  { %v642_v28 = vadd.f32 %v3511_v27, %v3139_v15  ;;  %v636_v29 = vpop.f32.mrb[15].mxu1  ;;  %v664_v30 = vsel %vm330_vm3, %v656_v25, 0.0 }
 0x4c0   :  { %v637_v31 = vadd.f32 %v3139_v15, %v636_v29  ;;  %665 = vadd.xlane.f32.xlu1 %v664_v30  ;;  %v661_v32 = vsel %vm330_vm3, %v655_v26, 0.0 }
 0x4c1   :  { %v658_v7 = vmax.f32 %v642_v28, 0.0  ;;  %662 = vadd.xlane.f32.xlu0 %v661_v32 }
 0x4c2   :  { %v657_v33 = vmax.f32 %v637_v31, 0.0  ;;  %v3514_v34 = vpop.f32.mrb[16].mxu1 }
 0x4c3   :  { %v652_v35 = vadd.f32 %v3514_v34, %v3139_v15  ;;  %v646_v36 = vpop.f32.mrb[17].mxu1  ;;  %v670_v37 = vsel %vm330_vm3, %v658_v7, 0.0 }
 0x4c4   :  { %v647_v38 = vadd.f32 %v3139_v15, %v646_v36  ;;  %671 = vadd.xlane.f32.xlu1 %v670_v37  ;;  %v667_v39 = vsel %vm330_vm3, %v657_v33, 0.0  ;;  %v766_v15 = vld [vmem:[%s5268_s10 + $0x18] sm:$0xff] }
 0x4c5   :  { %v660_v40 = vmax.f32 %v652_v35, 0.0  ;;  %668 = vadd.xlane.f32.xlu0 %v667_v39  ;;  %v3839_v16 = vpack.c.bf16 %v766_v15, %v765_v14 }
 0x4c6   :  { %v659_v41 = vmax.f32 %v647_v38, 0.0 }
 0x4c7   :  { %v676_v42 = vsel %vm330_vm3, %v660_v40, 0.0  ;;  %3840 = vmatprep.subr.bf16.mxu0 %v3839_v16 }
 0x4c8   :  { %677 = vadd.xlane.f32.xlu1 %v676_v42  ;;  %v673_v43 = vsel %vm330_vm3, %v659_v41, 0.0  ;;  %3842 = vmatpush3.bf16.msra.mxu0 %v3839_v16 }
 0x4c9   :  { %674 = vadd.xlane.f32.xlu0 %v673_v43 }
 0x54d   :  { %v666_v44 = vpop.xlane.xlu1 %665 }
 0x54e   :  { %v680_v45 = vmul.f32 0.03125, %v666_v44  ;;  %v663_v46 = vpop.xlane.xlu0 %662 }
 0x54f   :  { %v679_v47 = vmul.f32 0.03125, %v663_v46 }
 0x550   :  { %v4580_v48 = vsub.f32 %v656_v25, %v680_v45  ;;  %v3147_v45 = vld [vmem:[%s5270_s9] ss:$0 sm:$0xff] }
 0x551   :  { %v4582_v50 = vsub.f32 %v655_v26, %v679_v47  ;;  %v672_v51 = vpop.xlane.xlu1 %671 }
 0x552   :  { %v682_v52 = vmul.f32 0.03125, %v672_v51  ;;  %v669_v53 = vpop.xlane.xlu0 %668  ;;  %v692_v54 = vmul.f32 %v4580_v48, %v4580_v48 }
 0x553   :  { %v681_v57 = vmul.f32 0.03125, %v669_v53  ;;  %v691_v58 = vmul.f32 %v4582_v50, %v4582_v50 }
 0x554   :  { %v4588_v59 = vsub.f32 %v658_v7, %v682_v52  ;;  %v700_v49 = vsel %vm330_vm3, %v692_v54, 0.0 }
 0x555   :  { %v4591_v60 = vsub.f32 %v657_v33, %v681_v57  ;;  %701 = vadd.xlane.f32.xlu1 %v700_v49  ;;  %v678_v61 = vpop.xlane.xlu1 %677  ;;  %v697_v62 = vsel %vm330_vm3, %v691_v58, 0.0 }
 0x556   :  { %v684_v63 = vmul.f32 0.03125, %v678_v61  ;;  %698 = vadd.xlane.f32.xlu0 %v697_v62  ;;  %v675_v2 = vpop.xlane.xlu0 %674  ;;  %v694_v56 = vmul.f32 %v4588_v59, %v4588_v59 }
 0x557   :  { %v683_v55 = vmul.f32 0.03125, %v675_v2  ;;  %v693_v3 = vmul.f32 %v4591_v60, %v4591_v60 }
 0x558   :  { %v4598_v4 = vsub.f32 %v660_v40, %v684_v63  ;;  %v706_v5 = vsel %vm330_vm3, %v694_v56, 0.0  ;;  %v3146_v40 = vld [vmem:[%s5269_s8] ss:$0 sm:$0xff] }
 0x559   :  { %v4601_v0 = vsub.f32 %v659_v41, %v683_v55  ;;  %707 = vadd.xlane.f32.xlu1 %v706_v5  ;;  %v703_v1 = vsel %vm330_vm3, %v693_v3, 0.0 }
 0x55a   :  { %704 = vadd.xlane.f32.xlu0 %v703_v1  ;;  %v696_v6 = vmul.f32 %v4598_v4, %v4598_v4 }
 0x55b   :  { %v695_v8 = vmul.f32 %v4601_v0, %v4601_v0 }
 0x55c   :  { %v712_v10 = vsel %vm330_vm3, %v696_v6, 0.0 }
 0x55d   :  { %713 = vadd.xlane.f32.xlu1 %v712_v10  ;;  %v709_v11 = vsel %vm330_vm3, %v695_v8, 0.0 }
 0x55e   :  { %710 = vadd.xlane.f32.xlu0 %v709_v11 }
 0x5e2   :  { %v702_v22 = vpop.xlane.xlu1 %701 }
 0x5e3   :  { %v716_v23 = vmul.f32 0.03125, %v702_v22  ;;  %v699_v24 = vpop.xlane.xlu0 %698 }
 0x5e4   :  { %v715_v25 = vmul.f32 0.03125, %v699_v24 }
 0x5e5   :  { %v722_v26 = vadd.f32 1e-05, %v716_v23 }
 0x5e6   :  { %v721_v27 = vadd.f32 1e-05, %v715_v25  ;;  %v708_v28 = vpop.xlane.xlu1 %707 }
 0x5e7   :  { %4081 = vrsqrt.f32 %v722_v26  ;;  %v718_v29 = vmul.f32 0.03125, %v708_v28  ;;  %v705_v30 = vpop.xlane.xlu0 %704 }
 0x5e8   :  { %4083 = vrsqrt.f32 %v721_v27  ;;  %v717_v31 = vmul.f32 0.03125, %v705_v30  ;;  %v1092_v30 = vld [vmem:[%s5272_s14] sm:$0xff] }
 0x5e9   :  { %v724_v32 = vadd.f32 1e-05, %v718_v29 }
 0x5ea   :  { %v723_v7 = vadd.f32 1e-05, %v717_v31  ;;  %v714_v33 = vpop.xlane.xlu1 %713  ;;  %v1093_v31 = vld [vmem:[%s5272_s14 + $0x8] sm:$0xff] }
 0x5eb   :  { %4085 = vrsqrt.f32 %v724_v32  ;;  %v720_v34 = vmul.f32 0.03125, %v714_v33  ;;  %v711_v35 = vpop.xlane.xlu0 %710  ;;  %v3855_v32 = vpack.c.bf16 %v1093_v31, %v1092_v30  ;;  %v1095_v33 = vld [vmem:[%s5272_s14 + $0x18] sm:$0xff] }
 0x5ec   :  { %4087 = vrsqrt.f32 %v723_v7  ;;  %v719_v36 = vmul.f32 0.03125, %v711_v35  ;;  %v1094_v7 = vld [vmem:[%s5272_s14 + $0x10] sm:$0xff]  ;;  %v1096_v35 = vld [vmem:[%s5272_s14 + $0x20] sm:$0xff] }
 0x5ed   :  { %v726_v37 = vadd.f32 1e-05, %v720_v34  ;;  %3856 = vmatprep.subr.bf16.mxu0 %v3855_v32  ;;  %v3859_v34 = vpack.c.bf16 %v1095_v33, %v1094_v7 }
 0x5ee   :  { %v725_v38 = vadd.f32 1e-05, %v719_v36  ;;  %v1097_v36 = vld [vmem:[%s5272_s14 + $0x28] sm:$0xff] }
 0x5ef   :  { %4089 = vrsqrt.f32 %v726_v37  ;;  %v3863_v37 = vpack.c.bf16 %v1097_v36, %v1096_v35 }
 0x5f0   :  { %4091 = vrsqrt.f32 %v725_v38  ;;  %v1098_v38 = vld [vmem:[%s5272_s14 + $0x30] sm:$0xff] }
 0x5f1   :  { %v4082_v39 = vpop.eup %4081 }
 0x5f2   :  { %v4084_v41 = vpop.eup %4083  ;;  %v734_v42 = vmul.f32 %v4082_v39, %v4580_v48  ;;  %v1099_v39 = vld [vmem:[%s5272_s14 + $0x38] sm:$0xff] }
 0x5f3   :  { %v733_v43 = vmul.f32 %v4084_v41, %v4582_v50 }
 0x5f4   :  { %v746_v44 = vmul.f32 %v3146_v40, %v734_v42 }
 0x5f5   :  { %v4086_v46 = vpop.eup %4085  ;;  %v745_v47 = vmul.f32 %v3146_v40, %v733_v43 }
 0x5f6   :  { %v4088_v51 = vpop.eup %4087  ;;  %v736_v52 = vmul.f32 %v4086_v46, %v4588_v59  ;;  %v758_v57 = vadd.f32 %v3147_v45, %v746_v44 }
 0x5f7   :  { %v757_v53 = vadd.f32 %v3147_v45, %v745_v47  ;;  %v735_v54 = vmul.f32 %v4088_v51, %v4591_v60  ;;  %v4688_v51 = vld [vmem:[%s5273_s12] ss:$0 sm:$0xff] }
 0x5f8   :  { %v748_v58 = vmul.f32 %v3146_v40, %v736_v52 }
 0x5f9   :  { %v4090_v49 = vpop.eup %4089  ;;  %3523 = vmatprep.mubr.msk.f32.mxu0 %vm330_vm3, %v757_v53  ;;  %v747_v48 = vmul.f32 %v3146_v40, %v735_v54  ;;  %v4693_v54 = vld [vmem:[%s5274_s13] ss:$0 sm:$0xff] }
 0x5fa   :  { %v4092_v50 = vpop.eup %4091  ;;  %3524 = vmatmul.mubr.msk.f32.vlgmr.msra.gmra.mrb[6].mxu0 %vm330_vm3, %v758_v57  ;;  %v738_v61 = vmul.f32 %v4090_v49, %v4598_v4  ;;  %v760_v2 = vadd.f32 %v3147_v45, %v748_v58 }
 0x5fb   :  { %v759_v62 = vadd.f32 %v3147_v45, %v747_v48  ;;  %v737_v63 = vmul.f32 %v4092_v50, %v4601_v0  ;;  %3858 = vmatpush3.bf16.msra.mxu0 %v3855_v32 }
 0x5fc   :  { %v750_v56 = vmul.f32 %v3146_v40, %v738_v61  ;;  %3860 = vmatprep.subr.bf16.mxu0 %v3859_v34 }
 0x5fd   :  { %3526 = vmatprep.mubr.msk.f32.mxu0 %vm330_vm3, %v759_v62  ;;  %v749_v59 = vmul.f32 %v3146_v40, %v737_v63  ;;  %v3867_v40 = vpack.c.bf16 %v1099_v39, %v1098_v38 }
 0x5fe   :  { %3527 = vmatmul.mubr.msk.f32.gmra.mrb[8].mxu0 %vm330_vm3, %v760_v2  ;;  %v762_v55 = vadd.f32 %v3147_v45, %v750_v56  ;;  %v4706_v56 = vld [vmem:[%s5275_s15] ss:$0 sm:$0xff] }
 0x5ff   :  { %v761_v60 = vadd.f32 %v3147_v45, %v749_v59  ;;  %3862 = vmatpush3.bf16.msra.mxu0 %v3859_v34 }
 0x600   :  { %3864 = vmatprep.subr.bf16.mxu0 %v3863_v37 }
 0x601   :  { %3529 = vmatprep.mubr.msk.f32.mxu0 %vm330_vm3, %v761_v60 }
 0x602   :  { %3530 = vmatmul.mubr.msk.f32.gmra.mrb[10].mxu0 %vm330_vm3, %v762_v55 }
 0x603   :  { %3866 = vmatpush3.bf16.msra.mxu0 %v3863_v37 }
 0x604   :  { %3868 = vmatprep.subr.bf16.mxu0 %v3867_v40 }
 0x607   :  { %3870 = vmatpush3.bf16.msra.mxu0 %v3867_v40 }
 0x608   :  { %3888 = vmatprep.subr.bf16.mxu0 %v3855_v32 }
 0x6cd   :  { %v3525_v3 = vpop.f32.mrb[6].mxu0 }
 0x6ce   :  { %v854_v5 = vpop.f32.mrb[7].mxu0 }
 0x6cf   :  { %v3843_v1 = vpack.c.bf16 %v3525_v3, %v854_v5 }
 0x6d1   :  { %v3528_v4 = vpop.f32.mrb[8].mxu0  ;;  %3844 = vmatprep.subr.bf16.mxu1 %v3843_v1 }
 0x6d2   :  { %v864_v6 = vpop.f32.mrb[9].mxu0  ;;  %3846 = vmatpush3.bf16.msra.mxu1 %v3843_v1 }
 0x6d3   :  { %v3847_v0 = vpack.c.bf16 %v3528_v4, %v864_v6 }
 0x6d5   :  { %v3531_v8 = vpop.f32.mrb[10].mxu0  ;;  %3848 = vmatprep.subr.bf16.mxu1 %v3847_v0 }
 0x6d6   :  { %v874_v10 = vpop.f32.mrb[11].mxu0  ;;  %3850 = vmatpush3.bf16.msra.mxu1 %v3847_v0 }
 0x6d7   :  { %v3851_v11 = vpack.c.bf16 %v3531_v8, %v874_v10 }
 0x6d9   :  { %3852 = vmatprep.subr.bf16.mxu1 %v3851_v11 }
 0x6da   :  { %3854 = vmatpush3.bf16.msra.mxu1 %v3851_v11 }
 0x6db   :  { %3872 = vmatprep.subr.bf16.mxu1 %v3855_v32 }
 0x6dd   :  { %3545 = vmatmul.mubr.msk.f32.vlgmr.msra.gmra.mrb[18].mxu1 %vm210_vm2, %v4456_v17 }
 0x6de   :  { %3547 = vmatprep.mubr.msk.f32.mxu1 %vm210_vm2, %v4461_v18  ;;  %3874 = vmatpush3.bf16.msra.mxu1 %v3855_v32 }
 0x6df   :  { %3876 = vmatprep.subr.bf16.mxu1 %v3859_v34 }
 0x6e1   :  { %3548 = vmatmul.mubr.msk.f32.gmra.mrb[20].mxu1 %vm210_vm2, %v4470_v19 }
 0x6e2   :  { %3550 = vmatprep.mubr.msk.f32.mxu1 %vm210_vm2, %v4475_v20  ;;  %3878 = vmatpush3.bf16.msra.mxu1 %v3859_v34 }
 0x6e3   :  { %3880 = vmatprep.subr.bf16.mxu1 %v3863_v37 }
 0x6e5   :  { %3551 = vmatmul.mubr.msk.f32.gmra.mrb[22].mxu1 %vm210_vm2, %v4484_v21 }
 0x6e6   :  { %3882 = vmatpush3.bf16.msra.mxu1 %v3863_v37 }
 0x6e7   :  { %3884 = vmatprep.subr.bf16.mxu1 %v3867_v40 }
 0x6ea   :  { %3886 = vmatpush3.bf16.msra.mxu1 %v3867_v40 }
 0x7b0   :  { %v3546_v13 = vpop.f32.mrb[18].mxu1 }
 0x7b1   :  { %v961_v17 = vadd.f32 %v3546_v13, %v4653_v12  ;;  %v955_v9 = vpop.f32.mrb[19].mxu1 }
 0x7b2   :  { %v956_v18 = vadd.f32 %v4653_v12, %v955_v9 }
 0x7b3   :  { %v985_v14 = vmax.f32 %v961_v17, 0.0 }
 0x7b4   :  { %v984_v15 = vmax.f32 %v956_v18, 0.0  ;;  %v3549_v63 = vpop.f32.mrb[20].mxu1 }
 0x7b5   :  { %v993_v19 = vsel %vm330_vm3, %v985_v14, 0.0  ;;  %v965_v2 = vpop.f32.mrb[21].mxu1 }
 0x7b6   :  { %994 = vadd.xlane.f32.xlu1 %v993_v19  ;;  %v990_v20 = vsel %vm330_vm3, %v984_v15, 0.0  ;;  %v966_v4 = vadd.f32 %v4653_v12, %v965_v2 }
 0x7b7   :  { %991 = vadd.xlane.f32.xlu0 %v990_v20 }
 0x7b8   :  { %v986_v6 = vmax.f32 %v966_v4, 0.0  ;;  %v3178_v4 = vld [vmem:[%s5272_s14 + $0x50] sm:$0xff] }
 0x7ba   :  { %v996_v0 = vsel %vm330_vm3, %v986_v6, 0.0 }
 0x843   :  { %v995_v21 = vpop.xlane.xlu1 %994 }
 0x844   :  { %v1009_v16 = vmul.f32 0.03125, %v995_v21  ;;  %v992_v22 = vpop.xlane.xlu0 %991 }
 0x845   :  { %v1008_v23 = vmul.f32 0.03125, %v992_v22 }
 0x846   :  { %v1015_v24 = vsub.f32 %v985_v14, %v1009_v16  ;;  %v971_v16 = vadd.f32 %v3549_v63, %v4653_v12 }
 0x847   :  { %v1014_v25 = vsub.f32 %v984_v15, %v1008_v23 }
 0x848   :  { %v1021_v26 = vmul.f32 %v1015_v24, %v1015_v24  ;;  %v987_v22 = vmax.f32 %v971_v16, 0.0 }
 0x849   :  { %v1020_v27 = vmul.f32 %v1014_v25, %v1014_v25 }
 0x84a   :  { %v1029_v28 = vsel %vm330_vm3, %v1021_v26, 0.0  ;;  %v999_v23 = vsel %vm330_vm3, %v987_v22, 0.0 }
 0x84b   :  { %1030 = vadd.xlane.f32.xlu1 %v1029_v28  ;;  %v1026_v29 = vsel %vm330_vm3, %v1020_v27, 0.0 }
 0x84c   :  { %1027 = vadd.xlane.f32.xlu0 %v1026_v29 }
 0x8d8   :  { %v1031_v41 = vpop.xlane.xlu1 %1030 }
 0x8d9   :  { %v1045_v42 = vmul.f32 0.03125, %v1031_v41  ;;  %v1028_v43 = vpop.xlane.xlu0 %1027  ;;  %v3176_v41 = vld [vmem:[%s5272_s14 + $0x40] sm:$0xff] }
 0x8da   :  { %v1044_v44 = vmul.f32 0.03125, %v1028_v43 }
 0x8db   :  { %v1051_v45 = vadd.f32 1e-05, %v1045_v42  ;;  %v3177_v42 = vld [vmem:[%s5272_s14 + $0x48] sm:$0xff] }
 0x8dc   :  { %v1050_v46 = vadd.f32 1e-05, %v1044_v44  ;;  %v4734_v43 = vpack.c.bf16 %v3177_v42, %v3176_v41 }
 0x8dd   :  { %4093 = vrsqrt.f32 %v1051_v45 }
 0x8de   :  { %4095 = vrsqrt.f32 %v1050_v46  ;;  %3904 = vmatprep.subr.bf16.mxu1 %v4734_v43 }
 0x8e7   :  { %v4094_v47 = vpop.eup %4093 }
 0x8e8   :  { %v4096_v52 = vpop.eup %4095  ;;  %v1063_v53 = vmul.f32 %v4094_v47, %v1015_v24 }
 0x8e9   :  { %v1062_v57 = vmul.f32 %v4096_v52, %v1014_v25  ;;  %v4742_v52 = vpop.f32.mrb[22].mxu1 }
 0x8ea   :  { %v1075_v58 = vmul.f32 %v4688_v51, %v1063_v53  ;;  %v4744_v53 = vpop.f32.mrb[23].mxu1 }
 0x8eb   :  { %v1074_v49 = vmul.f32 %v4688_v51, %v1062_v57 }
 0x8ec   :  { %v1087_v48 = vadd.f32 %v4693_v54, %v1075_v58 }
 0x8ed   :  { %v1086_v50 = vadd.f32 %v4693_v54, %v1074_v49 }
 0x8ee   :  { %v1102_v62 = vsel %vm330_vm3, %v1087_v48, 0.0 }
 0x8ef   :  { %v1101_v61 = vsel %vm330_vm3, %v1086_v50, 0.0 }
 0x8f0   :  { %3569 = vmatprep.mubr.msk.f32.mxu0 %vm1109_vm4, %v1101_v61 }
 0x8f1   :  { %3570 = vmatmul.mubr.msk.f32.vlgmr.msra.gmra.mrb[12].mxu0 %vm1109_vm4, %v1102_v62 }
 0x8f2   :  { %3890 = vmatpush3.bf16.msra.mxu0 %v3855_v32 }
 0x8f3   :  { %3892 = vmatprep.subr.bf16.mxu0 %v3859_v34 }
 0x8f6   :  { %3894 = vmatpush3.bf16.msra.mxu0 %v3859_v34 }
 0x8f7   :  { %3896 = vmatprep.subr.bf16.mxu0 %v3863_v37 }
 0x8fa   :  { %3898 = vmatpush3.bf16.msra.mxu0 %v3863_v37 }
 0x8fb   :  { %3900 = vmatprep.subr.bf16.mxu0 %v3867_v40 }
 0x8fe   :  { %3902 = vmatpush3.bf16.msra.mxu0 %v3867_v40 }
 0x8ff   :  { %3920 = vmatprep.subr.bf16.mxu0 %v4734_v43 }
 0x9c4   :  { %v3571_v59 = vpop.f32.mrb[12].mxu0 }
 0x9c5   :  { %v1188_v60 = vadd.f32 %v3571_v59, %v4706_v56  ;;  %v1182_v55 = vpop.f32.mrb[13].mxu0 }
 0x9c6   :  { %v1183_v3 = vadd.f32 %v4706_v56, %v1182_v55 }
 0x9c7   :  { %4097 = vtanh.f32 %v1188_v60  ;;  %v3167_v10 = vmul.f32 -1.442695, %v1188_v60 }
 0x9c8   :  { %4099 = vtanh.f32 %v1183_v3  ;;  %v3166_v8 = vmul.f32 -1.442695, %v1183_v3 }
 0x9ca   :  { %4101 = vpow2.f32 %v3166_v8 }
 0x9cb   :  { %4103 = vpow2.f32 %v3167_v10 }
 0x9d1   :  { %v4098_v5 = vpop.eup %4097 }
 0x9d2   :  { %v4100_v1 = vpop.eup %4099  ;;  %1211 = vrot.lane.b32.xlu1 %v4098_v5, %s4311_s11 }
 0x9d3   :  { %1209 = vrot.lane.b32.xlu0 %v4100_v1, %s4311_s11 }
 0x9d4   :  { %v4102_v11 = vpop.eup %4101 }
 0x9d5   :  { %v1197_v13 = vadd.f32 1.0, %v4102_v11  ;;  %v4104_v17 = vpop.eup %4103 }
 0x9d6   :  { %v1198_v9 = vadd.f32 1.0, %v4104_v17 }
 0x9d7   :  { %4105 = vrcp.f32 %v1197_v13 }
 0x9d8   :  { %4107 = vrcp.f32 %v1198_v9  ;;  %v3180_v9 = vld [vmem:[%s5272_s14 + $0x60] sm:$0xff] }
 0x9e1   :  { %v4106_v18 = vpop.eup %4105 }
 0x9e2   :  { %v4108_v20 = vpop.eup %4107  ;;  %v1205_v24 = vmul.f32 0.0, %v4106_v18 }
 0x9e3   :  { %v1206_v27 = vmul.f32 0.0, %v4108_v20 }
 0x9f2   :  { %997 = vadd.xlane.f32.xlu0 %v996_v0 }
 0xa44   :  { %v1212_v19 = vpop.permute.xlu1 %1211 }
 0xa45   :  { %v1210_v14 = vpop.permute.xlu0 %1209  ;;  %v1216_v21 = vmul.f32 %v4108_v20, %v1212_v19  ;;  %v3183_v19 = vld [vmem:[%s5272_s14 + $0x78] sm:$0xff] }
 0xa46   :  { %v1215_v15 = vmul.f32 %v4106_v18, %v1210_v14 }
 0xa48   :  { %1219 = vrot.lane.b32.xlu1 %v1215_v15, %s4311_s11  ;;  %v3182_v15 = vld [vmem:[%s5272_s14 + $0x70] sm:$0xff] }
 0xa4c   :  { %1221 = vrot.lane.b32.xlu1 %v1216_v21, %s4311_s11 }
 0xa70   :  { %1000 = vadd.xlane.f32.xlu1 %v999_v23 }
 0xa7f   :  { %v998_v32 = vpop.xlane.xlu0 %997 }
 0xa80   :  { %v1010_v7 = vmul.f32 0.03125, %v998_v32 }
 0xa82   :  { %v1016_v33 = vsub.f32 %v986_v6, %v1010_v7  ;;  %v3179_v6 = vld [vmem:[%s5272_s14 + $0x58] sm:$0xff] }
 0xa83   :  { %v4758_v11 = vpack.c.bf16 %v3179_v6, %v3178_v4 }
 0xa84   :  { %v1022_v34 = vmul.f32 %v1016_v33, %v1016_v33 }
 0xa86   :  { %v1032_v35 = vsel %vm330_vm3, %v1022_v34, 0.0 }
 0xaba   :  { %v1220_v25 = vpop.permute.xlu1 %1219 }
 0xabb   :  { %v4718_v26 = vadd.f32 %v1220_v25, %v1205_v24 }
 0xabd   :  { %4109 = vtanh.f32 %v4718_v26 }
 0xabe   :  { %v1222_v28 = vpop.permute.xlu1 %1221 }
 0xabf   :  { %v4721_v29 = vadd.f32 %v1222_v28, %v1206_v27 }
 0xac1   :  { %4111 = vtanh.f32 %v4721_v29 }
 0xac7   :  { %v4110_v30 = vpop.eup %4109 }
 0xac8   :  { %1231 = vrot.lane.b32.xlu0 %v4110_v30, %s4311_s11  ;;  %v4803_v30 = vld [vmem:[%s5275_s15 + $0x1] ss:$0 sm:$0xff] }
 0xacb   :  { %v4112_v31 = vpop.eup %4111 }
 0xacc   :  { %1233 = vrot.lane.b32.xlu1 %v4112_v31, %s4311_s11 }
 0xae7   :  { %1033 = vadd.xlane.f32.xlu0 %v1032_v35 }
 0xafd   :  { %v1001_v36 = vpop.xlane.xlu1 %1000 }
 0xafe   :  { %v1011_v37 = vmul.f32 0.03125, %v1001_v36 }
 0xb00   :  { %v1017_v38 = vsub.f32 %v987_v22, %v1011_v37 }
 0xb02   :  { %v1023_v39 = vmul.f32 %v1017_v38, %v1017_v38 }
 0xb04   :  { %v1035_v40 = vsel %vm330_vm3, %v1023_v39, 0.0 }
 0xb05   :  { %1036 = vadd.xlane.f32.xlu1 %v1035_v40 }
 0xb3a   :  { %v1232_v44 = vpop.permute.xlu0 %1231 }
 0xb3b   :  { %v1237_v45 = vmul.f32 %v4106_v18, %v1232_v44  ;;  %v3181_v18 = vld [vmem:[%s5272_s14 + $0x68] sm:$0xff] }
 0xb3c   :  { %v4772_v14 = vpack.c.bf16 %v3181_v18, %v3180_v9 }
 0xb3d   :  { %1241 = vrot.lane.b32.xlu0 %v1237_v45, %s4312_s27 }
 0xb3e   :  { %v1234_v46 = vpop.permute.xlu1 %1233 }
 0xb3f   :  { %v1238_v47 = vmul.f32 %v4108_v20, %v1234_v46  ;;  %v4782_v20 = vpack.c.bf16 %v3183_v19, %v3182_v15 }
 0xb41   :  { %1243 = vrot.lane.b32.xlu1 %v1238_v47, %s4312_s27  ;;  %1528 = vrot.lane.b32.xlu0 %v1237_v45, %s4313_s7 }
 0xb45   :  { %1530 = vrot.lane.b32.xlu1 %v1238_v47, %s4313_s7 }
 0xb74   :  { %v1034_v57 = vpop.xlane.xlu0 %1033 }
 0xb75   :  { %v1046_v58 = vmul.f32 0.03125, %v1034_v57 }
 0xb77   :  { %v1052_v48 = vadd.f32 1e-05, %v1046_v58 }
 0xb79   :  { %4113 = vrsqrt.f32 %v1052_v48 }
 0xb83   :  { %v4114_v62 = vpop.eup %4113 }
 0xb84   :  { %v1064_v63 = vmul.f32 %v4114_v62, %v1016_v33 }
 0xb86   :  { %v1076_v59 = vmul.f32 %v4688_v51, %v1064_v63 }
 0xb88   :  { %v1088_v55 = vadd.f32 %v4693_v54, %v1076_v59 }
 0xb92   :  { %v1037_v49 = vpop.xlane.xlu1 %1036 }
 0xb93   :  { %v1047_v50 = vmul.f32 0.03125, %v1037_v49 }
 0xb95   :  { %v1053_v61 = vadd.f32 1e-05, %v1047_v50 }
 0xb97   :  { %4115 = vrsqrt.f32 %v1053_v61 }
 0xba1   :  { %v4116_v2 = vpop.eup %4115 }
 0xba2   :  { %v1065_v60 = vmul.f32 %v4116_v2, %v1017_v38 }
 0xba4   :  { %v1077_v3 = vmul.f32 %v4688_v51, %v1065_v60 }
 0xba6   :  { %v1089_v0 = vadd.f32 %v4693_v54, %v1077_v3 }
 0xbaf   :  { %v1242_v5 = vpop.permute.xlu0 %1241 }
 0xbb0   :  { %v1247_v1 = vsel %vm330_vm3, %v1088_v55, %v1242_v5  ;;  %v976_v5 = vadd.f32 %v4653_v12, %v4744_v53 }
 0xbb1   :  { %3588 = vmatprep.mubr.msk.f32.mxu1 %vm1109_vm4, %v1247_v1  ;;  %v981_v1 = vadd.f32 %v4742_v52, %v4653_v12 }
 0xbb2   :  { %v988_v4 = vmax.f32 %v976_v5, 0.0 }
 0xbb3   :  { %v1244_v8 = vpop.permute.xlu1 %1243  ;;  %v1529_v10 = vpop.permute.xlu0 %1528  ;;  %v989_v6 = vmax.f32 %v981_v1, 0.0 }
 0xbb4   :  { %v1248_v13 = vsel %vm330_vm3, %v1089_v0, %v1244_v8  ;;  %v1534_v17 = vsel %vm330_vm3, %v1529_v10, 0.0  ;;  %v1002_v0 = vsel %vm330_vm3, %v988_v4, 0.0 }
 0xbb5   :  { %3589 = vmatmul.mubr.msk.f32.vlgmr.msra.gmra.mrb[24].mxu1 %vm1109_vm4, %v1248_v13  ;;  %v1005_v8 = vsel %vm330_vm3, %v989_v6, 0.0 }
 0xbb6   :  { %3906 = vmatpush3.bf16.msra.mxu1 %v4734_v43  ;;  %3626 = vmatprep.mubr.msk.f32.mxu1 %vm1109_vm4, %v1534_v17 }
 0xbb7   :  { %3908 = vmatprep.subr.bf16.mxu1 %v4758_v11  ;;  %v1531_v21 = vpop.permute.xlu1 %1530 }
 0xbb8   :  { %v1535_v16 = vsel %vm330_vm3, %v1531_v21, 0.0 }
 0xbba   :  { %3910 = vmatpush3.bf16.msra.mxu1 %v4758_v11 }
 0xbbb   :  { %3912 = vmatprep.subr.bf16.mxu1 %v4772_v14 }
 0xbbe   :  { %3914 = vmatpush3.bf16.msra.mxu1 %v4772_v14 }
 0xbbf   :  { %3916 = vmatprep.subr.bf16.mxu1 %v4782_v20 }
 0xbc2   :  { %3918 = vmatpush3.bf16.msra.mxu1 %v4782_v20 }
 0xbc3   :  { %3936 = vmatprep.subr.bf16.mxu1 %v4734_v43 }
 0xbc5   :  { %3627 = vmatmul.mubr.msk.f32.vlgmr.msra.gmra.mrb[26].mxu1 %vm1109_vm4, %v1535_v16 }
 0xbc6   :  { %3938 = vmatpush3.bf16.msra.mxu1 %v4734_v43 }
 0xbc7   :  { %3940 = vmatprep.subr.bf16.mxu1 %v4758_v11 }
 0xbca   :  { %3942 = vmatpush3.bf16.msra.mxu1 %v4758_v11 }
 0xbcb   :  { %3944 = vmatprep.subr.bf16.mxu1 %v4772_v14 }
 0xbce   :  { %3946 = vmatpush3.bf16.msra.mxu1 %v4772_v14 }
 0xbcf   :  { %3948 = vmatprep.subr.bf16.mxu1 %v4782_v20 }
 0xbd2   :  { %3950 = vmatpush3.bf16.msra.mxu1 %v4782_v20 }
 0xc88   :  { %v3590_v22 = vpop.f32.mrb[24].mxu1 }
 0xc89   :  { %v1327_v23 = vadd.f32 %v3590_v22, %v4706_v56  ;;  %v1321_v24 = vpop.f32.mrb[25].mxu1 }
 0xc8a   :  { %v1322_v25 = vadd.f32 %v4706_v56, %v1321_v24 }
 0xc8b   :  { %4117 = vtanh.f32 %v1327_v23  ;;  %v3171_v36 = vmul.f32 -1.442695, %v1327_v23 }
 0xc8c   :  { %4119 = vtanh.f32 %v1322_v25  ;;  %v3170_v37 = vmul.f32 -1.442695, %v1322_v25 }
 0xc95   :  { %v4118_v27 = vpop.eup %4117 }
 0xc96   :  { %v4120_v28 = vpop.eup %4119  ;;  %1350 = vrot.lane.b32.xlu1 %v4118_v27, %s4311_s11 }
 0xc97   :  { %1348 = vrot.lane.b32.xlu0 %v4120_v28, %s4311_s11 }
 0xc98   :  { %v3628_v31 = vpop.f32.mrb[26].mxu1 }
 0xc99   :  { %v1620_v32 = vadd.f32 %v3628_v31, %v4803_v30  ;;  %v1614_v7 = vpop.f32.mrb[27].mxu1 }
 0xc9a   :  { %v1615_v33 = vadd.f32 %v4803_v30, %v1614_v7 }
 0xc9b   :  { %4121 = vtanh.f32 %v1620_v32  ;;  %v3189_v41 = vmul.f32 -1.442695, %v1620_v32 }
 0xc9c   :  { %4123 = vtanh.f32 %v1615_v33  ;;  %v3188_v44 = vmul.f32 -1.442695, %v1615_v33 }
 0xc9d   :  { %4125 = vpow2.f32 %v3171_v36 }
 0xc9e   :  { %4127 = vpow2.f32 %v3170_v37 }
 0xca5   :  { %v4122_v34 = vpop.eup %4121 }
 0xca6   :  { %1643 = vrot.lane.b32.xlu1 %v4122_v34, %s4311_s11  ;;  %v4124_v35 = vpop.eup %4123 }
 0xca7   :  { %1641 = vrot.lane.b32.xlu0 %v4124_v35, %s4311_s11  ;;  %v4126_v38 = vpop.eup %4125 }
 0xca8   :  { %v4128_v39 = vpop.eup %4127  ;;  %v1337_v40 = vadd.f32 1.0, %v4126_v38 }
 0xca9   :  { %v1336_v42 = vadd.f32 1.0, %v4128_v39 }
 0xcaa   :  { %4129 = vrcp.f32 %v1337_v40  ;;  %v3198_v40 = vld [vmem:[%s5272_s14 + $0x80] sm:$0xff] }
 0xcab   :  { %4131 = vpow2.f32 %v3189_v41  ;;  %v3199_v41 = vld [vmem:[%s5272_s14 + $0x88] sm:$0xff] }
 0xcac   :  { %4133 = vrcp.f32 %v1336_v42  ;;  %v4864_v42 = vpack.c.bf16 %v3199_v41, %v3198_v40 }
 0xcad   :  { %4135 = vpow2.f32 %v3188_v44 }
 0xcae   :  { %3968 = vmatprep.subr.bf16.mxu1 %v4864_v42 }
 0xcb4   :  { %v4810_v45 = vpop.eup %4129 }
 0xcb5   :  { %v4132_v46 = vpop.eup %4131  ;;  %v1345_v10 = vmul.f32 %v4810_v45, %v4721_v29 }
 0xcb6   :  { %v4812_v57 = vpop.eup %4133  ;;  %v1630_v61 = vadd.f32 1.0, %v4132_v46 }
 0xcb7   :  { %v4136_v50 = vpop.eup %4135  ;;  %v1344_v17 = vmul.f32 %v4812_v57, %v4718_v26 }
 0xcb8   :  { %v1629_v62 = vadd.f32 1.0, %v4136_v50  ;;  %4137 = vrcp.f32 %v1630_v61 }
 0xcba   :  { %4139 = vrcp.f32 %v1629_v62 }
 0xcc2   :  { %v4818_v63 = vpop.eup %4137 }
 0xcc3   :  { %v1638_v29 = vmul.f32 0.0, %v4818_v63 }
 0xcc4   :  { %v4140_v60 = vpop.eup %4139 }
 0xcc5   :  { %v1637_v26 = vmul.f32 0.0, %v4140_v60 }
 0xd08   :  { %v1351_v47 = vpop.permute.xlu1 %1350 }
 0xd09   :  { %v1355_v58 = vmul.f32 %v4810_v45, %v1351_v47  ;;  %v1349_v49 = vpop.permute.xlu0 %1348 }
 0xd0a   :  { %v1354_v48 = vmul.f32 %v4812_v57, %v1349_v49 }
 0xd0b   :  { %1360 = vrot.lane.b32.xlu1 %v1355_v58, %s4311_s11 }
 0xd0c   :  { %1358 = vrot.lane.b32.xlu0 %v1354_v48, %s4311_s11 }
 0xd18   :  { %v1644_v2 = vpop.permute.xlu1 %1643 }
 0xd19   :  { %v1648_v59 = vmul.f32 %v4818_v63, %v1644_v2  ;;  %v1642_v55 = vpop.permute.xlu0 %1641 }
 0xd1a   :  { %v1647_v3 = vmul.f32 %v4140_v60, %v1642_v55 }
 0xd1b   :  { %1653 = vrot.lane.b32.xlu1 %v1648_v59, %s4311_s11 }
 0xd1c   :  { %1651 = vrot.lane.b32.xlu0 %v1647_v3, %s4311_s11 }
 0xd3b   :  { %1003 = vadd.xlane.f32.xlu0 %v1002_v0 }
 0xd3f   :  { %1006 = vadd.xlane.f32.xlu1 %v1005_v8 }
 0xd7d   :  { %v1361_v13 = vpop.permute.xlu1 %1360 }
 0xd7e   :  { %v4833_v9 = vadd.f32 %v1361_v13, %v1345_v10  ;;  %v1359_v53 = vpop.permute.xlu0 %1358 }
 0xd7f   :  { %v4835_v18 = vadd.f32 %v1359_v53, %v1344_v17  ;;  %v3202_v53 = vld [vmem:[%s5272_s14 + $0xa0] sm:$0xff] }
 0xd80   :  { %4141 = vtanh.f32 %v4833_v9 }
 0xd81   :  { %4143 = vtanh.f32 %v4835_v18 }
 0xd8a   :  { %v4142_v12 = vpop.eup %4141 }
 0xd8b   :  { %v4144_v52 = vpop.eup %4143  ;;  %1372 = vrot.lane.b32.xlu1 %v4142_v12, %s4311_s11  ;;  %v3203_v12 = vld [vmem:[%s5272_s14 + $0xa8] sm:$0xff] }
 0xd8c   :  { %1370 = vrot.lane.b32.xlu0 %v4144_v52, %s4311_s11 }
 0xd8d   :  { %v1654_v15 = vpop.permute.xlu1 %1653 }
 0xd8e   :  { %v4842_v19 = vadd.f32 %v1654_v15, %v1638_v29  ;;  %v1652_v21 = vpop.permute.xlu0 %1651  ;;  %v4910_v29 = vpack.c.bf16 %v3203_v12, %v3202_v53  ;;  %v3204_v15 = vld [vmem:[%s5272_s14 + $0xb0] sm:$0xff] }
 0xd8f   :  { %v4845_v16 = vadd.f32 %v1652_v21, %v1637_v26  ;;  %v3205_v26 = vld [vmem:[%s5272_s14 + $0xb8] sm:$0xff] }
 0xd90   :  { %4145 = vtanh.f32 %v4842_v19  ;;  %v4920_v21 = vpack.c.bf16 %v3205_v26, %v3204_v15 }
 0xd91   :  { %4147 = vtanh.f32 %v4845_v16 }
 0xd9a   :  { %v4146_v22 = vpop.eup %4145 }
 0xd9b   :  { %1665 = vrot.lane.b32.xlu1 %v4146_v22, %s4311_s11  ;;  %v4148_v23 = vpop.eup %4147 }
 0xd9c   :  { %1663 = vrot.lane.b32.xlu0 %v4148_v23, %s4311_s11 }
 0xdc8   :  { %v1004_v24 = vpop.xlane.xlu0 %1003 }
 0xdc9   :  { %v1012_v25 = vmul.f32 0.03125, %v1004_v24 }
 0xdcb   :  { %v1018_v28 = vsub.f32 %v988_v4, %v1012_v25 }
 0xdcc   :  { %v1007_v27 = vpop.xlane.xlu1 %1006 }
 0xdcd   :  { %v1013_v31 = vmul.f32 0.03125, %v1007_v27  ;;  %v1024_v7 = vmul.f32 %v1018_v28, %v1018_v28 }
 0xdcf   :  { %v1019_v32 = vsub.f32 %v989_v6, %v1013_v31  ;;  %v1038_v33 = vsel %vm330_vm3, %v1024_v7, 0.0 }
 0xdd0   :  { %1039 = vadd.xlane.f32.xlu0 %v1038_v33 }
 0xdd1   :  { %v1025_v34 = vmul.f32 %v1019_v32, %v1019_v32 }
 0xdd3   :  { %v1041_v35 = vsel %vm330_vm3, %v1025_v34, 0.0 }
 0xdd4   :  { %1042 = vadd.xlane.f32.xlu1 %v1041_v35 }
 0xdfd   :  { %v1373_v36 = vpop.permute.xlu1 %1372 }
 0xdfe   :  { %v1377_v37 = vmul.f32 %v4810_v45, %v1373_v36  ;;  %v1371_v38 = vpop.permute.xlu0 %1370 }
 0xdff   :  { %v1376_v39 = vmul.f32 %v4812_v57, %v1371_v38 }
 0xe00   :  { %1382 = vrot.lane.b32.xlu1 %v1377_v37, %s4312_s27 }
 0xe01   :  { %1380 = vrot.lane.b32.xlu0 %v1376_v39, %s4312_s27 }
 0xe05   :  { %1671 = vrot.lane.b32.xlu0 %v1376_v39, %s4313_s7 }
 0xe09   :  { %1673 = vrot.lane.b32.xlu0 %v1377_v37, %s4313_s7 }
 0xe0d   :  { %v1666_v46 = vpop.permute.xlu1 %1665 }
 0xe0e   :  { %v1664_v44 = vpop.permute.xlu0 %1663  ;;  %v1670_v47 = vmul.f32 %v4818_v63, %v1666_v46 }
 0xe0f   :  { %v1669_v45 = vmul.f32 %v4140_v60, %v1664_v44 }
 0xe11   :  { %1974 = vrot.lane.b32.xlu0 %v1669_v45, %s4313_s7  ;;  %1679 = vrot.lane.b32.xlu1 %v1669_v45, %s4312_s27 }
 0xe15   :  { %1681 = vrot.lane.b32.xlu1 %v1670_v47, %s4312_s27 }
 0xe19   :  { %1976 = vrot.lane.b32.xlu1 %v1670_v47, %s4313_s7 }
 0xe5d   :  { %v1040_v57 = vpop.xlane.xlu0 %1039 }
 0xe5e   :  { %v1048_v58 = vmul.f32 0.03125, %v1040_v57 }
 0xe60   :  { %v1054_v48 = vadd.f32 1e-05, %v1048_v58 }
 0xe61   :  { %v1043_v49 = vpop.xlane.xlu1 %1042 }
 0xe62   :  { %v1049_v50 = vmul.f32 0.03125, %v1043_v49  ;;  %4149 = vrsqrt.f32 %v1054_v48 }
 0xe64   :  { %v1055_v61 = vadd.f32 1e-05, %v1049_v50 }
 0xe66   :  { %4151 = vrsqrt.f32 %v1055_v61 }
 0xe6c   :  { %v4150_v62 = vpop.eup %4149 }
 0xe6d   :  { %v1066_v2 = vmul.f32 %v4150_v62, %v1018_v28 }
 0xe6f   :  { %v1078_v55 = vmul.f32 %v4688_v51, %v1066_v2 }
 0xe70   :  { %v4152_v59 = vpop.eup %4151 }
 0xe71   :  { %v1067_v60 = vmul.f32 %v4152_v59, %v1019_v32  ;;  %v1090_v5 = vadd.f32 %v4693_v54, %v1078_v55 }
 0xe72   :  { %v1383_v6 = vpop.permute.xlu1 %1382 }
 0xe73   :  { %v1381_v3 = vpop.permute.xlu0 %1380  ;;  %v1079_v63 = vmul.f32 %v4688_v51, %v1067_v60 }
 0xe74   :  { %v1386_v4 = vsel %vm330_vm3, %v1090_v5, %v1381_v3 }
 0xe75   :  { %v1091_v1 = vadd.f32 %v4693_v54, %v1079_v63  ;;  %3607 = vmatprep.mubr.msk.f32.mxu0 %vm1109_vm4, %v1386_v4 }
 0xe77   :  { %v1387_v0 = vsel %vm330_vm3, %v1091_v1, %v1383_v6  ;;  %v1672_v51 = vpop.permute.xlu0 %1671 }
 0xe78   :  { %3608 = vmatmul.mubr.msk.f32.vlgmr.msra.gmra.mrb[14].mxu0 %vm1109_vm4, %v1387_v0 }
 0xe79   :  { %3922 = vmatpush3.bf16.msra.mxu0 %v4734_v43  ;;  %v3200_v43 = vld [vmem:[%s5272_s14 + $0x90] sm:$0xff] }
 0xe7a   :  { %3924 = vmatprep.subr.bf16.mxu0 %v4758_v11 }
 0xe7b   :  { %v1674_v54 = vpop.permute.xlu0 %1673 }
 0xe7d   :  { %3926 = vmatpush3.bf16.msra.mxu0 %v4758_v11  ;;  %v3201_v11 = vld [vmem:[%s5272_s14 + $0x98] sm:$0xff] }
 0xe7e   :  { %3928 = vmatprep.subr.bf16.mxu0 %v4772_v14  ;;  %v4896_v17 = vpack.c.bf16 %v3201_v11, %v3200_v43 }
 0xe81   :  { %3930 = vmatpush3.bf16.msra.mxu0 %v4772_v14 }
 0xe82   :  { %3932 = vmatprep.subr.bf16.mxu0 %v4782_v20 }
 0xe83   :  { %v1680_v8 = vpop.permute.xlu1 %1679  ;;  %v1975_v14 = vpop.permute.xlu0 %1974 }
 0xe84   :  { %v1685_v10 = vsel %vm330_vm3, %v1672_v51, %v1680_v8  ;;  %v1980_v52 = vsel %vm330_vm3, %v1975_v14, 0.0 }
 0xe85   :  { %3934 = vmatpush3.bf16.msra.mxu0 %v4782_v20  ;;  %3645 = vmatprep.mubr.msk.f32.mxu0 %vm1109_vm4, %v1685_v10 }
 0xe86   :  { %3952 = vmatprep.subr.bf16.mxu0 %v4864_v42 }
 0xe87   :  { %v1682_v13 = vpop.permute.xlu1 %1681 }
 0xe88   :  { %v1686_v20 = vsel %vm330_vm3, %v1674_v54, %v1682_v13 }
 0xe89   :  { %3646 = vmatmul.mubr.msk.f32.vlgmr.msra.gmra.mrb[16].mxu0 %vm1109_vm4, %v1686_v20 }
 0xe8a   :  { %3954 = vmatpush3.bf16.msra.mxu0 %v4864_v42  ;;  %3683 = vmatprep.mubr.msk.f32.mxu0 %vm1109_vm4, %v1980_v52 }
 0xe8b   :  { %3956 = vmatprep.subr.bf16.mxu0 %v4896_v17  ;;  %v1977_v22 = vpop.permute.xlu1 %1976 }
 0xe8c   :  { %v1981_v23 = vsel %vm330_vm3, %v1977_v22, 0.0 }
 0xe8e   :  { %3958 = vmatpush3.bf16.msra.mxu0 %v4896_v17 }
 0xe8f   :  { %3960 = vmatprep.subr.bf16.mxu0 %v4910_v29 }
 0xe92   :  { %3962 = vmatpush3.bf16.msra.mxu0 %v4910_v29 }
 0xe93   :  { %3964 = vmatprep.subr.bf16.mxu0 %v4920_v21 }
 0xe96   :  { %3966 = vmatpush3.bf16.msra.mxu0 %v4920_v21 }
 0xe97   :  { %3984 = vmatprep.subr.bf16.mxu0 %v4864_v42 }
 0xe99   :  { %3684 = vmatmul.mubr.msk.f32.vlgmr.msra.gmra.mrb[18].mxu0 %vm1109_vm4, %v1981_v23 }
 0xe9a   :  { %3986 = vmatpush3.bf16.msra.mxu0 %v4864_v42 }
 0xe9b   :  { %3988 = vmatprep.subr.bf16.mxu0 %v4896_v17 }
 0xe9e   :  { %3990 = vmatpush3.bf16.msra.mxu0 %v4896_v17 }
 0xe9f   :  { %3992 = vmatprep.subr.bf16.mxu0 %v4910_v29 }
 0xea2   :  { %3994 = vmatpush3.bf16.msra.mxu0 %v4910_v29 }
 0xea3   :  { %3996 = vmatprep.subr.bf16.mxu0 %v4920_v21 }
 0xea6   :  { %3998 = vmatpush3.bf16.msra.mxu0 %v4920_v21 }
 0xf4b   :  { %v3609_v24 = vpop.f32.mrb[14].mxu0 }
 0xf4c   :  { %v1460_v25 = vpop.f32.mrb[15].mxu0  ;;  %v1466_v28 = vadd.f32 %v3609_v24, %v4706_v56 }
 0xf4d   :  { %v1461_v27 = vadd.f32 %v4706_v56, %v1460_v25  ;;  %v4944_v56 = vld [vmem:[%s5275_s15 + $0x2] ss:$0 sm:$0xff] }
 0xf4e   :  { %v3175_v47 = vmul.f32 -1.442695, %v1466_v28 }
 0xf4f   :  { %4153 = vtanh.f32 %v1461_v27  ;;  %v3174_v46 = vmul.f32 -1.442695, %v1461_v27 }
 0xf50   :  { %4155 = vtanh.f32 %v1466_v28 }
 0xf59   :  { %v4154_v31 = vpop.eup %4153 }
 0xf5a   :  { %1487 = vrot.lane.b32.xlu0 %v4154_v31, %s4311_s11  ;;  %v4156_v32 = vpop.eup %4155 }
 0xf5c   :  { %v3647_v7 = vpop.f32.mrb[16].mxu0 }
 0xf5d   :  { %v1759_v33 = vpop.f32.mrb[17].mxu0  ;;  %v1765_v35 = vadd.f32 %v3647_v7, %v4803_v30 }
 0xf5e   :  { %1489 = vrot.lane.b32.xlu0 %v4156_v32, %s4311_s11  ;;  %v1760_v34 = vadd.f32 %v4803_v30, %v1759_v33 }
 0xf5f   :  { %v3193_v61 = vmul.f32 -1.442695, %v1765_v35 }
 0xf60   :  { %4157 = vtanh.f32 %v1760_v34  ;;  %v3192_v48 = vmul.f32 -1.442695, %v1760_v34 }
 0xf61   :  { %4159 = vtanh.f32 %v1765_v35 }
 0xf6a   :  { %v4158_v36 = vpop.eup %4157 }
 0xf6b   :  { %1786 = vrot.lane.b32.xlu1 %v4158_v36, %s4311_s11  ;;  %v4160_v40 = vpop.eup %4159 }
 0xf6c   :  { %v3685_v37 = vpop.f32.mrb[18].mxu0 }
 0xf6d   :  { %v2066_v38 = vadd.f32 %v3685_v37, %v4944_v56  ;;  %v2060_v39 = vpop.f32.mrb[19].mxu0 }
 0xf6e   :  { %v2061_v41 = vadd.f32 %v4944_v56, %v2060_v39 }
 0xf6f   :  { %1788 = vrot.lane.b32.xlu1 %v4160_v40, %s4311_s11  ;;  %4161 = vtanh.f32 %v2066_v38  ;;  %v3211_v3 = vmul.f32 -1.442695, %v2066_v38 }
 0xf70   :  { %4163 = vtanh.f32 %v2061_v41  ;;  %v3210_v6 = vmul.f32 -1.442695, %v2061_v41 }
 0xf71   :  { %4165 = vpow2.f32 %v3174_v46 }
 0xf72   :  { %4167 = vpow2.f32 %v3175_v47 }
 0xf79   :  { %v4162_v44 = vpop.eup %4161 }
 0xf7a   :  { %2089 = vrot.lane.b32.xlu1 %v4162_v44, %s4311_s11  ;;  %v4164_v45 = vpop.eup %4163 }
 0xf7b   :  { %2087 = vrot.lane.b32.xlu0 %v4164_v45, %s4311_s11  ;;  %v4166_v57 = vpop.eup %4165 }
 0xf7c   :  { %v1475_v58 = vadd.f32 1.0, %v4166_v57  ;;  %v4168_v49 = vpop.eup %4167 }
 0xf7d   :  { %v1476_v50 = vadd.f32 1.0, %v4168_v49 }
 0xf7e   :  { %4169 = vrcp.f32 %v1475_v58 }
 0xf7f   :  { %4171 = vpow2.f32 %v3192_v48 }
 0xf80   :  { %4173 = vrcp.f32 %v1476_v50 }
 0xf81   :  { %4175 = vpow2.f32 %v3193_v61 }
 0xf82   :  { %4177 = vpow2.f32 %v3211_v3 }
 0xf88   :  { %v4952_v62 = vpop.eup %4169 }
 0xf89   :  { %v4172_v60 = vpop.eup %4171  ;;  %v1483_v24 = vmul.f32 %v4952_v62, %v4835_v18 }
 0xf8a   :  { %v4956_v55 = vpop.eup %4173  ;;  %v1774_v5 = vadd.f32 1.0, %v4172_v60  ;;  %v3221_v60 = vld [vmem:[%s5272_s14 + $0xc8] sm:$0xff] }
 0xf8b   :  { %v4176_v4 = vpop.eup %4175  ;;  %v1484_v28 = vmul.f32 %v4956_v55, %v4833_v9 }
 0xf8c   :  { %v1775_v0 = vadd.f32 1.0, %v4176_v4  ;;  %4179 = vrcp.f32 %v1774_v5  ;;  %v4178_v51 = vpop.eup %4177 }
 0xf8d   :  { %4181 = vpow2.f32 %v3210_v6  ;;  %v2076_v11 = vadd.f32 1.0, %v4178_v51 }
 0xf8e   :  { %4183 = vrcp.f32 %v1775_v0 }
 0xf8f   :  { %4185 = vrcp.f32 %v2076_v11 }
 0xf96   :  { %v4960_v54 = vpop.eup %4179 }
 0xf97   :  { %v4182_v43 = vpop.eup %4181  ;;  %v1782_v34 = vmul.f32 %v4960_v54, %v4845_v16 }
 0xf98   :  { %v4184_v14 = vpop.eup %4183  ;;  %v2075_v20 = vadd.f32 1.0, %v4182_v43 }
 0xf99   :  { %v4965_v12 = vpop.eup %4185  ;;  %v1783_v36 = vmul.f32 %v4184_v14, %v4842_v19 }
 0xf9a   :  { %4187 = vrcp.f32 %v2075_v20  ;;  %v2084_v39 = vmul.f32 0.0, %v4965_v12 }
 0xfa4   :  { %v4188_v26 = vpop.eup %4187 }
 0xfa5   :  { %v2083_v44 = vmul.f32 0.0, %v4188_v26 }
 0xfcc   :  { %v1488_v2 = vpop.permute.xlu0 %1487 }
 0xfcd   :  { %v1493_v59 = vmul.f32 %v4952_v62, %v1488_v2 }
 0xfcf   :  { %1497 = vrot.lane.b32.xlu0 %v1493_v59, %s4311_s11 }
 0xfd0   :  { %v1490_v63 = vpop.permute.xlu0 %1489 }
 0xfd1   :  { %v1494_v1 = vmul.f32 %v4956_v55, %v1490_v63 }
 0xfd3   :  { %1499 = vrot.lane.b32.xlu0 %v1494_v1, %s4311_s11 }
 0xfdd   :  { %v1787_v8 = vpop.permute.xlu1 %1786 }
 0xfde   :  { %v1792_v10 = vmul.f32 %v4960_v54, %v1787_v8 }
 0xfe0   :  { %1796 = vrot.lane.b32.xlu1 %v1792_v10, %s4311_s11 }
 0xfe1   :  { %v1789_v13 = vpop.permute.xlu1 %1788 }
 0xfe2   :  { %v1793_v53 = vmul.f32 %v4184_v14, %v1789_v13 }
 0xfe4   :  { %1798 = vrot.lane.b32.xlu1 %v1793_v53, %s4311_s11  ;;  %v3224_v53 = vld [vmem:[%s5272_s14 + $0xe0] sm:$0xff] }
 0xfec   :  { %v2090_v52 = vpop.permute.xlu1 %2089 }
 0xfed   :  { %v2094_v15 = vmul.f32 %v4965_v12, %v2090_v52  ;;  %v2088_v22 = vpop.permute.xlu0 %2087 }
 0xfee   :  { %v2093_v23 = vmul.f32 %v4188_v26, %v2088_v22  ;;  %v3227_v22 = vld [vmem:[%s5272_s14 + $0xf8] sm:$0xff] }
 0xfef   :  { %2099 = vrot.lane.b32.xlu1 %v2094_v15, %s4311_s11 }
 0xff0   :  { %2097 = vrot.lane.b32.xlu0 %v2093_v23, %s4311_s11 }
0x1041   :  { %v1498_v25 = vpop.permute.xlu0 %1497 }
0x1042   :  { %v1503_v27 = vadd.f32 %v1498_v25, %v1483_v24 }
0x1044   :  { %4189 = vtanh.f32 %v1503_v27 }
0x1045   :  { %v1500_v31 = vpop.permute.xlu0 %1499 }
0x1046   :  { %v1504_v32 = vadd.f32 %v1500_v31, %v1484_v28 }
0x1048   :  { %4191 = vtanh.f32 %v1504_v32 }
0x104e   :  { %v4190_v7 = vpop.eup %4189 }
0x104f   :  { %1509 = vrot.lane.b32.xlu0 %v4190_v7, %s4311_s11 }
0x1052   :  { %v4192_v33 = vpop.eup %4191  ;;  %v1797_v35 = vpop.permute.xlu1 %1796 }
0x1053   :  { %1511 = vrot.lane.b32.xlu0 %v4192_v33, %s4311_s11  ;;  %v4978_v18 = vadd.f32 %v1797_v35, %v1782_v34 }
0x1055   :  { %4193 = vtanh.f32 %v4978_v18 }
0x1056   :  { %v1799_v9 = vpop.permute.xlu1 %1798 }
0x1057   :  { %v4982_v37 = vadd.f32 %v1799_v9, %v1783_v36 }
0x1059   :  { %4195 = vtanh.f32 %v4982_v37 }
0x105f   :  { %v4194_v38 = vpop.eup %4193 }
0x1060   :  { %1808 = vrot.lane.b32.xlu1 %v4194_v38, %s4311_s11 }
0x1061   :  { %v2100_v16 = vpop.permute.xlu1 %2099 }
0x1062   :  { %v4987_v41 = vadd.f32 %v2100_v16, %v2084_v39  ;;  %v2098_v19 = vpop.permute.xlu0 %2097 }
0x1063   :  { %v4196_v40 = vpop.eup %4195  ;;  %v4991_v45 = vadd.f32 %v2098_v19, %v2083_v44 }
0x1064   :  { %1810 = vrot.lane.b32.xlu1 %v4196_v40, %s4311_s11  ;;  %4197 = vtanh.f32 %v4987_v41 }
0x1065   :  { %4199 = vtanh.f32 %v4991_v45 }
0x106e   :  { %v4198_v46 = vpop.eup %4197 }
0x106f   :  { %2111 = vrot.lane.b32.xlu1 %v4198_v46, %s4311_s11  ;;  %v4200_v47 = vpop.eup %4199 }
0x1070   :  { %2109 = vrot.lane.b32.xlu0 %v4200_v47, %s4311_s11 }
0x10c1   :  { %v1510_v57 = vpop.permute.xlu0 %1509 }
0x10c2   :  { %v1515_v58 = vmul.f32 %v4952_v62, %v1510_v57  ;;  %v3220_v62 = vld [vmem:[%s5272_s14 + $0xc0] sm:$0xff] }
0x10c4   :  { %1818 = vrot.lane.b32.xlu0 %v1515_v58, %s4313_s7 }
0x10c5   :  { %v1512_v49 = vpop.permute.xlu0 %1511 }
0x10c6   :  { %v1516_v48 = vmul.f32 %v4956_v55, %v1512_v49  ;;  %v5011_v55 = vpack.c.bf16 %v3221_v60, %v3220_v62 }
0x10c8   :  { %1820 = vrot.lane.b32.xlu0 %v1516_v48, %s4313_s7  ;;  %4016 = vmatprep.subr.bf16.mxu0 %v5011_v55 }
0x10d2   :  { %v1809_v50 = vpop.permute.xlu1 %1808 }
0x10d3   :  { %v1814_v61 = vmul.f32 %v4960_v54, %v1809_v50 }
0x10d5   :  { %1826 = vrot.lane.b32.xlu1 %v1814_v61, %s4312_s27  ;;  %2117 = vrot.lane.b32.xlu0 %v1814_v61, %s4313_s7 }
0x10d6   :  { %v1811_v2 = vpop.permute.xlu1 %1810 }
0x10d7   :  { %v1815_v59 = vmul.f32 %v4184_v14, %v1811_v2 }
0x10d9   :  { %1828 = vrot.lane.b32.xlu1 %v1815_v59, %s4312_s27  ;;  %2119 = vrot.lane.b32.xlu0 %v1815_v59, %s4313_s7 }
0x10e1   :  { %v2112_v5 = vpop.permute.xlu1 %2111 }
0x10e2   :  { %v2110_v3 = vpop.permute.xlu0 %2109  ;;  %v2116_v1 = vmul.f32 %v4965_v12, %v2112_v5  ;;  %v3225_v12 = vld [vmem:[%s5272_s14 + $0xe8] sm:$0xff] }
0x10e3   :  { %v2115_v63 = vmul.f32 %v4188_v26, %v2110_v3  ;;  %v5053_v15 = vpack.c.bf16 %v3225_v12, %v3224_v53  ;;  %v3226_v26 = vld [vmem:[%s5272_s14 + $0xf0] sm:$0xff] }
0x10e4   :  { %v5063_v23 = vpack.c.bf16 %v3227_v22, %v3226_v26 }
0x10e5   :  { %2420 = vrot.lane.b32.xlu0 %v2115_v63, %s4313_s7  ;;  %2125 = vrot.lane.b32.xlu1 %v2115_v63, %s4312_s27 }
0x10e9   :  { %2127 = vrot.lane.b32.xlu1 %v2116_v1, %s4312_s27 }
0x10ed   :  { %2422 = vrot.lane.b32.xlu1 %v2116_v1, %s4313_s7 }
0x1136   :  { %v1819_v4 = vpop.permute.xlu0 %1818 }
0x113a   :  { %v1821_v51 = vpop.permute.xlu0 %1820 }
0x1147   :  { %v1827_v6 = vpop.permute.xlu1 %1826  ;;  %v2118_v10 = vpop.permute.xlu0 %2117 }
0x1148   :  { %v1832_v0 = vsel %vm330_vm3, %v1819_v4, %v1827_v6 }
0x1149   :  { %3664 = vmatprep.mubr.msk.f32.mxu1 %vm1109_vm4, %v1832_v0 }
0x114b   :  { %v1829_v54 = vpop.permute.xlu1 %1828  ;;  %v2120_v43 = vpop.permute.xlu0 %2119 }
0x114c   :  { %v1833_v8 = vsel %vm330_vm3, %v1821_v51, %v1829_v54 }
0x114d   :  { %3665 = vmatmul.mubr.msk.f32.vlgmr.msra.gmra.mrb[28].mxu1 %vm1109_vm4, %v1833_v8 }
0x114e   :  { %3970 = vmatpush3.bf16.msra.mxu1 %v4864_v42  ;;  %v3222_v42 = vld [vmem:[%s5272_s14 + $0xd0] sm:$0xff] }
0x114f   :  { %3972 = vmatprep.subr.bf16.mxu1 %v4896_v17 }
0x1152   :  { %3974 = vmatpush3.bf16.msra.mxu1 %v4896_v17  ;;  %v3223_v17 = vld [vmem:[%s5272_s14 + $0xd8] sm:$0xff] }
0x1153   :  { %3976 = vmatprep.subr.bf16.mxu1 %v4910_v29  ;;  %v5039_v20 = vpack.c.bf16 %v3223_v17, %v3222_v42 }
0x1156   :  { %3978 = vmatpush3.bf16.msra.mxu1 %v4910_v29 }
0x1157   :  { %3980 = vmatprep.subr.bf16.mxu1 %v4920_v21  ;;  %v2126_v11 = vpop.permute.xlu1 %2125  ;;  %v2421_v29 = vpop.permute.xlu0 %2420 }
0x1158   :  { %v2131_v14 = vsel %vm330_vm3, %v2118_v10, %v2126_v11  ;;  %v2426_v52 = vsel %vm330_vm3, %v2421_v29, 0.0 }
0x1159   :  { %3702 = vmatprep.mubr.msk.f32.mxu1 %vm1109_vm4, %v2131_v14 }
0x115a   :  { %3982 = vmatpush3.bf16.msra.mxu1 %v4920_v21 }
0x115b   :  { %4000 = vmatprep.subr.bf16.mxu1 %v5011_v55  ;;  %v2128_v13 = vpop.permute.xlu1 %2127 }
0x115c   :  { %v2132_v21 = vsel %vm330_vm3, %v2120_v43, %v2128_v13 }
0x115d   :  { %3703 = vmatmul.mubr.msk.f32.vlgmr.msra.gmra.mrb[30].mxu1 %vm1109_vm4, %v2132_v21 }
0x115e   :  { %4002 = vmatpush3.bf16.msra.mxu1 %v5011_v55  ;;  %3740 = vmatprep.mubr.msk.f32.mxu1 %vm1109_vm4, %v2426_v52 }
0x115f   :  { %4004 = vmatprep.subr.bf16.mxu1 %v5039_v20  ;;  %v2423_v24 = vpop.permute.xlu1 %2422 }
0x1160   :  { %v2427_v25 = vsel %vm330_vm3, %v2423_v24, 0.0 }
0x1162   :  { %4006 = vmatpush3.bf16.msra.mxu1 %v5039_v20 }
0x1163   :  { %4008 = vmatprep.subr.bf16.mxu1 %v5053_v15 }
0x1166   :  { %4010 = vmatpush3.bf16.msra.mxu1 %v5053_v15 }
0x1167   :  { %4012 = vmatprep.subr.bf16.mxu1 %v5063_v23 }
0x116a   :  { %4014 = vmatpush3.bf16.msra.mxu1 %v5063_v23 }
0x116b   :  { %4032 = vmatprep.subr.bf16.mxu1 %v5011_v55 }
0x116d   :  { %3741 = vmatmul.mubr.msk.f32.vlgmr.msra.gmra.mrb[32].mxu1 %vm1109_vm4, %v2427_v25 }
0x116e   :  { %4034 = vmatpush3.bf16.msra.mxu1 %v5011_v55 }
0x116f   :  { %4036 = vmatprep.subr.bf16.mxu1 %v5039_v20 }
0x1172   :  { %4038 = vmatpush3.bf16.msra.mxu1 %v5039_v20 }
0x1173   :  { %4040 = vmatprep.subr.bf16.mxu1 %v5053_v15 }
0x1176   :  { %4042 = vmatpush3.bf16.msra.mxu1 %v5053_v15 }
0x1177   :  { %4044 = vmatprep.subr.bf16.mxu1 %v5063_v23 }
0x117a   :  { %4046 = vmatpush3.bf16.msra.mxu1 %v5063_v23 }
0x1220   :  { %v3666_v27 = vpop.f32.mrb[28].mxu1 }
0x1221   :  { %v1906_v28 = vpop.f32.mrb[29].mxu1  ;;  %v1912_v32 = vadd.f32 %v3666_v27, %v4803_v30 }
0x1222   :  { %v1907_v31 = vadd.f32 %v4803_v30, %v1906_v28  ;;  %v5087_v30 = vld [vmem:[%s5275_s15 + $0x3] ss:$0 sm:$0xff] }
0x1223   :  { %v3197_v58 = vmul.f32 -1.442695, %v1912_v32 }
0x1224   :  { %4201 = vtanh.f32 %v1907_v31  ;;  %v3196_v57 = vmul.f32 -1.442695, %v1907_v31 }
0x1225   :  { %4203 = vtanh.f32 %v1912_v32 }
0x122e   :  { %v4202_v7 = vpop.eup %4201 }
0x122f   :  { %1933 = vrot.lane.b32.xlu0 %v4202_v7, %s4311_s11  ;;  %v4204_v33 = vpop.eup %4203 }
0x1230   :  { %v3704_v34 = vpop.f32.mrb[30].mxu1 }
0x1231   :  { %v2205_v35 = vpop.f32.mrb[31].mxu1  ;;  %v2211_v9 = vadd.f32 %v3704_v34, %v4944_v56 }
0x1232   :  { %v2206_v36 = vadd.f32 %v4944_v56, %v2205_v35 }
0x1233   :  { %1935 = vrot.lane.b32.xlu0 %v4204_v33, %s4311_s11  ;;  %v3215_v59 = vmul.f32 -1.442695, %v2211_v9 }
0x1234   :  { %4205 = vtanh.f32 %v2206_v36  ;;  %v3214_v61 = vmul.f32 -1.442695, %v2206_v36 }
0x1235   :  { %4207 = vtanh.f32 %v2211_v9 }
0x123e   :  { %v4206_v38 = vpop.eup %4205 }
0x123f   :  { %2232 = vrot.lane.b32.xlu1 %v4206_v38, %s4311_s11  ;;  %v4208_v44 = vpop.eup %4207 }
0x1240   :  { %v3742_v39 = vpop.f32.mrb[32].mxu1 }
0x1241   :  { %v2512_v16 = vadd.f32 %v3742_v39, %v5087_v30  ;;  %v2506_v40 = vpop.f32.mrb[33].mxu1 }
0x1242   :  { %v2507_v19 = vadd.f32 %v5087_v30, %v2506_v40 }
0x1243   :  { %2234 = vrot.lane.b32.xlu1 %v4208_v44, %s4311_s11  ;;  %4209 = vtanh.f32 %v2512_v16  ;;  %v3233_v1 = vmul.f32 -1.442695, %v2512_v16 }
0x1244   :  { %4211 = vtanh.f32 %v2507_v19  ;;  %v3232_v54 = vmul.f32 -1.442695, %v2507_v19 }
0x1245   :  { %4213 = vpow2.f32 %v3196_v57 }
0x1246   :  { %4215 = vpow2.f32 %v3197_v58 }
0x124d   :  { %v4210_v46 = vpop.eup %4209 }
0x124e   :  { %2535 = vrot.lane.b32.xlu1 %v4210_v46, %s4311_s11  ;;  %v4212_v47 = vpop.eup %4211 }
0x124f   :  { %2533 = vrot.lane.b32.xlu0 %v4212_v47, %s4311_s11  ;;  %v4214_v49 = vpop.eup %4213 }
0x1250   :  { %v1921_v48 = vadd.f32 1.0, %v4214_v49  ;;  %v4216_v50 = vpop.eup %4215 }
0x1251   :  { %v1922_v2 = vadd.f32 1.0, %v4216_v50 }
0x1252   :  { %4217 = vrcp.f32 %v1921_v48 }
0x1253   :  { %4219 = vpow2.f32 %v3214_v61 }
0x1254   :  { %4221 = vrcp.f32 %v1922_v2 }
0x1255   :  { %4223 = vpow2.f32 %v3215_v59 }
0x1256   :  { %4225 = vpow2.f32 %v3233_v1 }
0x125c   :  { %v5095_v62 = vpop.eup %4217 }
0x125d   :  { %v4220_v63 = vpop.eup %4219  ;;  %v1929_v27 = vmul.f32 %v5095_v62, %v4978_v18 }
0x125e   :  { %v5099_v5 = vpop.eup %4221  ;;  %v2220_v6 = vadd.f32 1.0, %v4220_v63 }
0x125f   :  { %v4224_v51 = vpop.eup %4223  ;;  %v1930_v32 = vmul.f32 %v5099_v5, %v4982_v37 }
0x1260   :  { %v2221_v8 = vadd.f32 1.0, %v4224_v51  ;;  %4227 = vrcp.f32 %v2220_v6  ;;  %v4226_v10 = vpop.eup %4225 }
0x1261   :  { %4229 = vpow2.f32 %v3232_v54  ;;  %v2522_v17 = vadd.f32 1.0, %v4226_v10 }
0x1262   :  { %4231 = vrcp.f32 %v2221_v8 }
0x1263   :  { %4233 = vrcp.f32 %v2522_v17 }
0x126a   :  { %v5103_v43 = vpop.eup %4227 }
0x126b   :  { %v4230_v42 = vpop.eup %4229  ;;  %v2228_v36 = vmul.f32 %v5103_v43, %v4991_v45 }
0x126c   :  { %v4232_v29 = vpop.eup %4231  ;;  %v2521_v21 = vadd.f32 1.0, %v4230_v42 }
0x126d   :  { %v4234_v12 = vpop.eup %4233  ;;  %v2229_v38 = vmul.f32 %v4232_v29, %v4987_v41 }
0x126e   :  { %4235 = vrcp.f32 %v2521_v21  ;;  %v2530_v40 = vmul.f32 0.0, %v4234_v12 }
0x1278   :  { %v4236_v22 = vpop.eup %4235 }
0x1279   :  { %v2529_v46 = vmul.f32 0.0, %v4236_v22 }
0x12a1   :  { %v1934_v60 = vpop.permute.xlu0 %1933 }
0x12a2   :  { %v1939_v3 = vmul.f32 %v5095_v62, %v1934_v60 }
0x12a4   :  { %1943 = vrot.lane.b32.xlu0 %v1939_v3, %s4311_s11 }
0x12a5   :  { %v1936_v4 = vpop.permute.xlu0 %1935 }
0x12a6   :  { %v1940_v0 = vmul.f32 %v5099_v5, %v1936_v4 }
0x12a8   :  { %1945 = vrot.lane.b32.xlu0 %v1940_v0, %s4311_s11 }
0x12b1   :  { %v2233_v11 = vpop.permute.xlu1 %2232 }
0x12b2   :  { %v2238_v14 = vmul.f32 %v5103_v43, %v2233_v11 }
0x12b4   :  { %2242 = vrot.lane.b32.xlu1 %v2238_v14, %s4311_s11 }
0x12b5   :  { %v2235_v13 = vpop.permute.xlu1 %2234 }
0x12b6   :  { %v2239_v53 = vmul.f32 %v4232_v29, %v2235_v13 }
0x12b8   :  { %2244 = vrot.lane.b32.xlu1 %v2239_v53, %s4311_s11 }
0x12c0   :  { %v2536_v52 = vpop.permute.xlu1 %2535 }
0x12c1   :  { %v2540_v26 = vmul.f32 %v4234_v12, %v2536_v52  ;;  %v2534_v24 = vpop.permute.xlu0 %2533 }
0x12c2   :  { %v2539_v25 = vmul.f32 %v4236_v22, %v2534_v24 }
0x12c3   :  { %2545 = vrot.lane.b32.xlu1 %v2540_v26, %s4311_s11 }
0x12c4   :  { %2543 = vrot.lane.b32.xlu0 %v2539_v25, %s4311_s11 }
0x1316   :  { %v1944_v28 = vpop.permute.xlu0 %1943 }
0x1317   :  { %v1949_v31 = vadd.f32 %v1944_v28, %v1929_v27 }
0x1319   :  { %4237 = vtanh.f32 %v1949_v31 }
0x131a   :  { %v1946_v7 = vpop.permute.xlu0 %1945 }
0x131b   :  { %v1950_v33 = vadd.f32 %v1946_v7, %v1930_v32 }
0x131d   :  { %4239 = vtanh.f32 %v1950_v33 }
0x1323   :  { %v4238_v34 = vpop.eup %4237 }
0x1324   :  { %1955 = vrot.lane.b32.xlu0 %v4238_v34, %s4311_s11 }
0x1326   :  { %v2243_v9 = vpop.permute.xlu1 %2242 }
0x1327   :  { %v4240_v35 = vpop.eup %4239  ;;  %v5118_v18 = vadd.f32 %v2243_v9, %v2228_v36 }
0x1328   :  { %1957 = vrot.lane.b32.xlu0 %v4240_v35, %s4311_s11 }
0x1329   :  { %4241 = vtanh.f32 %v5118_v18 }
0x132a   :  { %v2245_v37 = vpop.permute.xlu1 %2244 }
0x132b   :  { %v5122_v39 = vadd.f32 %v2245_v37, %v2229_v38 }
0x132d   :  { %4243 = vtanh.f32 %v5122_v39 }
0x1333   :  { %v4242_v16 = vpop.eup %4241 }
0x1334   :  { %2254 = vrot.lane.b32.xlu1 %v4242_v16, %s4311_s11 }
0x1335   :  { %v2546_v44 = vpop.permute.xlu1 %2545 }
0x1336   :  { %v5126_v19 = vadd.f32 %v2546_v44, %v2530_v40  ;;  %v2544_v47 = vpop.permute.xlu0 %2543 }
0x1337   :  { %v4244_v45 = vpop.eup %4243  ;;  %v5130_v41 = vadd.f32 %v2544_v47, %v2529_v46 }
0x1338   :  { %2256 = vrot.lane.b32.xlu1 %v4244_v45, %s4311_s11  ;;  %4245 = vtanh.f32 %v5126_v19 }
0x1339   :  { %4247 = vtanh.f32 %v5130_v41 }
0x1342   :  { %v4246_v57 = vpop.eup %4245 }
0x1343   :  { %2557 = vrot.lane.b32.xlu1 %v4246_v57, %s4311_s11  ;;  %v4248_v58 = vpop.eup %4247 }
0x1344   :  { %2555 = vrot.lane.b32.xlu0 %v4248_v58, %s4311_s11 }
0x1396   :  { %v1956_v49 = vpop.permute.xlu0 %1955 }
0x1397   :  { %v1961_v48 = vmul.f32 %v5095_v62, %v1956_v49 }
0x1399   :  { %2264 = vrot.lane.b32.xlu0 %v1961_v48, %s4313_s7 }
0x139a   :  { %v1958_v50 = vpop.permute.xlu0 %1957 }
0x139b   :  { %v1962_v61 = vmul.f32 %v5099_v5, %v1958_v50 }
0x139d   :  { %2266 = vrot.lane.b32.xlu0 %v1962_v61, %s4313_s7 }
0x13a6   :  { %v2255_v2 = vpop.permute.xlu1 %2254 }
0x13a7   :  { %v2260_v59 = vmul.f32 %v5103_v43, %v2255_v2 }
0x13a9   :  { %2272 = vrot.lane.b32.xlu1 %v2260_v59, %s4312_s27  ;;  %2563 = vrot.lane.b32.xlu0 %v2260_v59, %s4313_s7 }
0x13aa   :  { %v2257_v60 = vpop.permute.xlu1 %2256 }
0x13ab   :  { %v2261_v3 = vmul.f32 %v4232_v29, %v2257_v60 }
0x13ad   :  { %2274 = vrot.lane.b32.xlu1 %v2261_v3, %s4312_s27  ;;  %2565 = vrot.lane.b32.xlu0 %v2261_v3, %s4313_s7 }
0x13b5   :  { %v2558_v1 = vpop.permute.xlu1 %2557 }
0x13b6   :  { %v2556_v62 = vpop.permute.xlu0 %2555  ;;  %v2562_v5 = vmul.f32 %v4234_v12, %v2558_v1 }
0x13b7   :  { %v2561_v63 = vmul.f32 %v4236_v22, %v2556_v62 }
0x13b9   :  { %2571 = vrot.lane.b32.xlu1 %v2561_v63, %s4312_s27 }
0x13bd   :  { %2573 = vrot.lane.b32.xlu1 %v2562_v5, %s4312_s27 }
0x140b   :  { %v2265_v4 = vpop.permute.xlu0 %2264 }
0x140f   :  { %v2267_v51 = vpop.permute.xlu0 %2266 }
0x141b   :  { %v2273_v6 = vpop.permute.xlu1 %2272  ;;  %v2564_v10 = vpop.permute.xlu0 %2563 }
0x141c   :  { %v2278_v0 = vsel %vm330_vm3, %v2265_v4, %v2273_v6 }
0x141d   :  { %3721 = vmatprep.mubr.msk.f32.mxu0 %vm1109_vm4, %v2278_v0 }
0x141f   :  { %v2275_v54 = vpop.permute.xlu1 %2274  ;;  %v2566_v14 = vpop.permute.xlu0 %2565 }
0x1420   :  { %v2279_v8 = vsel %vm330_vm3, %v2267_v51, %v2275_v54 }
0x1421   :  { %3722 = vmatmul.mubr.msk.f32.vlgmr.msra.gmra.mrb[20].mxu0 %vm1109_vm4, %v2279_v8 }
0x1422   :  { %4018 = vmatpush3.bf16.msra.mxu0 %v5011_v55 }
0x1423   :  { %4020 = vmatprep.subr.bf16.mxu0 %v5039_v20 }
0x1426   :  { %4022 = vmatpush3.bf16.msra.mxu0 %v5039_v20 }
0x1427   :  { %4024 = vmatprep.subr.bf16.mxu0 %v5053_v15 }
0x142a   :  { %4026 = vmatpush3.bf16.msra.mxu0 %v5053_v15 }
0x142b   :  { %4028 = vmatprep.subr.bf16.mxu0 %v5063_v23  ;;  %v2572_v43 = vpop.permute.xlu1 %2571 }
0x142c   :  { %v2577_v11 = vsel %vm330_vm3, %v2564_v10, %v2572_v43 }
0x142d   :  { %3759 = vmatprep.mubr.msk.f32.mxu0 %vm1109_vm4, %v2577_v11 }
0x142e   :  { %4030 = vmatpush3.bf16.msra.mxu0 %v5063_v23 }
0x142f   :  { %v2574_v55 = vpop.permute.xlu1 %2573 }
0x1430   :  { %v2578_v42 = vsel %vm330_vm3, %v2566_v14, %v2574_v55 }
0x1431   :  { %3760 = vmatmul.mubr.msk.f32.vlgmr.msra.gmra.mrb[22].mxu0 %vm1109_vm4, %v2578_v42 }
0x14f4   :  { %v3723_v20 = vpop.f32.mrb[20].mxu0 }
0x14f5   :  { %v2352_v17 = vpop.f32.mrb[21].mxu0  ;;  %v2358_v29 = vadd.f32 %v3723_v20, %v4944_v56 }
0x14f6   :  { %v2353_v15 = vadd.f32 %v4944_v56, %v2352_v17 }
0x14f7   :  { %v3219_v24 = vmul.f32 -1.442695, %v2358_v29 }
0x14f8   :  { %4249 = vtanh.f32 %v2353_v15  ;;  %v3218_v22 = vmul.f32 -1.442695, %v2353_v15 }
0x14f9   :  { %4251 = vtanh.f32 %v2358_v29 }
0x1502   :  { %v4250_v13 = vpop.eup %4249 }
0x1503   :  { %2379 = vrot.lane.b32.xlu0 %v4250_v13, %s4311_s11  ;;  %v4252_v23 = vpop.eup %4251 }
0x1504   :  { %v3761_v21 = vpop.f32.mrb[22].mxu0 }
0x1505   :  { %v2651_v53 = vpop.f32.mrb[23].mxu0  ;;  %v2657_v52 = vadd.f32 %v3761_v21, %v5087_v30 }
0x1506   :  { %v2652_v12 = vadd.f32 %v5087_v30, %v2651_v53 }
0x1507   :  { %2381 = vrot.lane.b32.xlu0 %v4252_v23, %s4311_s11  ;;  %v3237_v7 = vmul.f32 -1.442695, %v2657_v52 }
0x1508   :  { %4253 = vtanh.f32 %v2652_v12  ;;  %v3236_v31 = vmul.f32 -1.442695, %v2652_v12 }
0x1509   :  { %4255 = vtanh.f32 %v2657_v52 }
0x150a   :  { %4257 = vpow2.f32 %v3218_v22 }
0x150b   :  { %4259 = vpow2.f32 %v3219_v24 }
0x1512   :  { %v4254_v26 = vpop.eup %4253 }
0x1513   :  { %2678 = vrot.lane.b32.xlu1 %v4254_v26, %s4311_s11  ;;  %v4256_v56 = vpop.eup %4255 }
0x1514   :  { %v4258_v25 = vpop.eup %4257 }
0x1515   :  { %v2367_v27 = vadd.f32 1.0, %v4258_v25  ;;  %v4260_v28 = vpop.eup %4259 }
0x1516   :  { %v2368_v32 = vadd.f32 1.0, %v4260_v28 }
0x1517   :  { %2680 = vrot.lane.b32.xlu1 %v4256_v56, %s4311_s11  ;;  %4261 = vrcp.f32 %v2367_v27 }
0x1518   :  { %4263 = vpow2.f32 %v3236_v31 }
0x1519   :  { %4265 = vrcp.f32 %v2368_v32 }
0x151a   :  { %4267 = vpow2.f32 %v3237_v7 }
0x1521   :  { %v4262_v33 = vpop.eup %4261 }
0x1522   :  { %v4264_v36 = vpop.eup %4263  ;;  %v2375_v48 = vmul.f32 %v4262_v33, %v5118_v18 }
0x1523   :  { %v4266_v9 = vpop.eup %4265  ;;  %v2666_v37 = vadd.f32 1.0, %v4264_v36 }
0x1524   :  { %v4268_v40 = vpop.eup %4267  ;;  %v2376_v2 = vmul.f32 %v4266_v9, %v5122_v39 }
0x1525   :  { %v2667_v44 = vadd.f32 1.0, %v4268_v40  ;;  %4269 = vrcp.f32 %v2666_v37  ;;  %v2906_v37 = vld [vmem:[%s5276_s16] sm:$0xff]  ;;  %v2908_v40 = vld [vmem:[%s5276_s16 + $0x10] sm:$0xff] }
0x1527   :  { %4271 = vrcp.f32 %v2667_v44 }
0x152f   :  { %v4270_v45 = vpop.eup %4269 }
0x1530   :  { %v2674_v63 = vmul.f32 %v4270_v45, %v5130_v41 }
0x1531   :  { %v4272_v57 = vpop.eup %4271 }
0x1532   :  { %v2675_v18 = vmul.f32 %v4272_v57, %v5126_v19 }
0x1575   :  { %v2380_v34 = vpop.permute.xlu0 %2379 }
0x1576   :  { %v2385_v35 = vmul.f32 %v4262_v33, %v2380_v34 }
0x1578   :  { %2389 = vrot.lane.b32.xlu0 %v2385_v35, %s4311_s11 }
0x1579   :  { %v2382_v38 = vpop.permute.xlu0 %2381 }
0x157a   :  { %v2386_v16 = vmul.f32 %v4266_v9, %v2382_v38 }
0x157c   :  { %2391 = vrot.lane.b32.xlu0 %v2386_v16, %s4311_s11  ;;  %v2907_v16 = vld [vmem:[%s5276_s16 + $0x8] sm:$0xff] }
0x157d   :  { %v4047_v44 = vpack.c.bf16 %v2907_v16, %v2906_v37 }
0x157f   :  { %4048 = vmatprep.subr.bf16.mxu0 %v4047_v44 }
0x1580   :  { %4050 = vmatpush3.bf16.msra.mxu0 %v4047_v44 }
0x1585   :  { %v2679_v46 = vpop.permute.xlu1 %2678 }
0x1586   :  { %v2684_v47 = vmul.f32 %v4270_v45, %v2679_v46 }
0x1588   :  { %2688 = vrot.lane.b32.xlu1 %v2684_v47, %s4311_s11 }
0x1589   :  { %v2681_v58 = vpop.permute.xlu1 %2680 }
0x158a   :  { %v2685_v49 = vmul.f32 %v4272_v57, %v2681_v58  ;;  %v4314_v58 = vmov 0  }
0x158b   :  { %4068 = vset.pattern.permute.xlu1 %v4314_v58  ;;  %4067 = vset.pattern.permute.xlu0 %v4314_v58 }
0x158c   :  { %2690 = vrot.lane.b32.xlu1 %v2685_v49, %s4311_s11 }
0x15ea   :  { %v2390_v50 = vpop.permute.xlu0 %2389 }
0x15eb   :  { %v2395_v61 = vadd.f32 %v2390_v50, %v2375_v48 }
0x15ed   :  { %4273 = vtanh.f32 %v2395_v61 }
0x15ee   :  { %v2392_v59 = vpop.permute.xlu0 %2391 }
0x15ef   :  { %v2396_v60 = vadd.f32 %v2392_v59, %v2376_v2 }
0x15f1   :  { %4275 = vtanh.f32 %v2396_v60  ;;  %v4305_v60 = vld [vmem:[%s5292_s28 + $0x10] sm:$0xff] }
0x15f7   :  { %v4274_v3 = vpop.eup %4273 }
0x15f8   :  { %2401 = vrot.lane.b32.xlu0 %v4274_v3, %s4311_s11  ;;  %v4306_v3 = vld [vmem:[%s5292_s28] sm:$0xff] }
0x15fa   :  { %v2689_v1 = vpop.permute.xlu1 %2688 }
0x15fb   :  { %v4276_v62 = vpop.eup %4275  ;;  %v2694_v5 = vadd.f32 %v2689_v1, %v2674_v63  ;;  %v4308_v63 = vld [vmem:[%s5292_s28 + $0x18] sm:$0xff]  ;;  %v4309_v1 = vld [vmem:[%s5292_s28 + $0x20] sm:$0xff] }
0x15fc   :  { %2403 = vrot.lane.b32.xlu0 %v4276_v62, %s4311_s11  ;;  %v4307_v62 = vld [vmem:[%s5292_s28 + $0x8] sm:$0xff] }
0x15fd   :  { %4277 = vtanh.f32 %v2694_v5 }
0x15fe   :  { %v2691_v4 = vpop.permute.xlu1 %2690 }
0x15ff   :  { %v2695_v6 = vadd.f32 %v2691_v4, %v2675_v18 }
0x1601   :  { %4279 = vtanh.f32 %v2695_v6 }
0x1607   :  { %v4278_v39 = vpop.eup %4277 }
0x1608   :  { %2700 = vrot.lane.b32.xlu1 %v4278_v39, %s4311_s11  ;;  %v3007_v39 = vld [vmem:[%s5277_s19 + $0x8] sm:$0xff] }
0x160b   :  { %v4280_v0 = vpop.eup %4279 }
0x160c   :  { %2702 = vrot.lane.b32.xlu1 %v4280_v0, %s4311_s11 }
0x166a   :  { %v2402_v51 = vpop.permute.xlu0 %2401 }
0x166b   :  { %v2407_v54 = vmul.f32 %v4262_v33, %v2402_v51  ;;  %v3008_v51 = vld [vmem:[%s5277_s19 + $0x10] sm:$0xff] }
0x166d   :  { %2710 = vrot.lane.b32.xlu0 %v2407_v54, %s4313_s7  ;;  %v3009_v54 = vld [vmem:[%s5277_s19 + $0x18] sm:$0xff] }
0x166e   :  { %v2404_v41 = vpop.permute.xlu0 %2403 }
0x166f   :  { %v2408_v8 = vmul.f32 %v4266_v9, %v2404_v41  ;;  %v4059_v41 = vpack.c.bf16 %v3009_v54, %v3008_v51 }
0x1671   :  { %2712 = vrot.lane.b32.xlu0 %v2408_v8, %s4313_s7  ;;  %v26_v8 = vstv %s5278_s20 }
0x1672   :  { %27 = vst [vmem:[#allocation2] sm:$0x1] %v26_v8 }
0x1679   :  { %v3245_v37 = vld [vmem:[#allocation2] ss:$0 sm:$0xff] }
0x167a   :  { %v2701_v10 = vpop.permute.xlu1 %2700 }
0x167b   :  { %v2706_v43 = vmul.f32 %v4270_v45, %v2701_v10  ;;  %v2909_v45 = vld [vmem:[%s5276_s16 + $0x18] sm:$0xff]  ;;  %v2866_v10 = vlaneseq }
0x167c   :  { %v4051_v46 = vpack.c.bf16 %v2909_v45, %v2908_v40 }
0x167d   :  { %2718 = vrot.lane.b32.xlu1 %v2706_v43, %s4312_s27  ;;  %v2867_v43 = vshrl.u32 %v2866_v10, 7 }
0x167e   :  { %v2703_v19 = vpop.permute.xlu1 %2702  ;;  %4052 = vmatprep.subr.bf16.mxu0 %v4051_v46 }
0x167f   :  { %v2707_v11 = vmul.f32 %v4272_v57, %v2703_v19  ;;  %4054 = vmatpush3.bf16.msra.mxu0 %v4051_v46 }
0x1681   :  { %2720 = vrot.lane.b32.xlu1 %v2707_v11, %s4312_s27 }
0x16df   :  { %v2711_v14 = vpop.permute.xlu0 %2710 }
0x16e3   :  { %v2713_v20 = vpop.permute.xlu0 %2712 }
0x16ef   :  { %v2719_v55 = vpop.permute.xlu1 %2718 }
0x16f0   :  { %v2724_v42 = vsel %vm330_vm3, %v2711_v14, %v2719_v55  ;;  %v2884_v14 = vsub.s32 1, %v2867_v43  ;;  %v2868_v55 = vsub.s32 0, %v2867_v43 }
0x16f1   :  { %3778 = vmatprep.mubr.msk.f32.mxu1 %vm1109_vm4, %v2724_v42  ;;  %v2857_v42 = vld [vmem:[%s5279_s17] sm:$0x7] }
0x16f3   :  { %v2721_v17 = vpop.permute.xlu1 %2720 }
0x16f4   :  { %v2725_v15 = vsel %vm330_vm3, %v2713_v20, %v2721_v17  ;;  %v2885_v17 = vrot.slane %v2857_v42, %v2884_v14 }
0x16f5   :  { %3779 = vmatmul.mubr.msk.f32.vlgmr.msra.gmra.mrb[34].mxu1 %vm1109_vm4, %v2725_v15  ;;  %v2869_v15 = vrot.slane %v2857_v42, %v2868_v55 }
0x17c8   :  { %v3780_v29 = vpop.f32.mrb[34].mxu1 }
0x17c9   :  { %v2804_v13 = vadd.f32 %v3780_v29, %v5087_v30  ;;  %v2798_v23 = vpop.f32.mrb[35].mxu1 }
0x17ca   :  { %v2799_v21 = vadd.f32 %v5087_v30, %v2798_v23 }
0x17cb   :  { %4281 = vtanh.f32 %v2804_v13  ;;  %v3241_v52 = vmul.f32 -1.442695, %v2804_v13  ;;  %v2900_v13 = vsub.s32 2, %v2867_v43 }
0x17cc   :  { %4283 = vtanh.f32 %v2799_v21  ;;  %v3240_v26 = vmul.f32 -1.442695, %v2799_v21 }
0x17cd   :  { %4285 = vpow2.f32 %v3241_v52 }
0x17ce   :  { %4287 = vpow2.f32 %v3240_v26 }
0x17d5   :  { %v4282_v53 = vpop.eup %4281 }
0x17d6   :  { %v4284_v12 = vpop.eup %4283  ;;  %2827 = vrot.lane.b32.xlu1 %v4282_v53, %s4311_s11  ;;  %v2901_v53 = vrot.slane %v2857_v42, %v2900_v13 }
0x17d7   :  { %2825 = vrot.lane.b32.xlu0 %v4284_v12, %s4311_s11  ;;  %v4286_v56 = vpop.eup %4285 }
0x17d8   :  { %v4288_v22 = vpop.eup %4287  ;;  %v2814_v24 = vadd.f32 1.0, %v4286_v56 }
0x17d9   :  { %v2813_v25 = vadd.f32 1.0, %v4288_v22 }
0x17da   :  { %4289 = vrcp.f32 %v2814_v24 }
0x17db   :  { %4291 = vrcp.f32 %v2813_v25 }
0x17e4   :  { %v4290_v27 = vpop.eup %4289 }
0x17e5   :  { %v4292_v28 = vpop.eup %4291  ;;  %v2822_v33 = vmul.f32 %v4290_v27, %v2695_v6  ;;  %v3006_v6 = vld [vmem:[%s5277_s19] sm:$0xff] }
0x17e6   :  { %v2821_v35 = vmul.f32 %v4292_v28, %v2694_v5  ;;  %v4310_v5 = vld [vmem:[%s5292_s28 + $0x28] sm:$0xff]  ;;  %v4055_v0 = vpack.c.bf16 %v3007_v39, %v3006_v6 }
0x17e8   :  { %4056 = vmatprep.subr.bf16.mxu0 %v4055_v0 }
0x1848   :  { %v2828_v30 = vpop.permute.xlu1 %2827 }
0x1849   :  { %v2832_v31 = vmul.f32 %v4290_v27, %v2828_v30  ;;  %v2826_v32 = vpop.permute.xlu0 %2825 }
0x184a   :  { %v2831_v7 = vmul.f32 %v4292_v28, %v2826_v32 }
0x184b   :  { %2837 = vrot.lane.b32.xlu1 %v2832_v31, %s4311_s11  ;;  %v3244_v31 = vld [vmem:[%s5280_s18] ss:$0 sm:$0xff] }
0x184c   :  { %2835 = vrot.lane.b32.xlu0 %v2831_v7, %s4311_s11 }
0x18bd   :  { %v2838_v34 = vpop.permute.xlu1 %2837 }
0x18be   :  { %v2842_v36 = vadd.f32 %v2838_v34, %v2822_v33  ;;  %v2836_v9 = vpop.permute.xlu0 %2835 }
0x18bf   :  { %v2841_v38 = vadd.f32 %v2836_v9, %v2821_v35 }
0x18c0   :  { %4293 = vtanh.f32 %v2842_v36 }
0x18c1   :  { %4295 = vtanh.f32 %v2841_v38 }
0x18ca   :  { %v4294_v47 = vpop.eup %4293 }
0x18cb   :  { %v4296_v57 = vpop.eup %4295  ;;  %2849 = vrot.lane.b32.xlu1 %v4294_v47, %s4311_s11 }
0x18cc   :  { %2847 = vrot.lane.b32.xlu0 %v4296_v57, %s4311_s11 }
0x193d   :  { %v2850_v49 = vpop.permute.xlu1 %2849 }
0x193e   :  { %v2854_v48 = vmul.f32 %v4290_v27, %v2850_v49  ;;  %v2848_v50 = vpop.permute.xlu0 %2847 }
0x193f   :  { %v2853_v61 = vmul.f32 %v4292_v28, %v2848_v50 }
0x1940   :  { %v2856_v2 = vmax.f32 %v2854_v48, 0.0 }
0x1941   :  { %v2855_v59 = vmax.f32 %v2853_v61, 0.0 }
0x1942   :  { %2914 = vrot.lane.b32.xlu1 %v2856_v2, %s4313_s7 }
0x1943   :  { %2912 = vrot.lane.b32.xlu0 %v2855_v59, %s4313_s7 }
0x1946   :  { %2875 = vperm.xlu1 %4068, %v4305_v60  }
0x1947   :  { %2859 = vperm.xlu0 %4067, %v4306_v3  }
0x194a   :  { %2863 = vperm.xlu1 %4068, %v4307_v62  }
0x194b   :  { %2879 = vperm.xlu0 %4067, %v4308_v63  }
0x194e   :  { %2891 = vperm.xlu1 %4068, %v4309_v1  }
0x194f   :  { %2895 = vperm.xlu0 %4067, %v4310_v5  }
0x19b4   :  { %v2915_v4 = vpop.permute.xlu1 %2914 }
0x19b5   :  { %v2913_v18 = vpop.permute.xlu0 %2912 }
0x19b6   :  { %3789 = vmatprep.mubr.msk.f32.mxu0 %vm330_vm3, %v2913_v18 }
0x19b7   :  { %3790 = vmatmul.mubr.msk.f32.vlgmr.msra.gmra.mrb[24].mxu0 %vm330_vm3, %v2915_v4 }
0x19b8   :  { %4058 = vmatpush3.bf16.msra.mxu0 %v4055_v0 }
0x19b9   :  { %4060 = vmatprep.subr.bf16.mxu0 %v4059_v41 }
0x19bc   :  { %4062 = vmatpush3.bf16.msra.mxu0 %v4059_v41 }
0x19c5   :  { %v2876_v11 = vpop.permute.xlu1 %2875 }
0x19c6   :  { %v2860_v19 = vpop.permute.xlu0 %2859  ;;  %v2886_v12 = vmul.f32 %v2885_v17, %v2876_v11 }
0x19c7   :  { %v2870_v52 = vmul.f32 %v2869_v15, %v2860_v19 }
0x19c9   :  { %v2864_v29 = vpop.permute.xlu1 %2863  ;;  %v2888_v25 = vadd.f32 %v2886_v12, %v2870_v52 }
0x19ca   :  { %v2880_v20 = vpop.permute.xlu0 %2879  ;;  %v2871_v23 = vmul.f32 %v2869_v15, %v2864_v29 }
0x19cb   :  { %v2887_v21 = vmul.f32 %v2885_v17, %v2880_v20 }
0x19cd   :  { %v2892_v56 = vpop.permute.xlu1 %2891  ;;  %v2889_v22 = vadd.f32 %v2887_v21, %v2871_v23 }
0x19ce   :  { %v2896_v26 = vpop.permute.xlu0 %2895  ;;  %v2902_v27 = vmul.f32 %v2901_v53, %v2892_v56 }
0x19cf   :  { %v2903_v24 = vmul.f32 %v2901_v53, %v2896_v26 }
0x19d0   :  { %v2904_v32 = vadd.f32 %v2902_v27, %v2888_v25 }
0x19d1   :  { %v2905_v30 = vadd.f32 %v2903_v24, %v2889_v22 }
0x1a8a   :  { %v3791_v28 = vpop.f32.mrb[24].mxu0 }
0x1a8b   :  { %v2992_v7 = vadd.f32 %v3791_v28, %v2905_v30  ;;  %v2986_v33 = vpop.f32.mrb[25].mxu0 }
0x1a8c   :  { %v2987_v34 = vadd.f32 %v2986_v33, %v2904_v32 }
0x1a8d   :  { %v3003_v35 = vadd.f32 %v3244_v31, %v2992_v7 }
0x1a8e   :  { %v3002_v36 = vadd.f32 %v3244_v31, %v2987_v34 }
0x1a8f   :  { %v3005_v38 = vmax.f32 %v3003_v35, 0.0 }
0x1a90   :  { %v3004_v9 = vmax.f32 %v3002_v36, 0.0 }
0x1a92   :  { %3800 = vmatprep.mubr.msk.f32.mxu0 %vm330_vm3, %v3004_v9 }
0x1a93   :  { %3801 = vmatmul.mubr.msk.f32.vlgmr.msra.gmra.mrb[26].mxu0 %vm330_vm3, %v3005_v38 }
0x1b66   :  { %v3802_v16 = vpop.f32.mrb[26].mxu0 }
0x1b67   :  { %v3095_v40 = vadd.f32 %v3802_v16, %v3245_v37  ;;  %v3089_v44 = vpop.f32.mrb[27].mxu0 }
0x1b68   :  { %v3090_v45 = vadd.f32 %v3245_v37, %v3089_v44 }
0x1b69   :  { %v3249_v46 = vmul.f32 -1.442695, %v3095_v40 }
0x1b6a   :  { %v3248_v47 = vmul.f32 -1.442695, %v3090_v45 }
0x1b6b   :  { %4297 = vpow2.f32 %v3249_v46 }
0x1b6c   :  { %4299 = vpow2.f32 %v3248_v47 }
0x1b75   :  { %v4298_v57 = vpop.eup %4297 }
0x1b76   :  { %v4300_v58 = vpop.eup %4299  ;;  %v3105_v49 = vadd.f32 1.0, %v4298_v57 }
0x1b77   :  { %v3104_v48 = vadd.f32 1.0, %v4300_v58 }
0x1b78   :  { %4301 = vrcp.f32 %v3105_v49 }
0x1b79   :  { %4303 = vrcp.f32 %v3104_v48 }
0x1b82   :  { %v4302_v50 = vpop.eup %4301 }
0x1b83   :  { %v4304_v61 = vpop.eup %4303  ;;  %3112 = vst.msk [vmem:[%s5281_s21 + $0x8] sm:$0xff] %vm3110_vm5, %v4302_v50 }
0x1b84   :  { %3111 = vst.msk [vmem:[%s5281_s21] sm:$0xff] %vm3110_vm5, %v4304_v61 }

</bundles_post_ra>
